<compile_context>
chip_gen: v7x
topology: tpu7x:2x2x1
jax: 0.10.0
libtpu: 0.0.40
codegen_flags: <defaults>
</compile_context>

<pallas_src>
import jax
import jax.numpy as jnp
from jax.experimental import pallas as pl
from jax.experimental.pallas import tpu as pltpu

IN_F = 12    # input features
HID_F = 50   # hidden features
OUT_F = 12   # output features
HP = 64      # padded hidden width (50 -> 64), sublane-aligned, MXU-friendly

_PREC = jax.lax.Precision.HIGHEST


def _mlp_kernel(y_ref, w_ref, b_ref, o_ref):
    # y_ref: (TB, 12) batch-major tile.
    # w_ref: (4, HP, HP) packed weights (in-major x out-major), VMEM-resident.
    # b_ref: (4, HP) packed biases, VMEM-resident.
    y = y_ref[...]                                            # (TB, IN_F) f32

    h = jnp.tanh(
        jnp.dot(y, w_ref[0, :IN_F, :],
                precision=_PREC, preferred_element_type=jnp.float32)
        + b_ref[0:1, :])                                      # (TB, HP)
    h = jnp.tanh(
        jnp.dot(h, w_ref[1],
                precision=_PREC, preferred_element_type=jnp.float32)
        + b_ref[1:2, :])                                      # (TB, HP)
    h = jnp.tanh(
        jnp.dot(h, w_ref[2],
                precision=_PREC, preferred_element_type=jnp.float32)
        + b_ref[2:3, :])                                      # (TB, HP)
    out = (jnp.dot(h, w_ref[3, :, :OUT_F],
                   precision=_PREC, preferred_element_type=jnp.float32)
           + b_ref[3:4, :OUT_F])                              # (TB, OUT_F)

    o_ref[...] = out.astype(o_ref.dtype)


def _pack_params(params):
    """Pack the 4 (W, b) pairs into w_all (4, HP, HP) / b_all (4, HP), zero-padded.

    Weights are stored (in, out) so `y @ W` matches PyTorch's `y @ W_pt.T`.
    Zero padding is exact: padded rows/cols contribute nothing and tanh(0)=0.
    """
    w_all = jnp.zeros((4, HP, HP), jnp.float32)
    b_all = jnp.zeros((4, HP), jnp.float32)
    for l, (w, b) in enumerate(params):
        fi, fo = w.shape
        w_all = w_all.at[l, :fi, :fo].set(w.astype(jnp.float32))
        b_all = b_all.at[l, :fo].set(b.reshape(-1).astype(jnp.float32))
    return w_all, b_all


def _is_megacore_part():
    # v7x has 2 TensorCores per chip; v5e/v6e have 1.
    try:
        kind = jax.devices()[0].device_kind.lower()
        return ("v7" in kind) or ("7x" in kind)
    except Exception:
        return False


def neural_ode_forward(t, y, params, batch_tile=4096):
    """Forward pass of neuralODE. `t` is accepted but unused (as in PyTorch)."""
    del t
    y = y.astype(jnp.float32)                 # mirrors `y.float()`
    B, fin = y.shape
    assert fin == IN_F

    # Batch tile: multiple of 128 lanes, clamped to the (128-rounded) batch.
    bt = max(128, (int(batch_tile) // 128) * 128)
    TB = max(128, min(bt, pl.cdiv(B, 128) * 128))
    Bp = pl.cdiv(B, TB) * TB
    nb = Bp // TB

    # v7x megacore: make sure the "parallel" batch axis has >= 2 steps so both
    # TensorCores get work. On single-TC parts (v5e/v6e) keep fewest/largest tiles.
    if nb == 1 and Bp >= 256 and _is_megacore_part():
        TB = pl.cdiv(pl.cdiv(Bp, 2), 128) * 128
        Bp = pl.cdiv(B, TB) * TB
        nb = Bp // TB

    w_all, b_all = _pack_params(params)

    # Only pad the (tiny) batch axis when needed; features stay at 12 in HBM.
    if Bp != B:
        y_in = jnp.zeros((Bp, IN_F), jnp.float32).at[:B].set(y)
    else:
        y_in = y

    out = pl.pallas_call(
        _mlp_kernel,
        out_shape=jax.ShapeDtypeStruct((Bp, OUT_F), jnp.float32),
        grid=(nb,),
        in_specs=[
            pl.BlockSpec((TB, IN_F), lambda i: (i, 0)),        # y tile (batch-major)
            pl.BlockSpec(w_all.shape, lambda i: (0, 0, 0)),    # resident weights
            pl.BlockSpec(b_all.shape, lambda i: (0, 0)),       # resident biases
        ],
        out_specs=pl.BlockSpec((TB, OUT_F), lambda i: (i, 0)),
        compiler_params=pltpu.CompilerParams(
            dimension_semantics=("parallel",)),
    )(y_in, w_all, b_all)

    return out if Bp == B else out[:B]


def _xavier_uniform(key, fan_in, fan_out, dtype=jnp.float32):
    # Matches torch.nn.init.xavier_uniform_ bounds (gain=1).
    bound = jnp.sqrt(6.0 / (fan_in + fan_out))
    # Stored as (in, out) so math is y @ W (== y @ W_pt.T in PyTorch terms).
    return jax.random.uniform(key, (fan_in, fan_out), dtype=dtype,
                              minval=-bound, maxval=bound)


def init_params(key):
    dims = [(IN_F, HID_F), (HID_F, HID_F), (HID_F, HID_F), (HID_F, OUT_F)]
    keys = jax.random.split(key, len(dims))
    params = []
    for k, (fi, fo) in zip(keys, dims):
        params.append((_xavier_uniform(k, fi, fo), jnp.zeros((fo,), jnp.float32)))
    return params


if __name__ == "__main__":
    key = jax.random.PRNGKey(0)
    pkey, ykey = jax.random.split(key)

    params = init_params(pkey)

    batch = 200                        # pads to 256 rows -> 1-2 grid steps
    y = jax.random.normal(ykey, (batch, IN_F), dtype=jnp.float32)
    t = jnp.float32(0.0)               # unused by forward, matching PyTorch

    out = neural_ode_forward(t, y, params)
    out = jax.block_until_ready(out)

    # Pure-JAX reference check (same math, same matmul precision, outside Pallas).
    h = y
    for i, (w, b) in enumerate(params):
        h = jnp.dot(h, w, precision=_PREC) + b
        if i < 3:
            h = jnp.tanh(h)
    assert out.shape == (batch, OUT_F)
    max_err = float(jnp.max(jnp.abs(out - h)))
    assert jnp.allclose(out, h, atol=1e-4, rtol=1e-4), max_err

    print("KERNEL_OK")
</pallas_src>

<mosaic_0001>
module attributes {stable_mosaic.version = 11 : i64} {
  func.func @_mlp_kernel(%arg0: i32, %arg1: memref<256x12xf32, #tpu.memory_space<vmem>>, %arg2: memref<4x64x64xf32, #tpu.memory_space<vmem>>, %arg3: memref<4x64xf32, #tpu.memory_space<vmem>>, %arg4: memref<256x12xf32, #tpu.memory_space<vmem>>) attributes {dimension_semantics = [#tpu.dimension_semantics<parallel>], iteration_bounds = array<i64: 1>, scalar_prefetch = 0 : i64, scratch_operands = 0 : i64, tpu.core_type = #tpu.core_type<tc>, window_params = [{transform_indices = @transform_0, window_bounds = array<i64: 256, 12>}, {pipeline_mode = #tpu.pipeline_mode<synchronous>, transform_indices = @transform_1, window_bounds = array<i64: 4, 64, 64>}, {pipeline_mode = #tpu.pipeline_mode<synchronous>, transform_indices = @transform_2, window_bounds = array<i64: 4, 64>}, {transform_indices = @transform_3, window_bounds = array<i64: 256, 12>}]} {
    %c0 = arith.constant 0 : index
    %c0_0 = arith.constant 0 : index
    %0 = vector.load %arg1[%c0, %c0_0] : memref<256x12xf32, #tpu.memory_space<vmem>>, vector<256x12xf32>
    %c0_1 = arith.constant 0 : index
    %c0_2 = arith.constant 0 : index
    %c0_3 = arith.constant 0 : index
    %1 = vector.load %arg2[%c0_1, %c0_2, %c0_3] : memref<4x64x64xf32, #tpu.memory_space<vmem>>, vector<1x12x64xf32>
    %2 = vector.shape_cast %1 : vector<1x12x64xf32> to vector<12x64xf32>
    %cst = arith.constant dense<0.000000e+00> : vector<256x64xf32>
    %3 = tpu.matmul %0, %2, %cst {dimension_numbers = #tpu.dot_dimension_numbers<[1], [0], [0], [1], [0, 0, 1, 1], [], []>, precision = #tpu.contract_precision<fp32>} : vector<256x12xf32>, vector<12x64xf32>, vector<256x64xf32> -> vector<256x64xf32>
    %c0_4 = arith.constant 0 : index
    %c0_5 = arith.constant 0 : index
    %4 = vector.load %arg3[%c0_4, %c0_5] : memref<4x64xf32, #tpu.memory_space<vmem>>, vector<1x64xf32>
    %5 = vector.broadcast %4 : vector<1x64xf32> to vector<256x64xf32>
    %6 = arith.addf %3, %5 : vector<256x64xf32>
    %7 = math.tanh %6 : vector<256x64xf32>
    %c1 = arith.constant 1 : index
    %c0_6 = arith.constant 0 : index
    %c0_7 = arith.constant 0 : index
    %8 = vector.load %arg2[%c1, %c0_6, %c0_7] : memref<4x64x64xf32, #tpu.memory_space<vmem>>, vector<1x64x64xf32>
    %9 = vector.shape_cast %8 : vector<1x64x64xf32> to vector<64x64xf32>
    %cst_8 = arith.constant dense<0.000000e+00> : vector<256x64xf32>
    %10 = tpu.matmul %7, %9, %cst_8 {dimension_numbers = #tpu.dot_dimension_numbers<[1], [0], [0], [1], [0, 0, 1, 1], [], []>, precision = #tpu.contract_precision<fp32>} : vector<256x64xf32>, vector<64x64xf32>, vector<256x64xf32> -> vector<256x64xf32>
    %c1_9 = arith.constant 1 : index
    %c0_10 = arith.constant 0 : index
    %11 = vector.load %arg3[%c1_9, %c0_10] : memref<4x64xf32, #tpu.memory_space<vmem>>, vector<1x64xf32>
    %12 = vector.broadcast %11 : vector<1x64xf32> to vector<256x64xf32>
    %13 = arith.addf %10, %12 : vector<256x64xf32>
    %14 = math.tanh %13 : vector<256x64xf32>
    %c2 = arith.constant 2 : index
    %c0_11 = arith.constant 0 : index
    %c0_12 = arith.constant 0 : index
    %15 = vector.load %arg2[%c2, %c0_11, %c0_12] : memref<4x64x64xf32, #tpu.memory_space<vmem>>, vector<1x64x64xf32>
    %16 = vector.shape_cast %15 : vector<1x64x64xf32> to vector<64x64xf32>
    %cst_13 = arith.constant dense<0.000000e+00> : vector<256x64xf32>
    %17 = tpu.matmul %14, %16, %cst_13 {dimension_numbers = #tpu.dot_dimension_numbers<[1], [0], [0], [1], [0, 0, 1, 1], [], []>, precision = #tpu.contract_precision<fp32>} : vector<256x64xf32>, vector<64x64xf32>, vector<256x64xf32> -> vector<256x64xf32>
    %c2_14 = arith.constant 2 : index
    %c0_15 = arith.constant 0 : index
    %18 = vector.load %arg3[%c2_14, %c0_15] : memref<4x64xf32, #tpu.memory_space<vmem>>, vector<1x64xf32>
    %19 = vector.broadcast %18 : vector<1x64xf32> to vector<256x64xf32>
    %20 = arith.addf %17, %19 : vector<256x64xf32>
    %21 = math.tanh %20 : vector<256x64xf32>
    %c3 = arith.constant 3 : index
    %c0_16 = arith.constant 0 : index
    %c0_17 = arith.constant 0 : index
    %22 = vector.load %arg2[%c3, %c0_16, %c0_17] : memref<4x64x64xf32, #tpu.memory_space<vmem>>, vector<1x64x12xf32>
    %23 = vector.shape_cast %22 : vector<1x64x12xf32> to vector<64x12xf32>
    %cst_18 = arith.constant dense<0.000000e+00> : vector<256x12xf32>
    %24 = tpu.matmul %21, %23, %cst_18 {dimension_numbers = #tpu.dot_dimension_numbers<[1], [0], [0], [1], [0, 0, 1, 1], [], []>, precision = #tpu.contract_precision<fp32>} : vector<256x64xf32>, vector<64x12xf32>, vector<256x12xf32> -> vector<256x12xf32>
    %c3_19 = arith.constant 3 : index
    %c0_20 = arith.constant 0 : index
    %25 = vector.load %arg3[%c3_19, %c0_20] : memref<4x64xf32, #tpu.memory_space<vmem>>, vector<1x12xf32>
    %26 = vector.broadcast %25 : vector<1x12xf32> to vector<256x12xf32>
    %27 = arith.addf %24, %26 : vector<256x12xf32>
    %c0_21 = arith.constant 0 : index
    %c0_22 = arith.constant 0 : index
    %28 = vector.load %arg4[%c0_21, %c0_22] : memref<256x12xf32, #tpu.memory_space<vmem>>, vector<256x12xf32>
    tpu.vector_store %arg4[%c0_21, %c0_22], %27 {strides = array<i32>} : memref<256x12xf32, #tpu.memory_space<vmem>>, vector<256x12xf32>,
    return
  }
  func.func @transform_0(%arg0: i32) -> (i32, i32) {
    %c0_i32 = arith.constant 0 : i32
    %c0_i32_0 = arith.constant 0 : i32
    return %arg0, %c0_i32 : i32, i32
  }
  func.func @transform_1(%arg0: i32) -> (i32, i32, i32) {
    %c0_i32 = arith.constant 0 : i32
    %c0_i32_0 = arith.constant 0 : i32
    %c0_i32_1 = arith.constant 0 : i32
    %c0_i32_2 = arith.constant 0 : i32
    return %c0_i32, %c0_i32_0, %c0_i32_1 : i32, i32, i32
  }
  func.func @transform_2(%arg0: i32) -> (i32, i32) {
    %c0_i32 = arith.constant 0 : i32
    %c0_i32_0 = arith.constant 0 : i32
    %c0_i32_1 = arith.constant 0 : i32
    return %c0_i32, %c0_i32_0 : i32, i32
  }
  func.func @transform_3(%arg0: i32) -> (i32, i32) {
    %c0_i32 = arith.constant 0 : i32
    %c0_i32_0 = arith.constant 0 : i32
    return %arg0, %c0_i32 : i32, i32
  }
}

</mosaic_0001>

<bundles_post_ra>
// kernel: tpu_custom_call.1
= control target key start
LH: loop header
LB: loop body
LE: loop exit
PB: predicated region body
PF: predicated region fallthrough
CT: control target
= control target key end

     0   :  { %vm150_vm0 = vcmask 1043456   ;;  %vm53_vm1 = vcmask 97280   ;;  %vm1992_vm2 = vcmask 523264   ;;  %s14753_s1 = inlined_call_operand.vmem [shape: f32[4,64,64], index: 1, kind: input, shape index: {}]   ;;  %s14754_s0 = inlined_call_operand.vmem [shape: f32[256,12], index: 0, kind: input, shape index: {}]   ;;  %s14755_s2 = inlined_call_operand.vmem [shape: f32[4,64], index: 2, kind: input, shape index: {}]   ;;  %s14756_s3 = inlined_call_operand.vmem [shape: f32[256,12], index: 3, kind: output, shape index: {}]  }
   0x1   :  { %v46_v0 = vld [vmem:[%s14753_s1] sm:$0xff]  ;;  %v47_v1 = vld [vmem:[%s14753_s1 + $0x8] sm:$0xf]  ;;  %v16_v7 = vld [vmem:[%s14754_s0 + $0x10] sm:$0xff] }
   0x2   :  { %v14_v2 = vld [vmem:[%s14754_s0] sm:$0xff]  ;;  %v152_v3 = vsel %vm150_vm0, %v47_v1, 0  ;;  %v155_v4 = vand.u32 4294901760, %v46_v0  ;;  %v15_v6 = vld [vmem:[%s14754_s0 + $0x8] sm:$0xff]  ;;  %v17_v8 = vld [vmem:[%s14754_s0 + $0x18] sm:$0xff]  ;;  %v61_v12 = vsel %vm53_vm1, %v16_v7, 0 }
   0x3   :  { %v55_v5 = vsel %vm53_vm1, %v14_v2, 0  ;;  %v158_v9 = vand.u32 4294901760, %v152_v3  ;;  %v58_v11 = vsel %vm53_vm1, %v15_v6, 0  ;;  %v18_v13 = vld [vmem:[%s14754_s0 + $0x20] sm:$0xff]  ;;  %v11765_v16 = vand.u32 4294901760, %v61_v12  ;;  %v19_v22 = vld [vmem:[%s14754_s0 + $0x28] sm:$0xff] }
   0x4   :  { %v11754_v10 = vand.u32 4294901760, %v55_v5  ;;  %v11761_v14 = vand.u32 4294901760, %v58_v11  ;;  %v11763_v15 = vsub.f32 %v46_v0, %v155_v4  ;;  %v64_v17 = vsel %vm53_vm1, %v17_v8, 0  ;;  %v20_v39 = vld [vmem:[%s14754_s0 + $0x30] sm:$0xff]  ;;  %v21_v48 = vld [vmem:[%s14754_s0 + $0x38] sm:$0xff]  ;;  %v22_v49 = vld [vmem:[%s14754_s0 + $0x40] sm:$0xff] }
   0x5   :  { %v11768_v18 = vpack.c.bf16 %v158_v9, %v155_v4  ;;  %v11773_v20 = vsub.f32 %v152_v3, %v158_v9  ;;  %v11775_v21 = vand.u32 4294901760, %v64_v17  ;;  %v11785_v25 = vsub.f32 %v61_v12, %v11765_v16  ;;  %v23_v50 = vld [vmem:[%s14754_s0 + $0x48] sm:$0xff]  ;;  %v24_v59 = vld [vmem:[%s14754_s0 + $0x50] sm:$0xff]  ;;  %v25_v60 = vld [vmem:[%s14754_s0 + $0x58] sm:$0xff] }
   0x6   :  { %v11771_v19 = vsub.f32 %v55_v5, %v11754_v10  ;;  %v11781_v23 = vsub.f32 %v58_v11, %v11761_v14  ;;  %v14775_v24 = vand.u32 4294901760, %v11763_v15  ;;  %v67_v26 = vsel %vm53_vm1, %v18_v13, 0  ;;  %v26_v5 = vld [vmem:[%s14754_s0 + $0x60] sm:$0xff] }
   0x7   :  { %10436 = vmatprep.subr.bf16.mxu0 %v11768_v18  ;;  %v14774_v28 = vand.u32 4294901760, %v11773_v20  ;;  %v11792_v29 = vsub.f32 %v64_v17, %v11775_v21  ;;  %v11794_v30 = vand.u32 4294901760, %v67_v26  ;;  %v14769_v33 = vand.u32 4294901760, %v11785_v25 }
   0x8   :  { %v14773_v27 = vand.u32 4294901760, %v11771_v19  ;;  %10438 = vmatpush3.bf16.msra.mxu0 %v11768_v18  ;;  %v14771_v31 = vand.u32 4294901760, %v11781_v23  ;;  %v545_v32 = vsub.f32 %v11763_v15, %v14775_v24  ;;  %v70_v34 = vsel %vm53_vm1, %v19_v22, 0  ;;  %v27_v22 = vld [vmem:[%s14754_s0 + $0x68] sm:$0xff] }
   0x9   :  { %v552_v36 = vsub.f32 %v11773_v20, %v14774_v28  ;;  %v14768_v37 = vand.u32 4294901760, %v11792_v29  ;;  %v11811_v38 = vsub.f32 %v67_v26, %v11794_v30  ;;  %v244_v42 = vsub.f32 %v11785_v25, %v14769_v33 }
   0xa   :  { %v224_v35 = vsub.f32 %v11771_v19, %v14773_v27  ;;  %v234_v40 = vsub.f32 %v11781_v23, %v14771_v31  ;;  %v546_v41 = vand.u32 4294901760, %v545_v32  ;;  %v11822_v43 = vand.u32 4294901760, %v70_v34  ;;  %v38_v31 = vld [vmem:[%s14754_s0 + $0xc0] sm:$0xff]  ;;  %v39_v27 = vld [vmem:[%s14754_s0 + $0xc8] sm:$0xff] }
   0xb   :  { %v553_v45 = vand.u32 4294901760, %v552_v36  ;;  %v254_v46 = vsub.f32 %v11792_v29, %v14768_v37  ;;  %v14766_v47 = vand.u32 4294901760, %v11811_v38  ;;  %v245_v52 = vand.u32 4294901760, %v244_v42 }
   0xc   :  { %v225_v44 = vand.u32 4294901760, %v224_v35  ;;  %v235_v51 = vand.u32 4294901760, %v234_v40  ;;  %v11838_v53 = vsub.f32 %v70_v34, %v11822_v43  ;;  %v73_v54 = vsel %vm53_vm1, %v20_v39, 0 }
   0xd   :  { %v10439_v55 = vpack.c.bf16 %v553_v45, %v546_v41  ;;  %v255_v56 = vand.u32 4294901760, %v254_v46  ;;  %v264_v57 = vsub.f32 %v11811_v38, %v14766_v47  ;;  %v11844_v58 = vand.u32 4294901760, %v73_v54 }
   0xe   :  { %8975 = vmatprep.mubr.f32.mxu0 %v225_v44  ;;  %v14765_v61 = vand.u32 4294901760, %v11838_v53  ;;  %v76_v62 = vsel %vm53_vm1, %v21_v48, 0  ;;  %v79_v63 = vsel %vm53_vm1, %v22_v49, 0  ;;  %v82_v0 = vsel %vm53_vm1, %v23_v50, 0  ;;  %v28_v48 = vld [vmem:[%s14754_s0 + $0x70] sm:$0xff] }
   0xf   :  { %8976 = vmatmul.mubr.f32.vlgmr.msra.gmra.mrb[0].mxu0 %v235_v51  ;;  %10440 = vmatprep.subr.bf16.mxu0 %v10439_v55  ;;  %v265_v1 = vand.u32 4294901760, %v264_v57  ;;  %v11857_v2 = vsub.f32 %v73_v54, %v11844_v58  ;;  %v11859_v3 = vand.u32 4294901760, %v76_v62  ;;  %v11861_v4 = vand.u32 4294901760, %v79_v63 }
  0x10   :  { %8978 = vmatprep.mubr.f32.mxu0 %v245_v52  ;;  %10442 = vmatpush3.bf16.msra.mxu0 %v10439_v55  ;;  %v274_v6 = vsub.f32 %v11838_v53, %v14765_v61  ;;  %v11869_v7 = vand.u32 4294901760, %v82_v0  ;;  %v85_v8 = vsel %vm53_vm1, %v24_v59, 0  ;;  %v88_v9 = vsel %vm53_vm1, %v25_v60, 0  ;;  %v29_v59 = vld [vmem:[%s14754_s0 + $0x78] sm:$0xff]  ;;  %v30_v60 = vld [vmem:[%s14754_s0 + $0x80] sm:$0xff] }
  0x11   :  { %v14764_v11 = vand.u32 4294901760, %v11857_v2  ;;  %v11875_v12 = vsub.f32 %v76_v62, %v11859_v3  ;;  %v11878_v13 = vsub.f32 %v79_v63, %v11861_v4  ;;  %v11880_v17 = vand.u32 4294901760, %v85_v8 }
  0x12   :  { %v275_v26 = vand.u32 4294901760, %v274_v6  ;;  %v11886_v32 = vsub.f32 %v82_v0, %v11869_v7  ;;  %v11888_v34 = vand.u32 4294901760, %v88_v9  ;;  %v91_v35 = vsel %vm53_vm1, %v26_v5, 0 }
  0x13   :  { %8979 = vmatmul.mubr.f32.gmra.mrb[2].mxu0 %v255_v56  ;;  %v284_v36 = vsub.f32 %v11857_v2, %v14764_v11  ;;  %v14762_v39 = vand.u32 4294901760, %v11875_v12  ;;  %v14761_v40 = vand.u32 4294901760, %v11878_v13  ;;  %v11897_v41 = vsub.f32 %v85_v8, %v11880_v17 }
  0x14   :  { %15210 = vst [vmem:[#allocation2_spill] sm:$0xff] %v11886_v32  ;;  %8981 = vmatprep.mubr.f32.mxu0 %v265_v1  ;;  %v14760_v42 = vand.u32 4294901760, %v11886_v32  ;;  %v11901_v44 = vsub.f32 %v88_v9, %v11888_v34  ;;  %v11903_v45 = vand.u32 4294901760, %v91_v35  ;;  %v94_v46 = vsel %vm53_vm1, %v27_v22, 0  ;;  %v31_v9 = vld [vmem:[%s14754_s0 + $0x88] sm:$0xff]  ;;  %v32_v22 = vld [vmem:[%s14754_s0 + $0x90] sm:$0xff] }
  0x15   :  { %15211 = vst [vmem:[#allocation3_spill] sm:$0xff] %v11897_v41  ;;  %v285_v49 = vand.u32 4294901760, %v284_v36  ;;  %v294_v50 = vsub.f32 %v11875_v12, %v14762_v39  ;;  %v304_v51 = vsub.f32 %v11878_v13, %v14761_v40  ;;  %v14759_v52 = vand.u32 4294901760, %v11897_v41 }
  0x16   :  { %15212 = vst [vmem:[#allocation4_spill] sm:$0xff] %v11901_v44  ;;  %v314_v54 = vsub.f32 %v11886_v32, %v14760_v42  ;;  %v14757_v55 = vand.u32 4294901760, %v11901_v44  ;;  %v11921_v56 = vsub.f32 %v91_v35, %v11903_v45  ;;  %v11923_v57 = vand.u32 4294901760, %v94_v46 }
  0x17   :  { %8982 = vmatmul.mubr.f32.gmra.mrb[4].mxu0 %v275_v26  ;;  %v295_v62 = vand.u32 4294901760, %v294_v50  ;;  %v305_v63 = vand.u32 4294901760, %v304_v51  ;;  %v324_v0 = vsub.f32 %v11897_v41, %v14759_v52  ;;  %v97_v1 = vsel %vm53_vm1, %v28_v48, 0 }
  0x18   :  { %15213 = vst [vmem:[#allocation5_spill] sm:$0xff] %v11921_v56  ;;  %8984 = vmatprep.mubr.f32.mxu0 %v285_v49  ;;  %v334_v5 = vsub.f32 %v11901_v44, %v14757_v55  ;;  %v14758_v6 = vand.u32 4294901760, %v11921_v56  ;;  %v11940_v8 = vsub.f32 %v94_v46, %v11923_v57  ;;  %v315_v26 = vand.u32 4294901760, %v314_v54  ;;  %v33_v54 = vld [vmem:[%s14754_s0 + $0x98] sm:$0xff] }
  0x19   :  { %v11948_v35 = vand.u32 4294901760, %v97_v1  ;;  %v100_v36 = vsel %vm53_vm1, %v29_v59, 0  ;;  %v103_v48 = vsel %vm53_vm1, %v30_v60, 0  ;;  %v325_v49 = vand.u32 4294901760, %v324_v0 }
  0x1a   :  { %15214 = vst [vmem:[#allocation6_spill] sm:$0xff] %v11940_v8  ;;  %v344_v46 = vsub.f32 %v11921_v56, %v14758_v6  ;;  %v14763_v50 = vand.u32 4294901760, %v11940_v8  ;;  %v11956_v51 = vand.u32 4294901760, %v100_v36  ;;  %v11964_v59 = vand.u32 4294901760, %v103_v48 }
  0x1b   :  { %8985 = vmatmul.mubr.f32.gmra.mrb[6].mxu0 %v295_v62  ;;  %v11962_v55 = vsub.f32 %v97_v1, %v11948_v35  ;;  %v106_v60 = vsel %vm53_vm1, %v31_v9, 0  ;;  %v109_v62 = vsel %vm53_vm1, %v32_v22, 0  ;;  %v335_v0 = vand.u32 4294901760, %v334_v5 }
  0x1c   :  { %8987 = vmatprep.mubr.f32.mxu0 %v305_v63  ;;  %v345_v6 = vand.u32 4294901760, %v344_v46  ;;  %v11969_v52 = vsub.f32 %v100_v36, %v11956_v51  ;;  %v11971_v42 = vand.u32 4294901760, %v106_v60  ;;  %v34_v63 = vld [vmem:[%s14754_s0 + $0xa0] sm:$0xff]  ;;  %v11978_v40 = vsub.f32 %v103_v48, %v11964_v59  ;;  %v35_v48 = vld [vmem:[%s14754_s0 + $0xa8] sm:$0xff] }
  0x1d   :  { %15215 = vst [vmem:[#allocation7_spill] sm:$0xff] %v11962_v55  ;;  %v14767_v1 = vand.u32 4294901760, %v11962_v55  ;;  %v11980_v39 = vand.u32 4294901760, %v109_v62  ;;  %v112_v9 = vsel %vm53_vm1, %v33_v54, 0  ;;  %v354_v5 = vsub.f32 %v11940_v8, %v14763_v50 }
  0x1e   :  { %15216 = vst [vmem:[#allocation8_spill] sm:$0xff] %v11969_v52  ;;  %15217 = vst [vmem:[#allocation9_spill] sm:$0xff] %v11978_v40  ;;  %v14770_v22 = vand.u32 4294901760, %v11969_v52  ;;  %v11988_v36 = vsub.f32 %v106_v60, %v11971_v42  ;;  %v11990_v46 = vand.u32 4294901760, %v112_v9  ;;  %v14772_v54 = vand.u32 4294901760, %v11978_v40 }
  0x1f   :  { %8988 = vmatmul.mubr.f32.gmra.mrb[8].mxu0 %v315_v26  ;;  %v364_v26 = vsub.f32 %v11962_v55, %v14767_v1  ;;  %v12000_v50 = vsub.f32 %v109_v62, %v11980_v39  ;;  %v115_v11 = vsel %vm53_vm1, %v34_v63, 0  ;;  %v118_v1 = vsel %vm53_vm1, %v35_v48, 0 }
  0x20   :  { %15218 = vst [vmem:[#allocation10_spill] sm:$0xff] %v11988_v36  ;;  %8990 = vmatprep.mubr.f32.mxu0 %v325_v49  ;;  %v374_v60 = vsub.f32 %v11969_v52, %v14770_v22  ;;  %v12006_v61 = vand.u32 4294901760, %v115_v11  ;;  %v36_v49 = vld [vmem:[%s14754_s0 + $0xb0] sm:$0xff]  ;;  %v14780_v47 = vand.u32 4294901760, %v11988_v36  ;;  %v355_v37 = vand.u32 4294901760, %v354_v5  ;;  %v37_v22 = vld [vmem:[%s14754_s0 + $0xb8] sm:$0xff] }
  0x21   :  { %15219 = vst [vmem:[#allocation11_spill] sm:$0xff] %v12000_v50  ;;  %v365_v62 = vand.u32 4294901760, %v364_v26  ;;  %v384_v63 = vsub.f32 %v11978_v40, %v14772_v54  ;;  %v12017_v33 = vsub.f32 %v112_v9, %v11990_v46  ;;  %v12029_v48 = vand.u32 4294901760, %v118_v1 }
  0x22   :  { %v12027_v5 = vsub.f32 %v115_v11, %v12006_v61  ;;  %v121_v26 = vsel %vm53_vm1, %v36_v49, 0  ;;  %v375_v9 = vand.u32 4294901760, %v374_v60  ;;  %v124_v11 = vsel %vm53_vm1, %v37_v22, 0  ;;  %v40_v60 = vld [vmem:[%s14754_s0 + $0xd0] sm:$0xff] }
  0x23   :  { %8991 = vmatmul.mubr.f32.gmra.mrb[10].mxu0 %v335_v0  ;;  %15220 = vst [vmem:[#allocation12_spill] sm:$0xff] %v12017_v33  ;;  %v12032_v54 = vand.u32 4294901760, %v121_v26  ;;  %v12041_v28 = vsub.f32 %v118_v1, %v12029_v48  ;;  %v127_v24 = vsel %vm53_vm1, %v38_v31, 0  ;;  %v385_v49 = vand.u32 4294901760, %v384_v63  ;;  %v41_v63 = vld [vmem:[%s14754_s0 + $0xd8] sm:$0xff] }
  0x24   :  { %8993 = vmatprep.mubr.f32.mxu0 %v345_v6  ;;  %15221 = vst [vmem:[#allocation13_spill] sm:$0xff] %v12027_v5  ;;  %v394_v6 = vsub.f32 %v11988_v36, %v14780_v47  ;;  %v12052_v52 = vand.u32 4294901760, %v124_v11  ;;  %v15224_v1 = vand.u32 4294901760, %v12000_v50  ;;  %v12058_v47 = vand.u32 4294901760, %v127_v24 }
  0x25   :  { %15222 = vst [vmem:[#allocation14_spill] sm:$0xff] %v12041_v28  ;;  %v12050_v40 = vsub.f32 %v121_v26, %v12032_v54  ;;  %v130_v36 = vsel %vm53_vm1, %v39_v27, 0  ;;  %v15227_v27 = vand.u32 4294901760, %v12017_v33 }
  0x26   :  { %v404_v22 = vsub.f32 %v12000_v50, %v15224_v1  ;;  %15225 = vst [vmem:[#allocation16_spill] sm:$0xff] %v12058_v47  ;;  %v12068_v0 = vsub.f32 %v124_v11, %v12052_v52  ;;  %v42_v1 = vld [vmem:[%s14754_s0 + $0xe0] sm:$0xff]  ;;  %v395_v31 = vand.u32 4294901760, %v394_v6  ;;  %v12077_v50 = vsub.f32 %v127_v24, %v12058_v47 }
  0x27   :  { %8994 = vmatmul.mubr.f32.gmra.mrb[12].mxu0 %v355_v37  ;;  %15223 = vst [vmem:[#allocation15_spill] sm:$0xff] %v12050_v40  ;;  %v133_v37 = vsel %vm53_vm1, %v40_v60, 0  ;;  %v414_v60 = vsub.f32 %v12017_v33, %v15227_v27  ;;  %v12079_v55 = vand.u32 4294901760, %v130_v36  ;;  %v15230_v11 = vand.u32 4294901760, %v12027_v5  ;;  %v43_v27 = vld [vmem:[%s14754_s0 + $0xe8] sm:$0xff] }
  0x28   :  { %8996 = vmatprep.mubr.f32.mxu0 %v365_v62  ;;  %15226 = vst [vmem:[#allocation17_spill] sm:$0xff] %v12068_v0  ;;  %15228 = vst [vmem:[#allocation18_spill] sm:$0xff] %v12077_v50  ;;  %v405_v62 = vand.u32 4294901760, %v404_v22  ;;  %v12084_v8 = vand.u32 4294901760, %v133_v37  ;;  %v139_v6 = vsel %vm53_vm1, %v42_v1, 0  ;;  %v15232_v24 = vand.u32 4294901760, %v12041_v28 }
  0x29   :  { %15229 = vst [vmem:[#allocation19_spill] sm:$0xff] %v12079_v55  ;;  %v424_v26 = vsub.f32 %v12027_v5, %v15230_v11  ;;  %v415_v1 = vand.u32 4294901760, %v414_v60  ;;  %v12103_v56 = vsub.f32 %v130_v36, %v12079_v55  ;;  %v142_v11 = vsel %vm53_vm1, %v43_v27, 0 }
  0x2a   :  { %15231 = vst [vmem:[#allocation20_spill] sm:$0xff] %v12084_v8  ;;  %v434_v33 = vsub.f32 %v12041_v28, %v15232_v24  ;;  %v12108_v28 = vsub.f32 %v133_v37, %v12084_v8  ;;  %v15237_v5 = vand.u32 4294901760, %v12068_v0  ;;  %v10443_v37 = vpack.c.bf16 %v11773_v20, %v11763_v15 }
  0x2b   :  { %8997 = vmatmul.mubr.f32.gmra.mrb[14].mxu0 %v375_v9  ;;  %v136_v9 = vsel %vm53_vm1, %v41_v63, 0  ;;  %v44_v63 = vld [vmem:[%s14754_s0 + $0xf0] sm:$0xff]  ;;  %15234 = vst [vmem:[#allocation21_spill] sm:$0xff] %v12103_v56  ;;  %v425_v24 = vand.u32 4294901760, %v424_v26  ;;  %v15238_v26 = vand.u32 4294901760, %v12077_v50  ;;  %v12129_v32 = vand.u32 4294901760, %v142_v11 }
  0x2c   :  { %8999 = vmatprep.mubr.f32.mxu0 %v385_v49  ;;  %v15233_v49 = vand.u32 4294901760, %v12050_v40  ;;  %v12105_v44 = vand.u32 4294901760, %v136_v9  ;;  %v435_v60 = vand.u32 4294901760, %v434_v33  ;;  %10444 = vmatprep.subr.bf16.mxu0 %v10443_v37 }
  0x2d   :  { %v464_v27 = vsub.f32 %v12077_v50, %v15238_v26  ;;  %15240 = vst [vmem:[#allocation25_spill] sm:$0xff] %v12129_v32  ;;  %v15243_v50 = vand.u32 4294901760, %v12108_v28 }
  0x2e   :  { %v444_v22 = vsub.f32 %v12050_v40, %v15233_v49  ;;  %15235 = vst [vmem:[#allocation22_spill] sm:$0xff] %v12105_v44  ;;  %v12110_v49 = vand.u32 4294901760, %v139_v6  ;;  %v145_v40 = vsel %vm53_vm1, %v44_v63, 0  ;;  %v14809_v63 = vand.u32 4294901760, %v12103_v56 }
  0x2f   :  { %9000 = vmatmul.mubr.f32.gmra.mrb[16].mxu0 %v395_v31  ;;  %v45_v31 = vld [vmem:[%s14754_s0 + $0xf8] sm:$0xff]  ;;  %v12127_v41 = vsub.f32 %v136_v9, %v12105_v44 }
  0x30   :  { %9002 = vmatprep.mubr.f32.mxu0 %v405_v62  ;;  %15236 = vst [vmem:[#allocation23_spill] sm:$0xff] %v12110_v49  ;;  %v445_v36 = vand.u32 4294901760, %v444_v22  ;;  %v454_v62 = vsub.f32 %v12068_v0, %v15237_v5  ;;  %v12133_v5 = vsub.f32 %v139_v6, %v12110_v49  ;;  %v12135_v22 = vand.u32 4294901760, %v145_v40 }
  0x31   :  { %15239 = vst [vmem:[#allocation24_spill] sm:$0xff] %v12127_v41  ;;  %v474_v9 = vsub.f32 %v12103_v56, %v14809_v63  ;;  %v14812_v26 = vand.u32 4294901760, %v12127_v41  ;;  %v465_v6 = vand.u32 4294901760, %v464_v27 }
  0x32   :  { %15241 = vst [vmem:[#allocation26_spill] sm:$0xff] %v12135_v22  ;;  %v455_v0 = vand.u32 4294901760, %v454_v62  ;;  %v14818_v62 = vand.u32 4294901760, %v12133_v5 }
  0x33   :  { %9003 = vmatmul.mubr.f32.gmra.mrb[18].mxu0 %v415_v1  ;;  %v148_v1 = vsel %vm53_vm1, %v45_v31, 0  ;;  %v484_v31 = vsub.f32 %v12108_v28, %v15243_v50  ;;  %v475_v63 = vand.u32 4294901760, %v474_v9 }
  0x34   :  { %9005 = vmatprep.mubr.f32.mxu0 %v425_v24  ;;  %v12143_v24 = vsub.f32 %v142_v11, %v12129_v32  ;;  %v12145_v33 = vand.u32 4294901760, %v148_v1  ;;  %v494_v11 = vsub.f32 %v12127_v41, %v14812_v26  ;;  %v504_v50 = vsub.f32 %v12133_v5, %v14818_v62  ;;  %v15261_v62 = vld [vmem:[#allocation18_spill] sm:$0xff] }
  0x35   :  { %v485_v27 = vand.u32 4294901760, %v484_v31 }
  0x36   :  { %15242 = vst [vmem:[#allocation27_spill] sm:$0xff] %v12145_v33  ;;  %v14817_v56 = vand.u32 4294901760, %v12143_v24  ;;  %v505_v41 = vand.u32 4294901760, %v504_v50  ;;  %v15248_v50 = vld [vmem:[#allocation4_spill] sm:$0xff] }
  0x37   :  { %9006 = vmatmul.mubr.f32.gmra.mrb[20].mxu0 %v435_v60  ;;  %v12152_v60 = vsub.f32 %v145_v40, %v12135_v22 }
  0x38   :  { %9008 = vmatprep.mubr.f32.mxu0 %v445_v36  ;;  %v12159_v36 = vsub.f32 %v148_v1, %v12145_v33  ;;  %v514_v9 = vsub.f32 %v12143_v24, %v14817_v56  ;;  %v15260_v56 = vld [vmem:[#allocation17_spill] sm:$0xff] }
  0x39   :  { %v14816_v40 = vand.u32 4294901760, %v12152_v60 }
  0x3a   :  { %v14815_v26 = vand.u32 4294901760, %v12159_v36 }
  0x3b   :  { %9009 = vmatmul.mubr.f32.gmra.mrb[22].mxu0 %v455_v0  ;;  %v495_v0 = vand.u32 4294901760, %v494_v11  ;;  %v524_v1 = vsub.f32 %v12152_v60, %v14816_v40  ;;  %v15259_v40 = vld [vmem:[#allocation15_spill] sm:$0xff] }
  0x3c   :  { %9011 = vmatprep.mubr.f32.mxu0 %v465_v6  ;;  %v515_v6 = vand.u32 4294901760, %v514_v9  ;;  %v534_v31 = vsub.f32 %v12159_v36, %v14815_v26  ;;  %v15250_v9 = vld [vmem:[#allocation6_spill] sm:$0xff] }
  0x3d   :  { %v15258_v26 = vld [vmem:[#allocation14_spill] sm:$0xff] }
  0x3e   :  { %v535_v11 = vand.u32 4294901760, %v534_v31  ;;  %v15253_v31 = vld [vmem:[#allocation9_spill] sm:$0xff] }
  0x3f   :  { %9012 = vmatmul.mubr.f32.gmra.mrb[24].mxu0 %v475_v63  ;;  %v525_v63 = vand.u32 4294901760, %v524_v1  ;;  %v15251_v1 = vld [vmem:[#allocation7_spill] sm:$0xff] }
  0x40   :  { %9014 = vmatprep.mubr.f32.mxu0 %v485_v27 }
  0x43   :  { %9015 = vmatmul.mubr.f32.gmra.mrb[26].mxu0 %v495_v0  ;;  %v15249_v0 = vld [vmem:[#allocation5_spill] sm:$0xff] }
  0x44   :  { %9017 = vmatprep.mubr.f32.mxu0 %v505_v41  ;;  %v15244_v41 = vand.u32 4294901760, %v11763_v15  ;;  %v15246_v15 = vld [vmem:[#allocation2_spill] sm:$0xff] }
  0x47   :  { %9018 = vmatmul.mubr.f32.gmra.mrb[28].mxu0 %v515_v6  ;;  %v15252_v6 = vld [vmem:[#allocation8_spill] sm:$0xff] }
  0x48   :  { %9020 = vmatprep.mubr.f32.mxu0 %v525_v63  ;;  %v15254_v63 = vld [vmem:[#allocation10_spill] sm:$0xff] }
  0x4b   :  { %9021 = vmatmul.mubr.f32.gmra.mrb[30].mxu0 %v535_v11  ;;  %v15255_v11 = vld [vmem:[#allocation11_spill] sm:$0xff] }
  0x4c   :  { %9027 = vmatprep.mubr.f32.mxu0 %v11754_v10 }
  0x4f   :  { %9028 = vmatmul.mubr.f32.vlgmr.msra.gmra.mrb[0].mxu0 %v11761_v14 }
  0x50   :  { %10446 = vmatpush3.bf16.msra.mxu0 %v10443_v37  ;;  %9030 = vmatprep.mubr.f32.mxu0 %v11765_v16  ;;  %v15245_v37 = vand.u32 4294901760, %v11773_v20  ;;  %v15247_v20 = vld [vmem:[#allocation3_spill] sm:$0xff] }
  0x51   :  { %10448 = vmatprep.subr.bf16.mxu0 %v11768_v18 }
  0x52   :  { %v10451_v27 = vpack.c.bf16 %v15245_v37, %v15244_v41  ;;  %v15256_v41 = vld [vmem:[#allocation12_spill] sm:$0xff]  ;;  %v15257_v37 = vld [vmem:[#allocation13_spill] sm:$0xff] }
  0x53   :  { %9031 = vmatmul.mubr.f32.gmra.mrb[2].mxu0 %v11775_v21 }
  0x54   :  { %9033 = vmatprep.mubr.f32.mxu0 %v11794_v30 }
  0x57   :  { %9034 = vmatmul.mubr.f32.gmra.mrb[4].mxu0 %v11822_v43 }
  0x58   :  { %9036 = vmatprep.mubr.f32.mxu0 %v11844_v58 }
  0x5b   :  { %9037 = vmatmul.mubr.f32.gmra.mrb[6].mxu0 %v11859_v3 }
  0x5c   :  { %9039 = vmatprep.mubr.f32.mxu0 %v11861_v4 }
  0x5f   :  { %9040 = vmatmul.mubr.f32.gmra.mrb[8].mxu0 %v11869_v7 }
  0x60   :  { %9042 = vmatprep.mubr.f32.mxu0 %v11880_v17 }
  0x63   :  { %9043 = vmatmul.mubr.f32.gmra.mrb[10].mxu0 %v11888_v34 }
  0x64   :  { %9045 = vmatprep.mubr.f32.mxu0 %v11903_v45 }
  0x67   :  { %9046 = vmatmul.mubr.f32.gmra.mrb[12].mxu0 %v11923_v57 }
  0x68   :  { %9048 = vmatprep.mubr.f32.mxu0 %v11948_v35 }
  0x6b   :  { %9049 = vmatmul.mubr.f32.gmra.mrb[14].mxu0 %v11956_v51 }
  0x6c   :  { %9051 = vmatprep.mubr.f32.mxu0 %v11964_v59 }
  0x6f   :  { %9052 = vmatmul.mubr.f32.gmra.mrb[16].mxu0 %v11971_v42 }
  0x70   :  { %9054 = vmatprep.mubr.f32.mxu0 %v11980_v39 }
  0x73   :  { %9055 = vmatmul.mubr.f32.gmra.mrb[18].mxu0 %v11990_v46 }
  0x74   :  { %9057 = vmatprep.mubr.f32.mxu0 %v12006_v61 }
  0x77   :  { %9058 = vmatmul.mubr.f32.gmra.mrb[20].mxu0 %v12029_v48 }
  0x78   :  { %9060 = vmatprep.mubr.f32.mxu0 %v12032_v54 }
  0x7b   :  { %9061 = vmatmul.mubr.f32.gmra.mrb[22].mxu0 %v12052_v52 }
  0x7c   :  { %9063 = vmatprep.mubr.f32.mxu0 %v12058_v47  ;;  %v15269_v47 = vand.u32 4294901760, %v11838_v53 }
  0x7f   :  { %9064 = vmatmul.mubr.f32.gmra.mrb[24].mxu0 %v12079_v55  ;;  %v15268_v55 = vand.u32 4294901760, %v11811_v38 }
  0x80   :  { %9066 = vmatprep.mubr.f32.mxu0 %v12084_v8  ;;  %v15267_v8 = vand.u32 4294901760, %v11792_v29 }
  0x83   :  { %9067 = vmatmul.mubr.f32.gmra.mrb[26].mxu0 %v12105_v44  ;;  %v15266_v44 = vand.u32 4294901760, %v11785_v25 }
  0x84   :  { %9069 = vmatprep.mubr.f32.mxu0 %v12110_v49  ;;  %v15265_v49 = vand.u32 4294901760, %v11781_v23 }
  0x87   :  { %9070 = vmatmul.mubr.f32.gmra.mrb[28].mxu0 %v12129_v32  ;;  %v15264_v32 = vand.u32 4294901760, %v11771_v19 }
  0x88   :  { %9072 = vmatprep.mubr.f32.mxu0 %v12135_v22  ;;  %v15263_v22 = vld [vmem:[#allocation24_spill] sm:$0xff] }
  0x8b   :  { %9073 = vmatmul.mubr.f32.gmra.mrb[30].mxu0 %v12145_v33  ;;  %v15262_v33 = vld [vmem:[#allocation21_spill] sm:$0xff] }
  0x8c   :  { %9079 = vmatprep.mubr.f32.mxu0 %v11771_v19  ;;  %v15270_v19 = vand.u32 4294901760, %v11857_v2 }
  0x8f   :  { %9080 = vmatmul.mubr.f32.vlgmr.msra.gmra.mrb[0].mxu0 %v11781_v23  ;;  %v15271_v23 = vand.u32 4294901760, %v11875_v12 }
  0x90   :  { %10450 = vmatpush3.bf16.msra.mxu0 %v11768_v18  ;;  %9082 = vmatprep.mubr.f32.mxu0 %v11785_v25  ;;  %v15272_v25 = vand.u32 4294901760, %v11878_v13 }
  0x91   :  { %10452 = vmatprep.subr.bf16.mxu0 %v10451_v27 }
  0x93   :  { %9083 = vmatmul.mubr.f32.gmra.mrb[2].mxu0 %v11792_v29  ;;  %v15274_v29 = vand.u32 4294901760, %v15247_v20 }
  0x94   :  { %9085 = vmatprep.mubr.f32.mxu0 %v11811_v38  ;;  %v15275_v38 = vand.u32 4294901760, %v15248_v50 }
  0x97   :  { %9086 = vmatmul.mubr.f32.gmra.mrb[4].mxu0 %v11838_v53  ;;  %v15277_v53 = vand.u32 4294901760, %v15250_v9 }
  0x98   :  { %9088 = vmatprep.mubr.f32.mxu0 %v11857_v2  ;;  %v15278_v2 = vand.u32 4294901760, %v15251_v1 }
  0x9b   :  { %9089 = vmatmul.mubr.f32.gmra.mrb[6].mxu0 %v11875_v12  ;;  %v15279_v12 = vand.u32 4294901760, %v15252_v6 }
  0x9c   :  { %9091 = vmatprep.mubr.f32.mxu0 %v11878_v13  ;;  %v15280_v13 = vand.u32 4294901760, %v15253_v31 }
  0x9f   :  { %9092 = vmatmul.mubr.f32.gmra.mrb[8].mxu0 %v15246_v15 }
  0xa0   :  { %9094 = vmatprep.mubr.f32.mxu0 %v15247_v20  ;;  %v15287_v20 = vand.u32 4294901760, %v15260_v56 }
  0xa3   :  { %9095 = vmatmul.mubr.f32.gmra.mrb[10].mxu0 %v15248_v50  ;;  %v15288_v50 = vand.u32 4294901760, %v15261_v62 }
  0xa4   :  { %9097 = vmatprep.mubr.f32.mxu0 %v15249_v0 }
  0xa7   :  { %9098 = vmatmul.mubr.f32.gmra.mrb[12].mxu0 %v15250_v9  ;;  %v15290_v9 = vand.u32 4294901760, %v12108_v28 }
  0xa8   :  { %9100 = vmatprep.mubr.f32.mxu0 %v15251_v1  ;;  %v15291_v1 = vand.u32 4294901760, %v15263_v22 }
  0xab   :  { %9101 = vmatmul.mubr.f32.gmra.mrb[14].mxu0 %v15252_v6 }
  0xac   :  { %9103 = vmatprep.mubr.f32.mxu0 %v15253_v31 }
  0xaf   :  { %9104 = vmatmul.mubr.f32.gmra.mrb[16].mxu0 %v15254_v63 }
  0xb0   :  { %9106 = vmatprep.mubr.f32.mxu0 %v15255_v11 }
  0xb3   :  { %9107 = vmatmul.mubr.f32.gmra.mrb[18].mxu0 %v15256_v41 }
  0xb4   :  { %9109 = vmatprep.mubr.f32.mxu0 %v15257_v37 }
  0xb7   :  { %9110 = vmatmul.mubr.f32.gmra.mrb[20].mxu0 %v15258_v26 }
  0xb8   :  { %9112 = vmatprep.mubr.f32.mxu0 %v15259_v40 }
  0xbb   :  { %9113 = vmatmul.mubr.f32.gmra.mrb[22].mxu0 %v15260_v56  ;;  %v15294_v56 = vand.u32 4294901760, %v12152_v60 }
  0xbc   :  { %9115 = vmatprep.mubr.f32.mxu0 %v15261_v62  ;;  %v15295_v62 = vand.u32 4294901760, %v12159_v36 }
  0xbf   :  { %9116 = vmatmul.mubr.f32.gmra.mrb[24].mxu0 %v15262_v33 }
  0xc0   :  { %9118 = vmatprep.mubr.f32.mxu0 %v12108_v28  ;;  %v15297_v28 = vld [vmem:[#allocation19_spill] sm:$0xff] }
  0xc3   :  { %9119 = vmatmul.mubr.f32.gmra.mrb[26].mxu0 %v15263_v22  ;;  %v15300_v22 = vld [vmem:[#allocation23_spill] sm:$0xff] }
  0xc4   :  { %9121 = vmatprep.mubr.f32.mxu0 %v12133_v5 }
  0xc7   :  { %9122 = vmatmul.mubr.f32.gmra.mrb[28].mxu0 %v12143_v24 }
  0xc8   :  { %9124 = vmatprep.mubr.f32.mxu0 %v12152_v60  ;;  %v15302_v60 = vld [vmem:[#allocation26_spill] sm:$0xff] }
  0xcb   :  { %9125 = vmatmul.mubr.f32.gmra.mrb[30].mxu0 %v12159_v36  ;;  %v15303_v36 = vld [vmem:[#allocation27_spill] sm:$0xff] }
  0xcc   :  { %9131 = vmatprep.mubr.f32.mxu0 %v15264_v32  ;;  %v15273_v32 = vand.u32 4294901760, %v15246_v15  ;;  %v15286_v15 = vand.u32 4294901760, %v15259_v40  ;;  %v15293_v40 = vand.u32 4294901760, %v12143_v24  ;;  %v15301_v24 = vld [vmem:[#allocation25_spill] sm:$0xff] }
  0xcf   :  { %9132 = vmatmul.mubr.f32.vlgmr.msra.gmra.mrb[0].mxu0 %v15265_v49  ;;  %v15284_v49 = vand.u32 4294901760, %v15257_v37 }
  0xd0   :  { %10454 = vmatpush3.bf16.msra.mxu0 %v10451_v27  ;;  %9134 = vmatprep.mubr.f32.mxu0 %v15266_v44  ;;  %v15281_v44 = vand.u32 4294901760, %v15254_v63  ;;  %v15285_v27 = vand.u32 4294901760, %v15258_v26  ;;  %v15292_v26 = vand.u32 4294901760, %v12133_v5  ;;  %v15299_v5 = vld [vmem:[#allocation22_spill] sm:$0xff] }
  0xd1   :  { %10456 = vmatprep.subr.bf16.mxu0 %v11768_v18 }
  0xd3   :  { %9135 = vmatmul.mubr.f32.gmra.mrb[2].mxu0 %v15267_v8  ;;  %v15283_v8 = vand.u32 4294901760, %v15256_v41 }
  0xd4   :  { %9137 = vmatprep.mubr.f32.mxu0 %v15268_v55  ;;  %v15282_v55 = vand.u32 4294901760, %v15255_v11 }
  0xd7   :  { %9138 = vmatmul.mubr.f32.gmra.mrb[4].mxu0 %v15269_v47  ;;  %v15276_v47 = vand.u32 4294901760, %v15249_v0  ;;  %v15289_v0 = vand.u32 4294901760, %v15262_v33  ;;  %v15298_v33 = vld [vmem:[#allocation20_spill] sm:$0xff] }
  0xd8   :  { %9140 = vmatprep.mubr.f32.mxu0 %v15270_v19 }
  0xdb   :  { %9141 = vmatmul.mubr.f32.gmra.mrb[6].mxu0 %v15271_v23 }
  0xdc   :  { %9143 = vmatprep.mubr.f32.mxu0 %v15272_v25 }
  0xdf   :  { %9144 = vmatmul.mubr.f32.gmra.mrb[8].mxu0 %v15273_v32 }
  0xe0   :  { %9146 = vmatprep.mubr.f32.mxu0 %v15274_v29 }
  0xe3   :  { %9147 = vmatmul.mubr.f32.gmra.mrb[10].mxu0 %v15275_v38 }
  0xe4   :  { %9149 = vmatprep.mubr.f32.mxu0 %v15276_v47 }
  0xe7   :  { %9150 = vmatmul.mubr.f32.gmra.mrb[12].mxu0 %v15277_v53 }
  0xe8   :  { %9152 = vmatprep.mubr.f32.mxu0 %v15278_v2 }
  0xeb   :  { %9153 = vmatmul.mubr.f32.gmra.mrb[14].mxu0 %v15279_v12 }
  0xec   :  { %9155 = vmatprep.mubr.f32.mxu0 %v15280_v13 }
  0xef   :  { %9156 = vmatmul.mubr.f32.gmra.mrb[16].mxu0 %v15281_v44 }
  0xf0   :  { %9158 = vmatprep.mubr.f32.mxu0 %v15282_v55 }
  0xf3   :  { %9159 = vmatmul.mubr.f32.gmra.mrb[18].mxu0 %v15283_v8 }
  0xf4   :  { %9161 = vmatprep.mubr.f32.mxu0 %v15284_v49 }
  0xf7   :  { %9162 = vmatmul.mubr.f32.gmra.mrb[20].mxu0 %v15285_v27 }
  0xf8   :  { %9164 = vmatprep.mubr.f32.mxu0 %v15286_v15 }
  0xfb   :  { %9165 = vmatmul.mubr.f32.gmra.mrb[22].mxu0 %v15287_v20 }
  0xfc   :  { %9167 = vmatprep.mubr.f32.mxu0 %v15288_v50 }
  0xff   :  { %9168 = vmatmul.mubr.f32.gmra.mrb[24].mxu0 %v15289_v0 }
 0x100   :  { %9170 = vmatprep.mubr.f32.mxu0 %v15290_v9 }
 0x103   :  { %9171 = vmatmul.mubr.f32.gmra.mrb[26].mxu0 %v15291_v1 }
 0x104   :  { %9173 = vmatprep.mubr.f32.mxu0 %v15292_v26 }
 0x107   :  { %9174 = vmatmul.mubr.f32.gmra.mrb[28].mxu0 %v15293_v40 }
 0x108   :  { %9176 = vmatprep.mubr.f32.mxu0 %v15294_v56 }
 0x10b   :  { %9177 = vmatmul.mubr.f32.gmra.mrb[30].mxu0 %v15295_v62 }
 0x10c   :  { %9183 = vmatprep.mubr.f32.mxu0 %v11754_v10 }
 0x10f   :  { %9184 = vmatmul.mubr.f32.vlgmr.msra.gmra.mrb[0].mxu0 %v11761_v14 }
 0x110   :  { %10458 = vmatpush3.bf16.msra.mxu0 %v11768_v18  ;;  %9186 = vmatprep.mubr.f32.mxu0 %v11765_v16  ;;  %v15296_v18 = vld [vmem:[#allocation16_spill] sm:$0xff] }
 0x113   :  { %9187 = vmatmul.mubr.f32.gmra.mrb[2].mxu0 %v11775_v21 }
 0x114   :  { %9189 = vmatprep.mubr.f32.mxu0 %v11794_v30 }
 0x117   :  { %9190 = vmatmul.mubr.f32.gmra.mrb[4].mxu0 %v11822_v43 }
 0x118   :  { %9192 = vmatprep.mubr.f32.mxu0 %v11844_v58 }
 0x11b   :  { %9193 = vmatmul.mubr.f32.gmra.mrb[6].mxu0 %v11859_v3 }
 0x11c   :  { %9195 = vmatprep.mubr.f32.mxu0 %v11861_v4 }
 0x11f   :  { %9196 = vmatmul.mubr.f32.gmra.mrb[8].mxu0 %v11869_v7 }
 0x120   :  { %9198 = vmatprep.mubr.f32.mxu0 %v11880_v17 }
 0x123   :  { %9199 = vmatmul.mubr.f32.gmra.mrb[10].mxu0 %v11888_v34 }
 0x124   :  { %9201 = vmatprep.mubr.f32.mxu0 %v11903_v45 }
 0x127   :  { %9202 = vmatmul.mubr.f32.gmra.mrb[12].mxu0 %v11923_v57 }
 0x128   :  { %9204 = vmatprep.mubr.f32.mxu0 %v11948_v35 }
 0x12b   :  { %9205 = vmatmul.mubr.f32.gmra.mrb[14].mxu0 %v11956_v51 }
 0x12c   :  { %9207 = vmatprep.mubr.f32.mxu0 %v11964_v59 }
 0x12f   :  { %9208 = vmatmul.mubr.f32.gmra.mrb[16].mxu0 %v11971_v42 }
 0x130   :  { %9210 = vmatprep.mubr.f32.mxu0 %v11980_v39 }
 0x133   :  { %9211 = vmatmul.mubr.f32.gmra.mrb[18].mxu0 %v11990_v46 }
 0x134   :  { %9213 = vmatprep.mubr.f32.mxu0 %v12006_v61 }
 0x137   :  { %9214 = vmatmul.mubr.f32.gmra.mrb[20].mxu0 %v12029_v48 }
 0x138   :  { %9216 = vmatprep.mubr.f32.mxu0 %v12032_v54 }
 0x13b   :  { %9217 = vmatmul.mubr.f32.gmra.mrb[22].mxu0 %v12052_v52 }
 0x13c   :  { %9219 = vmatprep.mubr.f32.mxu0 %v15296_v18 }
 0x13f   :  { %9220 = vmatmul.mubr.f32.gmra.mrb[24].mxu0 %v15297_v28 }
 0x140   :  { %9222 = vmatprep.mubr.f32.mxu0 %v15298_v33 }
 0x143   :  { %9223 = vmatmul.mubr.f32.gmra.mrb[26].mxu0 %v15299_v5 }
 0x144   :  { %9225 = vmatprep.mubr.f32.mxu0 %v15300_v22 }
 0x147   :  { %9226 = vmatmul.mubr.f32.gmra.mrb[28].mxu0 %v15301_v24 }
 0x148   :  { %9228 = vmatprep.mubr.f32.mxu0 %v15302_v60 }
 0x14b   :  { %9229 = vmatmul.mubr.f32.gmra.mrb[30].mxu0 %v15303_v36 }
 0x14c   :  { %9235 = vmatprep.mubr.f32.mxu0 %v11754_v10  ;;  %v8020_v10 = vld [vmem:[%s14753_s1 + $0x40] sm:$0xff] }
 0x14f   :  { %9236 = vmatmul.mubr.f32.vlgmr.msra.gmra.mrb[0].mxu0 %v11761_v14  ;;  %v8021_v14 = vld [vmem:[%s14753_s1 + $0x48] sm:$0xff] }
 0x150   :  { %9238 = vmatprep.mubr.f32.mxu0 %v11765_v16  ;;  %v2090_v16 = vand.u32 4294901760, %v8020_v10 }
 0x153   :  { %9239 = vmatmul.mubr.f32.gmra.mrb[2].mxu0 %v11775_v21  ;;  %v2093_v21 = vand.u32 4294901760, %v8021_v14 }
 0x154   :  { %9241 = vmatprep.mubr.f32.mxu0 %v11794_v30 }
 0x155   :  { %v12381_v30 = vpack.c.bf16 %v2093_v21, %v2090_v16 }
 0x157   :  { %9242 = vmatmul.mubr.f32.gmra.mrb[4].mxu0 %v11822_v43  ;;  %v8022_v43 = vld [vmem:[%s14753_s1 + $0x50] sm:$0xff]  ;;  %10460 = vmatprep.subr.bf16.mxu1 %v12381_v30 }
 0x158   :  { %9244 = vmatprep.mubr.f32.mxu0 %v11844_v58  ;;  %v8023_v58 = vld [vmem:[%s14753_s1 + $0x58] sm:$0xff]  ;;  %10462 = vmatpush3.bf16.msra.mxu1 %v12381_v30 }
 0x15b   :  { %9245 = vmatmul.mubr.f32.gmra.mrb[6].mxu0 %v11859_v3  ;;  %v2099_v3 = vand.u32 4294901760, %v8023_v58 }
 0x15c   :  { %9247 = vmatprep.mubr.f32.mxu0 %v11861_v4 }
 0x15d   :  { %v12432_v19 = vsub.f32 %v8023_v58, %v2099_v3 }
 0x15f   :  { %9248 = vmatmul.mubr.f32.gmra.mrb[8].mxu0 %v11869_v7  ;;  %v8024_v7 = vld [vmem:[%s14753_s1 + $0x60] sm:$0xff]  ;;  %15306 = vst [vmem:[#allocation4_spill] sm:$0xff] %v12432_v19  ;;  %v14848_v25 = vand.u32 4294901760, %v12432_v19 }
 0x160   :  { %9250 = vmatprep.mubr.f32.mxu0 %v11880_v17  ;;  %v8025_v17 = vld [vmem:[%s14753_s1 + $0x68] sm:$0xff] }
 0x161   :  { %v2507_v29 = vsub.f32 %v12432_v19, %v14848_v25 }
 0x163   :  { %9251 = vmatmul.mubr.f32.gmra.mrb[10].mxu0 %v11888_v34  ;;  %v2102_v34 = vand.u32 4294901760, %v8024_v7  ;;  %v2508_v47 = vand.u32 4294901760, %v2507_v29 }
 0x164   :  { %9253 = vmatprep.mubr.f32.mxu0 %v11903_v45  ;;  %v8026_v45 = vld [vmem:[%s14753_s1 + $0x70] sm:$0xff] }
 0x165   :  { %v12444_v2 = vsub.f32 %v8024_v7, %v2102_v34 }
 0x167   :  { %9254 = vmatmul.mubr.f32.gmra.mrb[12].mxu0 %v11923_v57  ;;  %v2108_v57 = vand.u32 4294901760, %v8026_v45  ;;  %15307 = vst [vmem:[#allocation5_spill] sm:$0xff] %v12444_v2  ;;  %v14843_v13 = vand.u32 4294901760, %v12444_v2 }
 0x168   :  { %9256 = vmatprep.mubr.f32.mxu0 %v11948_v35 }
 0x169   :  { %v2514_v55 = vsub.f32 %v12444_v2, %v14843_v13  ;;  %v12458_v20 = vsub.f32 %v8026_v45, %v2108_v57 }
 0x16b   :  { %9257 = vmatmul.mubr.f32.gmra.mrb[14].mxu0 %v11956_v51  ;;  %v2515_v49 = vand.u32 4294901760, %v2514_v55  ;;  %15309 = vst [vmem:[#allocation7_spill] sm:$0xff] %v12458_v20  ;;  %v14837_v0 = vand.u32 4294901760, %v12458_v20 }
 0x16c   :  { %9259 = vmatprep.mubr.f32.mxu0 %v11964_v59  ;;  %v12415_v59 = vsub.f32 %v8020_v10, %v2090_v16 }
 0x16d   :  { %v2528_v1 = vsub.f32 %v12458_v20, %v14837_v0 }
 0x16f   :  { %9260 = vmatmul.mubr.f32.gmra.mrb[16].mxu0 %v11971_v42  ;;  %v2529_v40 = vand.u32 4294901760, %v2528_v1 }
 0x170   :  { %9262 = vmatprep.mubr.f32.mxu0 %v11980_v39  ;;  %v2105_v39 = vand.u32 4294901760, %v8025_v17 }
 0x172   :  { %v12401_v42 = vpack.c.bf16 %v2105_v39, %v2102_v34  ;;  %v12446_v12 = vsub.f32 %v8025_v17, %v2105_v39 }
 0x173   :  { %9263 = vmatmul.mubr.f32.gmra.mrb[18].mxu0 %v11990_v46  ;;  %v12417_v46 = vsub.f32 %v8021_v14, %v2093_v21 }
 0x174   :  { %9265 = vmatprep.mubr.f32.mxu0 %v12006_v61  ;;  %v2096_v61 = vand.u32 4294901760, %v8022_v43  ;;  %15308 = vst [vmem:[#allocation6_spill] sm:$0xff] %v12446_v12  ;;  %v14842_v44 = vand.u32 4294901760, %v12446_v12 }
 0x175   :  { %15304 = vst [vmem:[#allocation2_spill] sm:$0xff] %v12417_v46 }
 0x176   :  { %v12391_v4 = vpack.c.bf16 %v2099_v3, %v2096_v61  ;;  %v12430_v37 = vsub.f32 %v8022_v43, %v2096_v61  ;;  %v2521_v8 = vsub.f32 %v12446_v12, %v14842_v44 }
 0x177   :  { %9266 = vmatmul.mubr.f32.gmra.mrb[20].mxu0 %v12029_v48  ;;  %v14853_v48 = vand.u32 4294901760, %v12417_v46 }
 0x178   :  { %9268 = vmatprep.mubr.f32.mxu0 %v12032_v54  ;;  %10464 = vmatprep.subr.bf16.mxu1 %v12391_v4  ;;  %v14854_v54 = vand.u32 4294901760, %v12415_v59  ;;  %15305 = vst [vmem:[#allocation3_spill] sm:$0xff] %v12430_v37  ;;  %v14850_v23 = vand.u32 4294901760, %v12430_v37  ;;  %v2522_v27 = vand.u32 4294901760, %v2521_v8 }
 0x179   :  { %10466 = vmatpush3.bf16.msra.mxu1 %v12391_v4  ;;  %v2493_v31 = vsub.f32 %v12417_v46, %v14853_v48 }
 0x17a   :  { %10468 = vmatprep.subr.bf16.mxu1 %v12401_v42  ;;  %v2486_v6 = vsub.f32 %v12415_v59, %v14854_v54  ;;  %v2500_v32 = vsub.f32 %v12430_v37, %v14850_v23  ;;  %v12456_v15 = vpack.c.bf16 %v2522_v27, %v2515_v49 }
 0x17b   :  { %9269 = vmatmul.mubr.f32.gmra.mrb[22].mxu0 %v12052_v52  ;;  %v8027_v52 = vld [vmem:[%s14753_s1 + $0x78] sm:$0xff]  ;;  %v2494_v11 = vand.u32 4294901760, %v2493_v31 }
 0x17c   :  { %9271 = vmatprep.mubr.f32.mxu0 %v15296_v18  ;;  %v2111_v35 = vand.u32 4294901760, %v8027_v52  ;;  %v2487_v63 = vand.u32 4294901760, %v2486_v6  ;;  %v2501_v38 = vand.u32 4294901760, %v2500_v32  ;;  %v12474_v18 = vpack.c.bf16 %v12417_v46, %v12415_v59 }
 0x17d   :  { %10470 = vmatpush3.bf16.msra.mxu1 %v12401_v42 }
 0x17e   :  { %v12411_v51 = vpack.c.bf16 %v2111_v35, %v2108_v57  ;;  %v12427_v41 = vpack.c.bf16 %v2494_v11, %v2487_v63  ;;  %v12442_v53 = vpack.c.bf16 %v2508_v47, %v2501_v38  ;;  %v12460_v50 = vsub.f32 %v8027_v52, %v2111_v35 }
 0x17f   :  { %9272 = vmatmul.mubr.f32.gmra.mrb[24].mxu0 %v15297_v28  ;;  %v12478_v28 = vpack.c.bf16 %v12432_v19, %v12430_v37 }
 0x180   :  { %9274 = vmatprep.mubr.f32.mxu0 %v15298_v33  ;;  %10472 = vmatprep.subr.bf16.mxu1 %v12411_v51  ;;  %15310 = vst [vmem:[#allocation8_spill] sm:$0xff] %v12460_v50  ;;  %v14835_v9 = vand.u32 4294901760, %v12460_v50  ;;  %v12482_v33 = vpack.c.bf16 %v12446_v12, %v12444_v2  ;;  %v12497_v17 = vpack.c.bf16 %v12460_v50, %v12458_v20 }
 0x181   :  { %10474 = vmatpush3.bf16.msra.mxu1 %v12411_v51 }
 0x182   :  { %10476 = vmatprep.subr.bf16.mxu1 %v12427_v41  ;;  %v2535_v26 = vsub.f32 %v12460_v50, %v14835_v9 }
 0x183   :  { %9275 = vmatmul.mubr.f32.gmra.mrb[26].mxu0 %v15299_v5  ;;  %v12487_v5 = vld [vmem:[%s14755_s2] ss:$0 sm:$0xff] }
 0x184   :  { %9277 = vmatprep.mubr.f32.mxu0 %v15300_v22  ;;  %v2536_v56 = vand.u32 4294901760, %v2535_v26 }
 0x186   :  { %v12470_v62 = vpack.c.bf16 %v2536_v56, %v2529_v40 }
 0x187   :  { %9278 = vmatmul.mubr.f32.gmra.mrb[28].mxu0 %v15301_v24 }
 0x188   :  { %9280 = vmatprep.mubr.f32.mxu0 %v15302_v60 }
 0x18b   :  { %9281 = vmatmul.mubr.f32.gmra.mrb[30].mxu0 %v15303_v36 }
 0x222   :  { %v9237_v22 = vpop.f32.mrb[0].mxu0 }
 0x223   :  { %v10755_v24 = vadd.f32 %v9237_v22, %v12487_v5  ;;  %v1756_v60 = vpop.f32.mrb[1].mxu0 }
 0x224   :  { %v10756_v36 = vadd.f32 %v12487_v5, %v1756_v60 }
 0x225   :  { %11523 = vtanh.f32 %v10755_v24 }
 0x226   :  { %11525 = vtanh.f32 %v10756_v36  ;;  %v9240_v10 = vpop.f32.mrb[2].mxu0 }
 0x227   :  { %v10757_v14 = vadd.f32 %v9240_v10, %v12487_v5  ;;  %v1768_v16 = vpop.f32.mrb[3].mxu0 }
 0x228   :  { %v10758_v21 = vadd.f32 %v12487_v5, %v1768_v16 }
 0x229   :  { %11527 = vtanh.f32 %v10757_v14 }
 0x22a   :  { %11529 = vtanh.f32 %v10758_v21  ;;  %v9243_v43 = vpop.f32.mrb[4].mxu0 }
 0x22b   :  { %v10759_v58 = vadd.f32 %v9243_v43, %v12487_v5  ;;  %v1780_v61 = vpop.f32.mrb[5].mxu0 }
 0x22c   :  { %v10760_v3 = vadd.f32 %v12487_v5, %v1780_v61 }
 0x22d   :  { %11531 = vtanh.f32 %v10759_v58 }
 0x22e   :  { %11533 = vtanh.f32 %v10760_v3  ;;  %v9246_v7 = vpop.f32.mrb[6].mxu0 }
 0x22f   :  { %v11524_v34 = vpop.eup %11523  ;;  %v10761_v39 = vadd.f32 %v9246_v7, %v12487_v5  ;;  %v1792_v45 = vpop.f32.mrb[7].mxu0 }
 0x230   :  { %v11526_v52 = vpop.eup %11525  ;;  %v10762_v57 = vadd.f32 %v12487_v5, %v1792_v45  ;;  %v1997_v35 = vsel %vm1992_vm2, %v11524_v34, 0 }
 0x231   :  { %11535 = vtanh.f32 %v10761_v39  ;;  %v1994_v6 = vsel %vm1992_vm2, %v11526_v52, 0  ;;  %v12503_v31 = vand.u32 4294901760, %v1997_v35 }
 0x232   :  { %11537 = vtanh.f32 %v10762_v57  ;;  %v9249_v63 = vpop.f32.mrb[8].mxu0  ;;  %v12505_v11 = vand.u32 4294901760, %v1994_v6 }
 0x233   :  { %v11528_v32 = vpop.eup %11527  ;;  %v10763_v29 = vadd.f32 %v9249_v63, %v12487_v5  ;;  %v1804_v38 = vpop.f32.mrb[9].mxu0  ;;  %v12509_v47 = vsub.f32 %v1997_v35, %v12503_v31 }
 0x234   :  { %v11530_v55 = vpop.eup %11529  ;;  %v10764_v8 = vadd.f32 %v12487_v5, %v1804_v38  ;;  %v12513_v49 = vsub.f32 %v1994_v6, %v12505_v11  ;;  %v2003_v27 = vsel %vm1992_vm2, %v11528_v32, 0 }
 0x235   :  { %11539 = vtanh.f32 %v10763_v29  ;;  %v14847_v1 = vand.u32 4294901760, %v12509_v47  ;;  %v2000_v26 = vsel %vm1992_vm2, %v11530_v55, 0  ;;  %v12518_v40 = vand.u32 4294901760, %v2003_v27 }
 0x236   :  { %11541 = vtanh.f32 %v10764_v8  ;;  %v9252_v56 = vpop.f32.mrb[10].mxu0  ;;  %v14851_v22 = vand.u32 4294901760, %v12513_v49  ;;  %v12521_v24 = vand.u32 4294901760, %v2000_v26 }
 0x237   :  { %v11532_v60 = vpop.eup %11531  ;;  %v10765_v36 = vadd.f32 %v9252_v56, %v12487_v5  ;;  %v1816_v10 = vpop.f32.mrb[11].mxu0  ;;  %v2175_v14 = vsub.f32 %v12509_v47, %v14847_v1  ;;  %v12528_v16 = vsub.f32 %v2003_v27, %v12518_v40 }
 0x238   :  { %v11534_v21 = vpop.eup %11533  ;;  %v10766_v43 = vadd.f32 %v12487_v5, %v1816_v10  ;;  %v2165_v58 = vsub.f32 %v12513_v49, %v14851_v22  ;;  %v12535_v61 = vsub.f32 %v2000_v26, %v12521_v24  ;;  %v2009_v3 = vsel %vm1992_vm2, %v11532_v60, 0 }
 0x239   :  { %11543 = vtanh.f32 %v10765_v36  ;;  %v14840_v7 = vand.u32 4294901760, %v12528_v16  ;;  %v2006_v34 = vsel %vm1992_vm2, %v11534_v21, 0  ;;  %v2176_v32 = vand.u32 4294901760, %v2175_v14 }
 0x23a   :  { %11545 = vtanh.f32 %v10766_v43  ;;  %v9255_v39 = vpop.f32.mrb[12].mxu0  ;;  %v2166_v45 = vand.u32 4294901760, %v2165_v58  ;;  %v14845_v52 = vand.u32 4294901760, %v12535_v61  ;;  %v12541_v57 = vand.u32 4294901760, %v2006_v34 }
 0x23b   :  { %v11536_v35 = vpop.eup %11535  ;;  %v10767_v6 = vadd.f32 %v9255_v39, %v12487_v5  ;;  %v1828_v63 = vpop.f32.mrb[13].mxu0  ;;  %v2195_v29 = vsub.f32 %v12528_v16, %v14840_v7  ;;  %v12547_v38 = vand.u32 4294901760, %v2009_v3 }
 0x23c   :  { %v11538_v55 = vpop.eup %11537  ;;  %v10768_v8 = vadd.f32 %v12487_v5, %v1828_v63  ;;  %9299 = vmatprep.mubr.f32.mxu1 %v2166_v45  ;;  %v2185_v27 = vsub.f32 %v12535_v61, %v14845_v52  ;;  %v12554_v26 = vsub.f32 %v2006_v34, %v12541_v57  ;;  %v2015_v56 = vsel %vm1992_vm2, %v11536_v35, 0 }
 0x23d   :  { %11547 = vtanh.f32 %v10767_v6  ;;  %9300 = vmatmul.mubr.f32.vlgmr.msra.gmra.mrb[0].mxu1 %v2176_v32  ;;  %v12558_v60 = vsub.f32 %v2009_v3, %v12547_v38  ;;  %v2012_v36 = vsel %vm1992_vm2, %v11538_v55, 0  ;;  %v2196_v45 = vand.u32 4294901760, %v2195_v29 }
 0x23e   :  { %11549 = vtanh.f32 %v10768_v8  ;;  %v9258_v10 = vpop.f32.mrb[14].mxu0  ;;  %10478 = vmatpush3.bf16.msra.mxu1 %v12427_v41  ;;  %v2186_v14 = vand.u32 4294901760, %v2185_v27  ;;  %v14838_v21 = vand.u32 4294901760, %v12554_v26  ;;  %v12563_v43 = vand.u32 4294901760, %v2012_v36 }
 0x23f   :  { %v11540_v58 = vpop.eup %11539  ;;  %v10769_v34 = vadd.f32 %v9258_v10, %v12487_v5  ;;  %v1840_v39 = vpop.f32.mrb[15].mxu0  ;;  %v14836_v35 = vand.u32 4294901760, %v12558_v60  ;;  %v12567_v3 = vand.u32 4294901760, %v2015_v56  ;;  %10480 = vmatprep.subr.bf16.mxu1 %v12442_v53 }
 0x240   :  { %v11542_v6 = vpop.eup %11541  ;;  %v10770_v63 = vadd.f32 %v12487_v5, %v1840_v39  ;;  %9302 = vmatprep.mubr.f32.mxu1 %v2186_v14  ;;  %v2205_v41 = vsub.f32 %v12554_v26, %v14838_v21  ;;  %v12575_v32 = vsub.f32 %v2012_v36, %v12563_v43  ;;  %v2021_v55 = vsel %vm1992_vm2, %v11540_v58, 0 }
 0x241   :  { %11551 = vtanh.f32 %v10769_v34  ;;  %9303 = vmatmul.mubr.f32.gmra.mrb[2].mxu1 %v2196_v45  ;;  %v2215_v29 = vsub.f32 %v12558_v60, %v14836_v35  ;;  %v12582_v8 = vsub.f32 %v2015_v56, %v12567_v3  ;;  %v2018_v27 = vsel %vm1992_vm2, %v11542_v6, 0 }
 0x242   :  { %11553 = vtanh.f32 %v10770_v63  ;;  %v9261_v10 = vpop.f32.mrb[16].mxu0  ;;  %v2206_v14 = vand.u32 4294901760, %v2205_v41  ;;  %v14839_v39 = vand.u32 4294901760, %v12575_v32  ;;  %v12586_v36 = vand.u32 4294901760, %v2018_v27  ;;  %10482 = vmatpush3.bf16.msra.mxu1 %v12442_v53 }
 0x243   :  { %15311 = vst [vmem:[#allocation9_spill] sm:$0xff] %v12582_v8  ;;  %v11544_v58 = vpop.eup %11543  ;;  %v10771_v34 = vadd.f32 %v9261_v10, %v12487_v5  ;;  %v1852_v45 = vpop.f32.mrb[17].mxu0  ;;  %v2216_v9 = vand.u32 4294901760, %v2215_v29  ;;  %v14841_v35 = vand.u32 4294901760, %v12582_v8  ;;  %v12591_v56 = vand.u32 4294901760, %v2021_v55  ;;  %10484 = vmatprep.subr.bf16.mxu1 %v12456_v15 }
 0x244   :  { %v11546_v6 = vpop.eup %11545  ;;  %v10772_v63 = vadd.f32 %v12487_v5, %v1852_v45  ;;  %9305 = vmatprep.mubr.f32.mxu1 %v2206_v14  ;;  %v2225_v41 = vsub.f32 %v12575_v32, %v14839_v39  ;;  %v12599_v53 = vsub.f32 %v2018_v27, %v12586_v36  ;;  %v2027_v10 = vsel %vm1992_vm2, %v11544_v58, 0 }
 0x245   :  { %11555 = vtanh.f32 %v10771_v34  ;;  %9306 = vmatmul.mubr.f32.gmra.mrb[4].mxu1 %v2216_v9  ;;  %v2235_v29 = vsub.f32 %v12582_v8, %v14841_v35  ;;  %v12606_v0 = vsub.f32 %v2021_v55, %v12591_v56  ;;  %v2024_v14 = vsel %vm1992_vm2, %v11546_v6, 0 }
 0x246   :  { %15312 = vst [vmem:[#allocation10_spill] sm:$0xff] %v12599_v53  ;;  %11557 = vtanh.f32 %v10772_v63  ;;  %v9264_v45 = vpop.f32.mrb[18].mxu0  ;;  %v2226_v21 = vand.u32 4294901760, %v2225_v41  ;;  %v14844_v39 = vand.u32 4294901760, %v12599_v53  ;;  %v12610_v27 = vand.u32 4294901760, %v2024_v14  ;;  %10486 = vmatpush3.bf16.msra.mxu1 %v12456_v15 }
 0x247   :  { %15313 = vst [vmem:[#allocation11_spill] sm:$0xff] %v12606_v0  ;;  %v11548_v58 = vpop.eup %11547  ;;  %v10773_v9 = vadd.f32 %v9264_v45, %v12487_v5  ;;  %v1864_v34 = vpop.f32.mrb[19].mxu0  ;;  %v2236_v7 = vand.u32 4294901760, %v2235_v29  ;;  %v14846_v35 = vand.u32 4294901760, %v12606_v0  ;;  %v12615_v55 = vand.u32 4294901760, %v2027_v10  ;;  %10488 = vmatprep.subr.bf16.mxu1 %v12470_v62 }
 0x248   :  { %v11550_v6 = vpop.eup %11549  ;;  %v10774_v63 = vadd.f32 %v12487_v5, %v1864_v34  ;;  %9308 = vmatprep.mubr.f32.mxu1 %v2226_v21  ;;  %v2245_v41 = vsub.f32 %v12599_v53, %v14844_v39  ;;  %v12623_v15 = vsub.f32 %v2024_v14, %v12610_v27  ;;  %v2033_v45 = vsel %vm1992_vm2, %v11548_v58, 0 }
 0x249   :  { %11559 = vtanh.f32 %v10773_v9  ;;  %9309 = vmatmul.mubr.f32.gmra.mrb[6].mxu1 %v2236_v7  ;;  %v2255_v29 = vsub.f32 %v12606_v0, %v14846_v35  ;;  %v12630_v44 = vsub.f32 %v2027_v10, %v12615_v55  ;;  %v2030_v21 = vsel %vm1992_vm2, %v11550_v6, 0 }
 0x24a   :  { %15314 = vst [vmem:[#allocation12_spill] sm:$0xff] %v12623_v15  ;;  %11561 = vtanh.f32 %v10774_v63  ;;  %v9267_v34 = vpop.f32.mrb[20].mxu0  ;;  %v2246_v13 = vand.u32 4294901760, %v2245_v41  ;;  %v14849_v39 = vand.u32 4294901760, %v12623_v15  ;;  %v12634_v14 = vand.u32 4294901760, %v2030_v21  ;;  %10490 = vmatpush3.bf16.msra.mxu1 %v12470_v62 }
 0x24b   :  { %15315 = vst [vmem:[#allocation13_spill] sm:$0xff] %v12630_v44  ;;  %v11552_v58 = vpop.eup %11551  ;;  %v10775_v7 = vadd.f32 %v9267_v34, %v12487_v5  ;;  %v1876_v9 = vpop.f32.mrb[21].mxu0  ;;  %v2256_v52 = vand.u32 4294901760, %v2255_v29  ;;  %v14852_v35 = vand.u32 4294901760, %v12630_v44  ;;  %v12639_v10 = vand.u32 4294901760, %v2033_v45  ;;  %10492 = vmatprep.subr.bf16.mxu1 %v12474_v18 }
 0x24c   :  { %v11554_v6 = vpop.eup %11553  ;;  %v10776_v63 = vadd.f32 %v12487_v5, %v1876_v9  ;;  %9311 = vmatprep.mubr.f32.mxu1 %v2246_v13  ;;  %v2265_v41 = vsub.f32 %v12623_v15, %v14849_v39  ;;  %v12647_v62 = vsub.f32 %v2030_v21, %v12634_v14  ;;  %v2039_v34 = vsel %vm1992_vm2, %v11552_v58, 0 }
 0x24d   :  { %11563 = vtanh.f32 %v10775_v7  ;;  %9312 = vmatmul.mubr.f32.gmra.mrb[8].mxu1 %v2256_v52  ;;  %v2275_v29 = vsub.f32 %v12630_v44, %v14852_v35  ;;  %v12654_v1 = vsub.f32 %v2033_v45, %v12639_v10  ;;  %v2036_v13 = vsel %vm1992_vm2, %v11554_v6, 0 }
 0x24e   :  { %15316 = vst [vmem:[#allocation14_spill] sm:$0xff] %v12647_v62  ;;  %11565 = vtanh.f32 %v10776_v63  ;;  %v9270_v9 = vpop.f32.mrb[22].mxu0  ;;  %v2266_v25 = vand.u32 4294901760, %v2265_v41  ;;  %v14855_v39 = vand.u32 4294901760, %v12647_v62  ;;  %v12658_v21 = vand.u32 4294901760, %v2036_v13 }
 0x24f   :  { %15317 = vst [vmem:[#allocation15_spill] sm:$0xff] %v12654_v1  ;;  %v11556_v23 = vpop.eup %11555  ;;  %v10777_v58 = vadd.f32 %v9270_v9, %v12487_v5  ;;  %v1888_v52 = vpop.f32.mrb[23].mxu0  ;;  %v2276_v7 = vand.u32 4294901760, %v2275_v29  ;;  %v14858_v22 = vand.u32 4294901760, %v12654_v1  ;;  %v12662_v35 = vand.u32 4294901760, %v2039_v34 }
 0x250   :  { %15318 = vst [vmem:[#allocation17_spill] sm:$0xff] %v12658_v21  ;;  %v11558_v45 = vpop.eup %11557  ;;  %v10778_v48 = vadd.f32 %v12487_v5, %v1888_v52  ;;  %9314 = vmatprep.mubr.f32.mxu1 %v2266_v25  ;;  %v2285_v6 = vsub.f32 %v12647_v62, %v14855_v39  ;;  %v12669_v63 = vsub.f32 %v2036_v13, %v12658_v21  ;;  %v2045_v41 = vsel %vm1992_vm2, %v11556_v23, 0 }
 0x251   :  { %15319 = vst [vmem:[#allocation18_spill] sm:$0xff] %v12662_v35  ;;  %11567 = vtanh.f32 %v10777_v58  ;;  %9315 = vmatmul.mubr.f32.gmra.mrb[10].mxu1 %v2276_v7  ;;  %v2295_v29 = vsub.f32 %v12654_v1, %v14858_v22  ;;  %v12676_v9 = vsub.f32 %v2039_v34, %v12662_v35  ;;  %v2042_v25 = vsel %vm1992_vm2, %v11558_v45, 0 }
 0x252   :  { %15320 = vst [vmem:[#allocation21_spill] sm:$0xff] %v12669_v63  ;;  %11569 = vtanh.f32 %v10778_v48  ;;  %v9273_v52 = vpop.f32.mrb[24].mxu0  ;;  %v2286_v54 = vand.u32 4294901760, %v2285_v6  ;;  %v14861_v39 = vand.u32 4294901760, %v12669_v63  ;;  %v12680_v13 = vand.u32 4294901760, %v2042_v25 }
 0x253   :  { %15321 = vst [vmem:[#allocation24_spill] sm:$0xff] %v12676_v9  ;;  %v11560_v50 = vpop.eup %11559  ;;  %v10779_v23 = vadd.f32 %v9273_v52, %v12487_v5  ;;  %v1900_v58 = vpop.f32.mrb[25].mxu0  ;;  %v2296_v7 = vand.u32 4294901760, %v2295_v29  ;;  %v14864_v20 = vand.u32 4294901760, %v12676_v9  ;;  %v12684_v22 = vand.u32 4294901760, %v2045_v41 }
 0x254   :  { %15322 = vst [vmem:[#allocation16_spill] sm:$0xff] %v12680_v13  ;;  %v11562_v34 = vpop.eup %11561  ;;  %v10780_v12 = vadd.f32 %v12487_v5, %v1900_v58  ;;  %9317 = vmatprep.mubr.f32.mxu1 %v2286_v54  ;;  %v2305_v48 = vsub.f32 %v12669_v63, %v14861_v39  ;;  %v12691_v45 = vsub.f32 %v2042_v25, %v12680_v13  ;;  %v2051_v6 = vsel %vm1992_vm2, %v11560_v50, 0 }
 0x255   :  { %15323 = vst [vmem:[#allocation19_spill] sm:$0xff] %v12684_v22  ;;  %11571 = vtanh.f32 %v10779_v23  ;;  %9318 = vmatmul.mubr.f32.gmra.mrb[12].mxu1 %v2296_v7  ;;  %v2315_v29 = vsub.f32 %v12676_v9, %v14864_v20  ;;  %v12698_v52 = vsub.f32 %v2045_v41, %v12684_v22  ;;  %v2048_v54 = vsel %vm1992_vm2, %v11562_v34, 0 }
 0x256   :  { %15324 = vst [vmem:[#allocation20_spill] sm:$0xff] %v12691_v45  ;;  %11573 = vtanh.f32 %v10780_v12  ;;  %v9276_v58 = vpop.f32.mrb[26].mxu0  ;;  %v2306_v2 = vand.u32 4294901760, %v2305_v48  ;;  %v14869_v39 = vand.u32 4294901760, %v12691_v45  ;;  %v12702_v25 = vand.u32 4294901760, %v2048_v54 }
 0x257   :  { %15325 = vst [vmem:[#allocation22_spill] sm:$0xff] %v12698_v52  ;;  %v11564_v19 = vpop.eup %11563  ;;  %v10781_v50 = vadd.f32 %v9276_v58, %v12487_v5  ;;  %v1912_v23 = vpop.f32.mrb[27].mxu0  ;;  %v2316_v7 = vand.u32 4294901760, %v2315_v29  ;;  %v14874_v37 = vand.u32 4294901760, %v12698_v52  ;;  %v12706_v20 = vand.u32 4294901760, %v2051_v6 }
 0x258   :  { %15326 = vst [vmem:[#allocation23_spill] sm:$0xff] %v12702_v25  ;;  %v11566_v41 = vpop.eup %11565  ;;  %v10782_v9 = vadd.f32 %v12487_v5, %v1912_v23  ;;  %9320 = vmatprep.mubr.f32.mxu1 %v2306_v2  ;;  %v2325_v12 = vsub.f32 %v12691_v45, %v14869_v39  ;;  %v12713_v34 = vsub.f32 %v2048_v54, %v12702_v25  ;;  %v2057_v48 = vsel %vm1992_vm2, %v11564_v19, 0 }
 0x259   :  { %15327 = vst [vmem:[#allocation25_spill] sm:$0xff] %v12706_v20  ;;  %11575 = vtanh.f32 %v10781_v50  ;;  %9321 = vmatmul.mubr.f32.gmra.mrb[14].mxu1 %v2316_v7  ;;  %v2335_v29 = vsub.f32 %v12698_v52, %v14874_v37  ;;  %v12720_v58 = vsub.f32 %v2051_v6, %v12706_v20  ;;  %v2054_v2 = vsel %vm1992_vm2, %v11566_v41, 0 }
 0x25a   :  { %15328 = vst [vmem:[#allocation26_spill] sm:$0xff] %v12713_v34  ;;  %11577 = vtanh.f32 %v10782_v9  ;;  %v9279_v23 = vpop.f32.mrb[28].mxu0  ;;  %v2326_v63 = vand.u32 4294901760, %v2325_v12  ;;  %v14879_v39 = vand.u32 4294901760, %v12713_v34  ;;  %v12724_v54 = vand.u32 4294901760, %v2054_v2 }
 0x25b   :  { %15329 = vst [vmem:[#allocation27_spill] sm:$0xff] %v12720_v58  ;;  %v11568_v45 = vpop.eup %11567  ;;  %v10783_v19 = vadd.f32 %v9279_v23, %v12487_v5  ;;  %v1924_v50 = vpop.f32.mrb[29].mxu0  ;;  %v2336_v7 = vand.u32 4294901760, %v2335_v29  ;;  %v14884_v1 = vand.u32 4294901760, %v12720_v58  ;;  %v12728_v37 = vand.u32 4294901760, %v2057_v48 }
 0x25c   :  { %15330 = vst [vmem:[#allocation28_spill] sm:$0xff] %v12724_v54  ;;  %v11570_v6 = vpop.eup %11569  ;;  %v10784_v52 = vadd.f32 %v12487_v5, %v1924_v50  ;;  %9323 = vmatprep.mubr.f32.mxu1 %v2326_v63  ;;  %v2345_v9 = vsub.f32 %v12713_v34, %v14879_v39  ;;  %v12735_v41 = vsub.f32 %v2054_v2, %v12724_v54  ;;  %v2063_v12 = vsel %vm1992_vm2, %v11568_v45, 0 }
 0x25d   :  { %15331 = vst [vmem:[#allocation29_spill] sm:$0xff] %v12728_v37  ;;  %11579 = vtanh.f32 %v10783_v19  ;;  %9324 = vmatmul.mubr.f32.gmra.mrb[16].mxu1 %v2336_v7  ;;  %v2355_v29 = vsub.f32 %v12720_v58, %v14884_v1  ;;  %v12742_v23 = vsub.f32 %v2057_v48, %v12728_v37  ;;  %v2060_v63 = vsel %vm1992_vm2, %v11570_v6, 0 }
 0x25e   :  { %15332 = vst [vmem:[#allocation30_spill] sm:$0xff] %v12735_v41  ;;  %11581 = vtanh.f32 %v10784_v52  ;;  %v9282_v50 = vpop.f32.mrb[30].mxu0  ;;  %v2346_v62 = vand.u32 4294901760, %v2345_v9  ;;  %v14887_v39 = vand.u32 4294901760, %v12735_v41  ;;  %v12746_v2 = vand.u32 4294901760, %v2060_v63 }
 0x25f   :  { %15333 = vst [vmem:[#allocation31_spill] sm:$0xff] %v12742_v23  ;;  %v11572_v34 = vpop.eup %11571  ;;  %v10785_v45 = vadd.f32 %v9282_v50, %v12487_v5  ;;  %v1936_v19 = vpop.f32.mrb[31].mxu0  ;;  %v2356_v7 = vand.u32 4294901760, %v2355_v29  ;;  %v14890_v44 = vand.u32 4294901760, %v12742_v23  ;;  %v12750_v1 = vand.u32 4294901760, %v2063_v12 }
 0x260   :  { %15334 = vst [vmem:[#allocation32_spill] sm:$0xff] %v12746_v2  ;;  %v11574_v48 = vpop.eup %11573  ;;  %v10786_v58 = vadd.f32 %v12487_v5, %v1936_v19  ;;  %9326 = vmatprep.mubr.f32.mxu1 %v2346_v62  ;;  %v2365_v52 = vsub.f32 %v12735_v41, %v14887_v39  ;;  %v12757_v6 = vsub.f32 %v2060_v63, %v12746_v2  ;;  %v2069_v9 = vsel %vm1992_vm2, %v11572_v34, 0 }
 0x261   :  { %15335 = vst [vmem:[#allocation33_spill] sm:$0xff] %v12750_v1  ;;  %11583 = vtanh.f32 %v10785_v45  ;;  %9327 = vmatmul.mubr.f32.gmra.mrb[18].mxu1 %v2356_v7  ;;  %v2375_v29 = vsub.f32 %v12742_v23, %v14890_v44  ;;  %v12764_v50 = vsub.f32 %v2063_v12, %v12750_v1  ;;  %v2066_v5 = vsel %vm1992_vm2, %v11574_v48, 0 }
 0x262   :  { %15336 = vst [vmem:[#allocation34_spill] sm:$0xff] %v12757_v6  ;;  %11585 = vtanh.f32 %v10786_v58  ;;  %v2366_v62 = vand.u32 4294901760, %v2365_v52  ;;  %v14893_v19 = vand.u32 4294901760, %v12757_v6  ;;  %v12768_v39 = vand.u32 4294901760, %v2066_v5 }
 0x263   :  { %15337 = vst [vmem:[#allocation35_spill] sm:$0xff] %v12764_v50  ;;  %v11576_v63 = vpop.eup %11575  ;;  %v2376_v41 = vand.u32 4294901760, %v2375_v29  ;;  %v14898_v34 = vand.u32 4294901760, %v12764_v50  ;;  %v12771_v45 = vand.u32 4294901760, %v2069_v9 }
 0x264   :  { %15338 = vst [vmem:[#allocation36_spill] sm:$0xff] %v12768_v39  ;;  %v11578_v7 = vpop.eup %11577  ;;  %9329 = vmatprep.mubr.f32.mxu1 %v2366_v62  ;;  %v2385_v12 = vsub.f32 %v12757_v6, %v14893_v19  ;;  %v12777_v48 = vsub.f32 %v2066_v5, %v12768_v39  ;;  %v2075_v58 = vsel %vm1992_vm2, %v11576_v63, 0 }
 0x265   :  { %15339 = vst [vmem:[#allocation37_spill] sm:$0xff] %v12771_v45  ;;  %9330 = vmatmul.mubr.f32.gmra.mrb[20].mxu1 %v2376_v41  ;;  %v2395_v52 = vsub.f32 %v12764_v50, %v14898_v34  ;;  %v12784_v29 = vsub.f32 %v2069_v9, %v12771_v45  ;;  %v2072_v44 = vsel %vm1992_vm2, %v11578_v7, 0  ;;  %v12787_v62 = vand.u32 4294901760, %v2075_v58 }
 0x266   :  { %15340 = vst [vmem:[#allocation38_spill] sm:$0xff] %v12777_v48  ;;  %v2386_v23 = vand.u32 4294901760, %v2385_v12  ;;  %v14905_v19 = vand.u32 4294901760, %v12777_v48  ;;  %v12790_v6 = vand.u32 4294901760, %v2072_v44 }
 0x267   :  { %15341 = vst [vmem:[#allocation39_spill] sm:$0xff] %v12784_v29  ;;  %15342 = vst [vmem:[#allocation40_spill] sm:$0xff] %v12787_v62  ;;  %v11580_v5 = vpop.eup %11579  ;;  %v2396_v15 = vand.u32 4294901760, %v2395_v52  ;;  %v14908_v41 = vand.u32 4294901760, %v12784_v29  ;;  %v12794_v63 = vsub.f32 %v2075_v58, %v12787_v62 }
 0x268   :  { %15343 = vst [vmem:[#allocation41_spill] sm:$0xff] %v12790_v6  ;;  %v11582_v34 = vpop.eup %11581  ;;  %9332 = vmatprep.mubr.f32.mxu1 %v2386_v23  ;;  %v2405_v9 = vsub.f32 %v12777_v48, %v14905_v19  ;;  %v12800_v7 = vsub.f32 %v2072_v44, %v12790_v6  ;;  %v2081_v12 = vsel %vm1992_vm2, %v11580_v5, 0 }
 0x269   :  { %15344 = vst [vmem:[#allocation42_spill] sm:$0xff] %v12794_v63  ;;  %9333 = vmatmul.mubr.f32.gmra.mrb[22].mxu1 %v2396_v15  ;;  %v2415_v52 = vsub.f32 %v12784_v29, %v14908_v41  ;;  %v14913_v50 = vand.u32 4294901760, %v12794_v63  ;;  %v2078_v58 = vsel %vm1992_vm2, %v11582_v34, 0  ;;  %v12808_v0 = vand.u32 4294901760, %v2081_v12 }
 0x26a   :  { %15345 = vst [vmem:[#allocation43_spill] sm:$0xff] %v12800_v7  ;;  %v2406_v23 = vand.u32 4294901760, %v2405_v9  ;;  %v14917_v53 = vand.u32 4294901760, %v12800_v7  ;;  %v12811_v19 = vand.u32 4294901760, %v2078_v58 }
 0x26b   :  { %15346 = vst [vmem:[#allocation44_spill] sm:$0xff] %v12808_v0  ;;  %v11584_v44 = vpop.eup %11583  ;;  %v2416_v48 = vand.u32 4294901760, %v2415_v52  ;;  %v2435_v15 = vsub.f32 %v12794_v63, %v14913_v50  ;;  %v12817_v5 = vsub.f32 %v2081_v12, %v12808_v0 }
 0x26c   :  { %15347 = vst [vmem:[#allocation45_spill] sm:$0xff] %v12811_v19  ;;  %v11586_v41 = vpop.eup %11585  ;;  %9335 = vmatprep.mubr.f32.mxu1 %v2406_v23  ;;  %v2425_v34 = vsub.f32 %v12800_v7, %v14917_v53  ;;  %v12823_v9 = vsub.f32 %v2078_v58, %v12811_v19  ;;  %v2087_v29 = vsel %vm1992_vm2, %v11584_v44, 0 }
 0x26d   :  { %9336 = vmatmul.mubr.f32.gmra.mrb[24].mxu1 %v2416_v48  ;;  %v14920_v52 = vand.u32 4294901760, %v12817_v5  ;;  %v2084_v8 = vsel %vm1992_vm2, %v11586_v41, 0  ;;  %v12828_v50 = vand.u32 4294901760, %v2087_v29  ;;  %v2436_v46 = vand.u32 4294901760, %v2435_v15 }
 0x26e   :  { %v2426_v12 = vand.u32 4294901760, %v2425_v34  ;;  %v14923_v63 = vand.u32 4294901760, %v12823_v9  ;;  %v12831_v23 = vand.u32 4294901760, %v2084_v8 }
 0x26f   :  { %15348 = vst [vmem:[#allocation46_spill] sm:$0xff] %v12828_v50  ;;  %v2455_v58 = vsub.f32 %v12817_v5, %v14920_v52  ;;  %v12837_v53 = vsub.f32 %v2087_v29, %v12828_v50 }
 0x270   :  { %15349 = vst [vmem:[#allocation47_spill] sm:$0xff] %v12831_v23  ;;  %9338 = vmatprep.mubr.f32.mxu1 %v2426_v12  ;;  %v2445_v48 = vsub.f32 %v12823_v9, %v14923_v63  ;;  %v12843_v41 = vsub.f32 %v2084_v8, %v12831_v23  ;;  %v15368_v63 = vld [vmem:[#allocation34_spill] sm:$0xff] }
 0x271   :  { %9339 = vmatmul.mubr.f32.gmra.mrb[26].mxu1 %v2436_v46  ;;  %v14921_v44 = vand.u32 4294901760, %v12837_v53  ;;  %v2456_v7 = vand.u32 4294901760, %v2455_v58  ;;  %v15350_v46 = vand.u32 4294901760, %v12415_v59  ;;  %v15356_v58 = vld [vmem:[#allocation12_spill] sm:$0xff]  ;;  %v15360_v59 = vld [vmem:[#allocation21_spill] sm:$0xff] }
 0x272   :  { %v2446_v34 = vand.u32 4294901760, %v2445_v48  ;;  %v14922_v15 = vand.u32 4294901760, %v12843_v41  ;;  %v15357_v48 = vld [vmem:[#allocation13_spill] sm:$0xff] }
 0x273   :  { %v2475_v29 = vsub.f32 %v12837_v53, %v14921_v44  ;;  %v15366_v44 = vld [vmem:[#allocation30_spill] sm:$0xff] }
 0x274   :  { %9341 = vmatprep.mubr.f32.mxu1 %v2446_v34  ;;  %v2465_v12 = vsub.f32 %v12843_v41, %v14922_v15  ;;  %v15358_v34 = vld [vmem:[#allocation14_spill] sm:$0xff]  ;;  %v15367_v15 = vld [vmem:[#allocation31_spill] sm:$0xff] }
 0x275   :  { %9342 = vmatmul.mubr.f32.gmra.mrb[28].mxu1 %v2456_v7  ;;  %v2476_v8 = vand.u32 4294901760, %v2475_v29  ;;  %v15354_v7 = vld [vmem:[#allocation10_spill] sm:$0xff]  ;;  %v15359_v29 = vld [vmem:[#allocation15_spill] sm:$0xff] }
 0x276   :  { %v2466_v52 = vand.u32 4294901760, %v2465_v12  ;;  %v15361_v12 = vld [vmem:[#allocation24_spill] sm:$0xff] }
 0x278   :  { %9344 = vmatprep.mubr.f32.mxu1 %v2466_v52  ;;  %v15355_v52 = vld [vmem:[#allocation11_spill] sm:$0xff] }
 0x279   :  { %9345 = vmatmul.mubr.f32.gmra.mrb[30].mxu1 %v2476_v8  ;;  %v15362_v8 = vld [vmem:[#allocation20_spill] sm:$0xff] }
 0x27a   :  { %9363 = vmatprep.mubr.f32.mxu1 %v12505_v11 }
 0x27d   :  { %9364 = vmatmul.mubr.f32.vlgmr.msra.gmra.mrb[0].mxu1 %v12503_v31 }
 0x27e   :  { %9366 = vmatprep.mubr.f32.mxu1 %v12521_v24  ;;  %10494 = vmatpush3.bf16.msra.mxu1 %v12474_v18  ;;  %v15351_v18 = vld [vmem:[#allocation2_spill] sm:$0xff] }
 0x27f   :  { %10496 = vmatprep.subr.bf16.mxu1 %v12478_v28 }
 0x281   :  { %9367 = vmatmul.mubr.f32.gmra.mrb[2].mxu1 %v12518_v40 }
 0x282   :  { %9369 = vmatprep.mubr.f32.mxu1 %v12541_v57  ;;  %10498 = vmatpush3.bf16.msra.mxu1 %v12478_v28  ;;  %v15352_v28 = vand.u32 4294901760, %v15351_v18  ;;  %v15364_v18 = vld [vmem:[#allocation26_spill] sm:$0xff] }
 0x283   :  { %10500 = vmatprep.subr.bf16.mxu1 %v12482_v33 }
 0x285   :  { %9370 = vmatmul.mubr.f32.gmra.mrb[4].mxu1 %v12547_v38 }
 0x286   :  { %9372 = vmatprep.mubr.f32.mxu1 %v12563_v43  ;;  %10502 = vmatpush3.bf16.msra.mxu1 %v12482_v33  ;;  %v10523_v33 = vpack.c.bf16 %v15352_v28, %v15350_v46  ;;  %v15363_v46 = vld [vmem:[#allocation22_spill] sm:$0xff]  ;;  %v15365_v28 = vld [vmem:[#allocation27_spill] sm:$0xff] }
 0x287   :  { %10504 = vmatprep.subr.bf16.mxu1 %v12497_v17 }
 0x289   :  { %9373 = vmatmul.mubr.f32.gmra.mrb[6].mxu1 %v12567_v3 }
 0x28a   :  { %9375 = vmatprep.mubr.f32.mxu1 %v12586_v36  ;;  %10506 = vmatpush3.bf16.msra.mxu1 %v12497_v17  ;;  %v15353_v17 = vld [vmem:[#allocation9_spill] sm:$0xff] }
 0x28b   :  { %10508 = vmatprep.subr.bf16.mxu1 %v12381_v30 }
 0x28d   :  { %9376 = vmatmul.mubr.f32.gmra.mrb[8].mxu1 %v12591_v56 }
 0x28e   :  { %9378 = vmatprep.mubr.f32.mxu1 %v12610_v27 }
 0x291   :  { %9379 = vmatmul.mubr.f32.gmra.mrb[10].mxu1 %v12615_v55 }
 0x292   :  { %9381 = vmatprep.mubr.f32.mxu1 %v12634_v14 }
 0x295   :  { %9382 = vmatmul.mubr.f32.gmra.mrb[12].mxu1 %v12639_v10 }
 0x296   :  { %9384 = vmatprep.mubr.f32.mxu1 %v12658_v21 }
 0x299   :  { %9385 = vmatmul.mubr.f32.gmra.mrb[14].mxu1 %v12662_v35 }
 0x29a   :  { %9387 = vmatprep.mubr.f32.mxu1 %v12680_v13  ;;  %v15383_v13 = vld [vmem:[#allocation6_spill] sm:$0xff] }
 0x29b   :  { %v15384_v35 = vand.u32 4294901760, %v15383_v13  ;;  %v15401_v13 = vand.u32 4294901760, %v15361_v12 }
 0x29d   :  { %9388 = vmatmul.mubr.f32.gmra.mrb[16].mxu1 %v12684_v22 }
 0x29e   :  { %9390 = vmatprep.mubr.f32.mxu1 %v12702_v25  ;;  %v15381_v25 = vld [vmem:[#allocation5_spill] sm:$0xff] }
 0x29f   :  { %v15382_v22 = vand.u32 4294901760, %v15381_v25  ;;  %v15392_v25 = vand.u32 4294901760, %v12575_v32 }
 0x2a1   :  { %9391 = vmatmul.mubr.f32.gmra.mrb[18].mxu1 %v12706_v20  ;;  %v15380_v20 = vand.u32 4294901760, %v12535_v61  ;;  %v10531_v21 = vpack.c.bf16 %v15384_v35, %v15382_v22  ;;  %v15393_v22 = vand.u32 4294901760, %v15353_v17  ;;  %v15398_v35 = vand.u32 4294901760, %v15358_v34 }
 0x2a2   :  { %9393 = vmatprep.mubr.f32.mxu1 %v12724_v54  ;;  %v15379_v54 = vand.u32 4294901760, %v12509_v47 }
 0x2a5   :  { %9394 = vmatmul.mubr.f32.gmra.mrb[20].mxu1 %v12728_v37 }
 0x2a6   :  { %9396 = vmatprep.mubr.f32.mxu1 %v12746_v2 }
 0x2a9   :  { %9397 = vmatmul.mubr.f32.gmra.mrb[22].mxu1 %v12750_v1  ;;  %v15377_v1 = vld [vmem:[#allocation4_spill] sm:$0xff] }
 0x2aa   :  { %9399 = vmatprep.mubr.f32.mxu1 %v12768_v39  ;;  %v15378_v2 = vand.u32 4294901760, %v15377_v1 }
 0x2ad   :  { %9400 = vmatmul.mubr.f32.gmra.mrb[24].mxu1 %v12771_v45  ;;  %v15375_v45 = vld [vmem:[#allocation3_spill] sm:$0xff] }
 0x2ae   :  { %9402 = vmatprep.mubr.f32.mxu1 %v12790_v6  ;;  %v15374_v6 = vand.u32 4294901760, %v12513_v49  ;;  %v15376_v39 = vand.u32 4294901760, %v15375_v45  ;;  %v15403_v45 = vand.u32 4294901760, %v15363_v46 }
 0x2b0   :  { %v10527_v37 = vpack.c.bf16 %v15378_v2, %v15376_v39  ;;  %v15389_v39 = vld [vmem:[#allocation8_spill] sm:$0xff]  ;;  %v15402_v2 = vand.u32 4294901760, %v15362_v8 }
 0x2b1   :  { %9403 = vmatmul.mubr.f32.gmra.mrb[26].mxu1 %v12787_v62  ;;  %v15373_v62 = vld [vmem:[#allocation42_spill] sm:$0xff] }
 0x2b2   :  { %9405 = vmatprep.mubr.f32.mxu1 %v12811_v19  ;;  %v15372_v19 = vld [vmem:[#allocation43_spill] sm:$0xff] }
 0x2b5   :  { %9406 = vmatmul.mubr.f32.gmra.mrb[28].mxu1 %v12808_v0  ;;  %v15371_v0 = vld [vmem:[#allocation39_spill] sm:$0xff] }
 0x2b6   :  { %9408 = vmatprep.mubr.f32.mxu1 %v12831_v23  ;;  %v15370_v23 = vld [vmem:[#allocation38_spill] sm:$0xff] }
 0x2b9   :  { %9409 = vmatmul.mubr.f32.gmra.mrb[30].mxu1 %v12828_v50  ;;  %v15369_v50 = vld [vmem:[#allocation35_spill] sm:$0xff] }
 0x2ba   :  { %9427 = vmatprep.mubr.f32.mxu1 %v12513_v49  ;;  %v15385_v49 = vand.u32 4294901760, %v12528_v16 }
 0x2bd   :  { %9428 = vmatmul.mubr.f32.vlgmr.msra.gmra.mrb[0].mxu1 %v12509_v47  ;;  %v15387_v47 = vld [vmem:[#allocation7_spill] sm:$0xff] }
 0x2be   :  { %9430 = vmatprep.mubr.f32.mxu1 %v12535_v61  ;;  %10510 = vmatpush3.bf16.msra.mxu1 %v12381_v30  ;;  %v15388_v1 = vand.u32 4294901760, %v15387_v47  ;;  %v15390_v61 = vand.u32 4294901760, %v15389_v39  ;;  %v15422_v39 = vld [vmem:[#allocation23_spill] sm:$0xff] }
 0x2bf   :  { %10512 = vmatprep.subr.bf16.mxu1 %v12391_v4 }
 0x2c1   :  { %9431 = vmatmul.mubr.f32.gmra.mrb[2].mxu1 %v12528_v16  ;;  %v15394_v16 = vand.u32 4294901760, %v15354_v7 }
 0x2c2   :  { %9433 = vmatprep.mubr.f32.mxu1 %v12554_v26  ;;  %10514 = vmatpush3.bf16.msra.mxu1 %v12391_v4 }
 0x2c3   :  { %10516 = vmatprep.subr.bf16.mxu1 %v12401_v42 }
 0x2c5   :  { %9434 = vmatmul.mubr.f32.gmra.mrb[4].mxu1 %v12558_v60 }
 0x2c6   :  { %9436 = vmatprep.mubr.f32.mxu1 %v12575_v32  ;;  %10518 = vmatpush3.bf16.msra.mxu1 %v12401_v42  ;;  %v15399_v32 = vand.u32 4294901760, %v15359_v29 }
 0x2c7   :  { %10520 = vmatprep.subr.bf16.mxu1 %v12411_v51 }
 0x2c9   :  { %9437 = vmatmul.mubr.f32.gmra.mrb[6].mxu1 %v15353_v17  ;;  %v15405_v17 = vand.u32 4294901760, %v15365_v28 }
 0x2ca   :  { %9439 = vmatprep.mubr.f32.mxu1 %v15354_v7  ;;  %10522 = vmatpush3.bf16.msra.mxu1 %v12411_v51  ;;  %v15406_v7 = vand.u32 4294901760, %v15366_v44 }
 0x2cb   :  { %10524 = vmatprep.subr.bf16.mxu1 %v10523_v33 }
 0x2cd   :  { %9440 = vmatmul.mubr.f32.gmra.mrb[8].mxu1 %v15355_v52 }
 0x2ce   :  { %9442 = vmatprep.mubr.f32.mxu1 %v15356_v58 }
 0x2d1   :  { %9443 = vmatmul.mubr.f32.gmra.mrb[10].mxu1 %v15357_v48 }
 0x2d2   :  { %9445 = vmatprep.mubr.f32.mxu1 %v15358_v34  ;;  %v15410_v34 = vand.u32 4294901760, %v15370_v23 }
 0x2d5   :  { %9446 = vmatmul.mubr.f32.gmra.mrb[12].mxu1 %v15359_v29  ;;  %v15411_v29 = vand.u32 4294901760, %v15371_v0 }
 0x2d6   :  { %9448 = vmatprep.mubr.f32.mxu1 %v15360_v59 }
 0x2d9   :  { %9449 = vmatmul.mubr.f32.gmra.mrb[14].mxu1 %v15361_v12  ;;  %v13040_v12 = vld [vmem:[%s14753_s1 + $0xa0] sm:$0xff] }
 0x2da   :  { %9451 = vmatprep.mubr.f32.mxu1 %v15362_v8  ;;  %v13045_v8 = vld [vmem:[%s14753_s1 + $0xa8] sm:$0xff] }
 0x2dd   :  { %9452 = vmatmul.mubr.f32.gmra.mrb[16].mxu1 %v15363_v46 }
 0x2de   :  { %9454 = vmatprep.mubr.f32.mxu1 %v15364_v18 }
 0x2e1   :  { %9455 = vmatmul.mubr.f32.gmra.mrb[18].mxu1 %v15365_v28 }
 0x2e2   :  { %9457 = vmatprep.mubr.f32.mxu1 %v15366_v44  ;;  %v15413_v44 = vand.u32 4294901760, %v15373_v62 }
 0x2e5   :  { %9458 = vmatmul.mubr.f32.gmra.mrb[20].mxu1 %v15367_v15 }
 0x2e6   :  { %9460 = vmatprep.mubr.f32.mxu1 %v15368_v63 }
 0x2e9   :  { %9461 = vmatmul.mubr.f32.gmra.mrb[22].mxu1 %v15369_v50 }
 0x2ea   :  { %9463 = vmatprep.mubr.f32.mxu1 %v15370_v23  ;;  %v15417_v23 = vand.u32 4294901760, %v12837_v53 }
 0x2ed   :  { %9464 = vmatmul.mubr.f32.gmra.mrb[24].mxu1 %v15371_v0  ;;  %v13016_v0 = vld [vmem:[%s14753_s1 + $0x80] sm:$0xff] }
 0x2ee   :  { %9466 = vmatprep.mubr.f32.mxu1 %v15372_v19 }
 0x2f1   :  { %9467 = vmatmul.mubr.f32.gmra.mrb[26].mxu1 %v15373_v62  ;;  %v13026_v62 = vld [vmem:[%s14753_s1 + $0x90] sm:$0xff] }
 0x2f2   :  { %9469 = vmatprep.mubr.f32.mxu1 %v12823_v9 }
 0x2f5   :  { %9470 = vmatmul.mubr.f32.gmra.mrb[28].mxu1 %v12817_v5 }
 0x2f6   :  { %9472 = vmatprep.mubr.f32.mxu1 %v12843_v41 }
 0x2f9   :  { %9473 = vmatmul.mubr.f32.gmra.mrb[30].mxu1 %v12837_v53  ;;  %v4102_v53 = vand.u32 4294901760, %v13016_v0 }
 0x2fa   :  { %9491 = vmatprep.mubr.f32.mxu1 %v15374_v6  ;;  %v15386_v6 = vand.u32 4294901760, %v12554_v26  ;;  %v15396_v26 = vand.u32 4294901760, %v15356_v58  ;;  %v15408_v58 = vand.u32 4294901760, %v15368_v63  ;;  %v15415_v63 = vand.u32 4294901760, %v12817_v5 }
 0x2fd   :  { %9492 = vmatmul.mubr.f32.vlgmr.msra.gmra.mrb[0].mxu1 %v15379_v54  ;;  %v15391_v54 = vand.u32 4294901760, %v12558_v60  ;;  %v15397_v60 = vand.u32 4294901760, %v15357_v48  ;;  %v15409_v48 = vand.u32 4294901760, %v15369_v50  ;;  %v15416_v50 = vand.u32 4294901760, %v12843_v41 }
 0x2fe   :  { %9494 = vmatprep.mubr.f32.mxu1 %v15380_v20  ;;  %10526 = vmatpush3.bf16.msra.mxu1 %v10523_v33  ;;  %v10535_v20 = vpack.c.bf16 %v15390_v61, %v15388_v1  ;;  %v15404_v33 = vand.u32 4294901760, %v15364_v18  ;;  %v4108_v41 = vand.u32 4294901760, %v13026_v62  ;;  %v15421_v1 = vld [vmem:[#allocation19_spill] sm:$0xff]  ;;  %v15424_v61 = vld [vmem:[#allocation28_spill] sm:$0xff] }
 0x2ff   :  { %10528 = vmatprep.subr.bf16.mxu1 %v10527_v37 }
 0x301   :  { %9495 = vmatmul.mubr.f32.gmra.mrb[2].mxu1 %v15385_v49  ;;  %v4114_v49 = vand.u32 4294901760, %v13040_v12 }
 0x302   :  { %9497 = vmatprep.mubr.f32.mxu1 %v15386_v6  ;;  %10530 = vmatpush3.bf16.msra.mxu1 %v10527_v37  ;;  %v15395_v37 = vand.u32 4294901760, %v15355_v52  ;;  %v15407_v52 = vand.u32 4294901760, %v15367_v15  ;;  %v15414_v15 = vand.u32 4294901760, %v12823_v9  ;;  %v13034_v9 = vld [vmem:[%s14753_s1 + $0x98] sm:$0xff]  ;;  %v4117_v6 = vand.u32 4294901760, %v13045_v8 }
 0x303   :  { %10532 = vmatprep.subr.bf16.mxu1 %v10531_v21  ;;  %v4111_v46 = vand.u32 4294901760, %v13034_v9 }
 0x304   :  { %v13074_v47 = vpack.c.bf16 %v4117_v6, %v4114_v49 }
 0x305   :  { %9498 = vmatmul.mubr.f32.gmra.mrb[4].mxu1 %v15391_v54  ;;  %v13059_v28 = vpack.c.bf16 %v4111_v46, %v4108_v41  ;;  %v15426_v54 = vld [vmem:[#allocation32_spill] sm:$0xff] }
 0x306   :  { %9500 = vmatprep.mubr.f32.mxu1 %v15392_v25  ;;  %10534 = vmatpush3.bf16.msra.mxu1 %v10531_v21  ;;  %v15400_v21 = vand.u32 4294901760, %v15360_v59  ;;  %v15412_v59 = vand.u32 4294901760, %v15372_v19  ;;  %v13021_v19 = vld [vmem:[%s14753_s1 + $0x88] sm:$0xff]  ;;  %v15427_v25 = vld [vmem:[#allocation33_spill] sm:$0xff] }
 0x307   :  { %10536 = vmatprep.subr.bf16.mxu1 %v10535_v20  ;;  %v4105_v5 = vand.u32 4294901760, %v13021_v19 }
 0x309   :  { %9501 = vmatmul.mubr.f32.gmra.mrb[6].mxu1 %v15393_v22  ;;  %v13052_v18 = vpack.c.bf16 %v4105_v5, %v4102_v53  ;;  %v15428_v22 = vld [vmem:[#allocation36_spill] sm:$0xff] }
 0x30a   :  { %9503 = vmatprep.mubr.f32.mxu1 %v15394_v16  ;;  %10538 = vmatpush3.bf16.msra.mxu1 %v10535_v20  ;;  %v15425_v20 = vld [vmem:[#allocation29_spill] sm:$0xff] }
 0x30b   :  { %10540 = vmatprep.subr.bf16.mxu1 %v12381_v30  ;;  %10556 = vmatprep.subr.bf16.mxu0 %v13052_v18  ;;  %v15429_v16 = vld [vmem:[#allocation37_spill] sm:$0xff] }
 0x30c   :  { %10558 = vmatpush3.bf16.msra.mxu0 %v13052_v18 }
 0x30d   :  { %9504 = vmatmul.mubr.f32.gmra.mrb[8].mxu1 %v15395_v37  ;;  %10560 = vmatprep.subr.bf16.mxu0 %v13059_v28  ;;  %v15430_v37 = vld [vmem:[#allocation41_spill] sm:$0xff] }
 0x30e   :  { %9506 = vmatprep.mubr.f32.mxu1 %v15396_v26  ;;  %v15431_v26 = vld [vmem:[#allocation40_spill] sm:$0xff] }
 0x310   :  { %10562 = vmatpush3.bf16.msra.mxu0 %v13059_v28 }
 0x311   :  { %9507 = vmatmul.mubr.f32.gmra.mrb[10].mxu1 %v15397_v60  ;;  %10564 = vmatprep.subr.bf16.mxu0 %v13074_v47  ;;  %v15432_v60 = vld [vmem:[#allocation45_spill] sm:$0xff] }
 0x312   :  { %9509 = vmatprep.mubr.f32.mxu1 %v15398_v35  ;;  %v15433_v35 = vld [vmem:[#allocation44_spill] sm:$0xff] }
 0x314   :  { %10566 = vmatpush3.bf16.msra.mxu0 %v13074_v47 }
 0x315   :  { %9510 = vmatmul.mubr.f32.gmra.mrb[12].mxu1 %v15399_v32  ;;  %v15434_v32 = vld [vmem:[#allocation47_spill] sm:$0xff] }
 0x316   :  { %9512 = vmatprep.mubr.f32.mxu1 %v15400_v21  ;;  %v15435_v21 = vld [vmem:[#allocation46_spill] sm:$0xff] }
 0x319   :  { %9513 = vmatmul.mubr.f32.gmra.mrb[14].mxu1 %v15401_v13 }
 0x31a   :  { %9515 = vmatprep.mubr.f32.mxu1 %v15402_v2 }
 0x31d   :  { %9516 = vmatmul.mubr.f32.gmra.mrb[16].mxu1 %v15403_v45 }
 0x31e   :  { %9518 = vmatprep.mubr.f32.mxu1 %v15404_v33 }
 0x321   :  { %9519 = vmatmul.mubr.f32.gmra.mrb[18].mxu1 %v15405_v17 }
 0x322   :  { %9521 = vmatprep.mubr.f32.mxu1 %v15406_v7 }
 0x325   :  { %9522 = vmatmul.mubr.f32.gmra.mrb[20].mxu1 %v15407_v52 }
 0x326   :  { %9524 = vmatprep.mubr.f32.mxu1 %v15408_v58 }
 0x329   :  { %9525 = vmatmul.mubr.f32.gmra.mrb[22].mxu1 %v15409_v48 }
 0x32a   :  { %9527 = vmatprep.mubr.f32.mxu1 %v15410_v34 }
 0x32d   :  { %9528 = vmatmul.mubr.f32.gmra.mrb[24].mxu1 %v15411_v29  ;;  %v13196_v29 = vsub.f32 %v13026_v62, %v4108_v41 }
 0x32e   :  { %9530 = vmatprep.mubr.f32.mxu1 %v15412_v59  ;;  %v13201_v59 = vsub.f32 %v13034_v9, %v4111_v46 }
 0x32f   :  { %15439 = vst [vmem:[#allocation11_spill] sm:$0xff] %v13196_v29  ;;  %v14975_v46 = vand.u32 4294901760, %v13196_v29 }
 0x330   :  { %15440 = vst [vmem:[#allocation12_spill] sm:$0xff] %v13201_v59 }
 0x331   :  { %9531 = vmatmul.mubr.f32.gmra.mrb[26].mxu1 %v15413_v44  ;;  %v13205_v44 = vpack.c.bf16 %v13201_v59, %v13196_v29 }
 0x332   :  { %9533 = vmatprep.mubr.f32.mxu1 %v15414_v15  ;;  %v13210_v15 = vsub.f32 %v13040_v12, %v4114_v49  ;;  %v14973_v49 = vand.u32 4294901760, %v13201_v59 }
 0x334   :  { %15441 = vst [vmem:[#allocation13_spill] sm:$0xff] %v13210_v15 }
 0x335   :  { %9534 = vmatmul.mubr.f32.gmra.mrb[28].mxu1 %v15415_v63  ;;  %v13215_v63 = vsub.f32 %v13045_v8, %v4117_v6 }
 0x336   :  { %9536 = vmatprep.mubr.f32.mxu1 %v15416_v50 }
 0x337   :  { %15442 = vst [vmem:[#allocation14_spill] sm:$0xff] %v13215_v63  ;;  %v13219_v50 = vpack.c.bf16 %v13215_v63, %v13210_v15 }
 0x339   :  { %9537 = vmatmul.mubr.f32.gmra.mrb[30].mxu1 %v15417_v23  ;;  %v13224_v23 = vld [vmem:[%s14755_s2 + $0x1] ss:$0 sm:$0xff] }
 0x33a   :  { %9555 = vmatprep.mubr.f32.mxu1 %v12505_v11 }
 0x33d   :  { %9556 = vmatmul.mubr.f32.vlgmr.msra.gmra.mrb[0].mxu1 %v12503_v31 }
 0x33e   :  { %9558 = vmatprep.mubr.f32.mxu1 %v12521_v24  ;;  %10542 = vmatpush3.bf16.msra.mxu1 %v12381_v30  ;;  %v15418_v30 = vld [vmem:[#allocation17_spill] sm:$0xff] }
 0x33f   :  { %10544 = vmatprep.subr.bf16.mxu1 %v12391_v4 }
 0x341   :  { %9559 = vmatmul.mubr.f32.gmra.mrb[2].mxu1 %v12518_v40 }
 0x342   :  { %9561 = vmatprep.mubr.f32.mxu1 %v12541_v57  ;;  %10546 = vmatpush3.bf16.msra.mxu1 %v12391_v4  ;;  %v15419_v4 = vld [vmem:[#allocation18_spill] sm:$0xff] }
 0x343   :  { %10548 = vmatprep.subr.bf16.mxu1 %v12401_v42 }
 0x345   :  { %9562 = vmatmul.mubr.f32.gmra.mrb[4].mxu1 %v12547_v38 }
 0x346   :  { %9564 = vmatprep.mubr.f32.mxu1 %v12563_v43  ;;  %10550 = vmatpush3.bf16.msra.mxu1 %v12401_v42  ;;  %v15420_v42 = vld [vmem:[#allocation16_spill] sm:$0xff] }
 0x347   :  { %10552 = vmatprep.subr.bf16.mxu1 %v12411_v51 }
 0x349   :  { %9565 = vmatmul.mubr.f32.gmra.mrb[6].mxu1 %v12567_v3 }
 0x34a   :  { %9567 = vmatprep.mubr.f32.mxu1 %v12586_v36  ;;  %10554 = vmatpush3.bf16.msra.mxu1 %v12411_v51  ;;  %v15423_v51 = vld [vmem:[#allocation25_spill] sm:$0xff] }
 0x34d   :  { %9568 = vmatmul.mubr.f32.gmra.mrb[8].mxu1 %v12591_v56 }
 0x34e   :  { %9570 = vmatprep.mubr.f32.mxu1 %v12610_v27 }
 0x351   :  { %9571 = vmatmul.mubr.f32.gmra.mrb[10].mxu1 %v12615_v55 }
 0x352   :  { %9573 = vmatprep.mubr.f32.mxu1 %v12634_v14 }
 0x355   :  { %9574 = vmatmul.mubr.f32.gmra.mrb[12].mxu1 %v12639_v10 }
 0x356   :  { %9576 = vmatprep.mubr.f32.mxu1 %v15418_v30 }
 0x359   :  { %9577 = vmatmul.mubr.f32.gmra.mrb[14].mxu1 %v15419_v4 }
 0x35a   :  { %9579 = vmatprep.mubr.f32.mxu1 %v15420_v42 }
 0x35d   :  { %9580 = vmatmul.mubr.f32.gmra.mrb[16].mxu1 %v15421_v1 }
 0x35e   :  { %9582 = vmatprep.mubr.f32.mxu1 %v15422_v39 }
 0x361   :  { %9583 = vmatmul.mubr.f32.gmra.mrb[18].mxu1 %v15423_v51 }
 0x362   :  { %9585 = vmatprep.mubr.f32.mxu1 %v15424_v61 }
 0x365   :  { %9586 = vmatmul.mubr.f32.gmra.mrb[20].mxu1 %v15425_v20 }
 0x366   :  { %9588 = vmatprep.mubr.f32.mxu1 %v15426_v54 }
 0x369   :  { %9589 = vmatmul.mubr.f32.gmra.mrb[22].mxu1 %v15427_v25 }
 0x36a   :  { %9591 = vmatprep.mubr.f32.mxu1 %v15428_v22 }
 0x36d   :  { %9592 = vmatmul.mubr.f32.gmra.mrb[24].mxu1 %v15429_v16 }
 0x36e   :  { %9594 = vmatprep.mubr.f32.mxu1 %v15430_v37 }
 0x371   :  { %9595 = vmatmul.mubr.f32.gmra.mrb[26].mxu1 %v15431_v26 }
 0x372   :  { %9597 = vmatprep.mubr.f32.mxu1 %v15432_v60 }
 0x375   :  { %9598 = vmatmul.mubr.f32.gmra.mrb[28].mxu1 %v15433_v35 }
 0x376   :  { %9600 = vmatprep.mubr.f32.mxu1 %v15434_v32 }
 0x379   :  { %9601 = vmatmul.mubr.f32.gmra.mrb[30].mxu1 %v15435_v21 }
 0x37a   :  { %9619 = vmatprep.mubr.f32.mxu1 %v12505_v11  ;;  %v8036_v11 = vld [vmem:[%s14753_s1 + $0xb8] sm:$0xff] }
 0x37d   :  { %9620 = vmatmul.mubr.f32.vlgmr.msra.gmra.mrb[0].mxu1 %v12503_v31  ;;  %v8035_v31 = vld [vmem:[%s14753_s1 + $0xb0] sm:$0xff] }
 0x37e   :  { %9622 = vmatprep.mubr.f32.mxu1 %v12521_v24  ;;  %v4123_v24 = vand.u32 4294901760, %v8036_v11 }
 0x380   :  { %v13177_v2 = vsub.f32 %v8036_v11, %v4123_v24 }
 0x381   :  { %9623 = vmatmul.mubr.f32.gmra.mrb[2].mxu1 %v12518_v40  ;;  %v4120_v40 = vand.u32 4294901760, %v8035_v31 }
 0x382   :  { %9625 = vmatprep.mubr.f32.mxu1 %v12541_v57  ;;  %15438 = vst [vmem:[#allocation10_spill] sm:$0xff] %v13177_v2  ;;  %v14960_v33 = vand.u32 4294901760, %v13177_v2 }
 0x383   :  { %v13150_v57 = vpack.c.bf16 %v4123_v24, %v4120_v40  ;;  %v13175_v13 = vsub.f32 %v8035_v31, %v4120_v40 }
 0x384   :  { %v4547_v7 = vsub.f32 %v13177_v2, %v14960_v33 }
 0x385   :  { %9626 = vmatmul.mubr.f32.gmra.mrb[4].mxu1 %v12547_v38  ;;  %10568 = vmatprep.subr.bf16.mxu0 %v13150_v57  ;;  %v13157_v38 = vsub.f32 %v13016_v0, %v4102_v53  ;;  %15437 = vst [vmem:[#allocation9_spill] sm:$0xff] %v13175_v13  ;;  %v14962_v45 = vand.u32 4294901760, %v13175_v13 }
 0x386   :  { %9628 = vmatprep.mubr.f32.mxu1 %v12563_v43  ;;  %10570 = vmatpush3.bf16.msra.mxu0 %v13150_v57  ;;  %v13162_v43 = vsub.f32 %v13021_v19, %v4105_v5  ;;  %v4548_v58 = vand.u32 4294901760, %v4547_v7 }
 0x387   :  { %v4540_v17 = vsub.f32 %v13175_v13, %v14962_v45 }
 0x388   :  { %15436 = vst [vmem:[#allocation2_spill] sm:$0xff] %v13162_v43  ;;  %v13191_v34 = vpack.c.bf16 %v13162_v43, %v13157_v38 }
 0x389   :  { %9629 = vmatmul.mubr.f32.gmra.mrb[6].mxu1 %v12567_v3  ;;  %v14979_v3 = vand.u32 4294901760, %v13157_v38  ;;  %v4541_v52 = vand.u32 4294901760, %v4540_v17 }
 0x38a   :  { %9631 = vmatprep.mubr.f32.mxu1 %v12586_v36  ;;  %v14978_v36 = vand.u32 4294901760, %v13162_v43 }
 0x38b   :  { %v13187_v48 = vpack.c.bf16 %v4548_v58, %v4541_v52 }
 0x38d   :  { %9632 = vmatmul.mubr.f32.gmra.mrb[8].mxu1 %v12591_v56  ;;  %v4498_v56 = vsub.f32 %v13157_v38, %v14979_v3 }
 0x38e   :  { %9634 = vmatprep.mubr.f32.mxu1 %v12610_v27  ;;  %v4505_v27 = vsub.f32 %v13162_v43, %v14978_v36 }
 0x391   :  { %9635 = vmatmul.mubr.f32.gmra.mrb[10].mxu1 %v12615_v55  ;;  %v4499_v55 = vand.u32 4294901760, %v4498_v56 }
 0x392   :  { %9637 = vmatprep.mubr.f32.mxu1 %v12634_v14  ;;  %v4506_v14 = vand.u32 4294901760, %v4505_v27 }
 0x395   :  { %9638 = vmatmul.mubr.f32.gmra.mrb[12].mxu1 %v12639_v10  ;;  %v13172_v10 = vpack.c.bf16 %v4506_v14, %v4499_v55 }
 0x396   :  { %9640 = vmatprep.mubr.f32.mxu1 %v15418_v30 }
 0x397   :  { %10572 = vmatprep.subr.bf16.mxu0 %v13172_v10 }
 0x399   :  { %9641 = vmatmul.mubr.f32.gmra.mrb[14].mxu1 %v15419_v4 }
 0x39a   :  { %9643 = vmatprep.mubr.f32.mxu1 %v15420_v42 }
 0x39d   :  { %9644 = vmatmul.mubr.f32.gmra.mrb[16].mxu1 %v15421_v1  ;;  %v4512_v1 = vsub.f32 %v13196_v29, %v14975_v46 }
 0x39e   :  { %9646 = vmatprep.mubr.f32.mxu1 %v15422_v39  ;;  %v4519_v39 = vsub.f32 %v13201_v59, %v14973_v49 }
 0x39f   :  { %v4513_v31 = vand.u32 4294901760, %v4512_v1 }
 0x3a0   :  { %v4520_v11 = vand.u32 4294901760, %v4519_v39 }
 0x3a1   :  { %9647 = vmatmul.mubr.f32.gmra.mrb[18].mxu1 %v15423_v51  ;;  %v13242_v51 = vpack.c.bf16 %v13177_v2, %v13175_v13 }
 0x3a2   :  { %9649 = vmatprep.mubr.f32.mxu1 %v15424_v61 }
 0x3a5   :  { %9650 = vmatmul.mubr.f32.gmra.mrb[20].mxu1 %v15425_v20 }
 0x3a6   :  { %9652 = vmatprep.mubr.f32.mxu1 %v15426_v54 }
 0x3a9   :  { %9653 = vmatmul.mubr.f32.gmra.mrb[22].mxu1 %v15427_v25  ;;  %v14968_v25 = vand.u32 4294901760, %v13210_v15 }
 0x3aa   :  { %9655 = vmatprep.mubr.f32.mxu1 %v15428_v22 }
 0x3ab   :  { %v4526_v55 = vsub.f32 %v13210_v15, %v14968_v25 }
 0x3ad   :  { %9656 = vmatmul.mubr.f32.gmra.mrb[24].mxu1 %v15429_v16 }
 0x3ae   :  { %9658 = vmatprep.mubr.f32.mxu1 %v15430_v37 }
 0x3b1   :  { %9659 = vmatmul.mubr.f32.gmra.mrb[26].mxu1 %v15431_v26  ;;  %v14967_v26 = vand.u32 4294901760, %v13215_v63 }
 0x3b2   :  { %9661 = vmatprep.mubr.f32.mxu1 %v15432_v60 }
 0x3b3   :  { %v4533_v58 = vsub.f32 %v13215_v63, %v14967_v26 }
 0x3b5   :  { %9662 = vmatmul.mubr.f32.gmra.mrb[28].mxu1 %v15433_v35 }
 0x3b6   :  { %9664 = vmatprep.mubr.f32.mxu1 %v15434_v32 }
 0x3b9   :  { %9665 = vmatmul.mubr.f32.gmra.mrb[30].mxu1 %v15435_v21 }
 0x450   :  { %v9621_v0 = vpop.f32.mrb[0].mxu1 }
 0x451   :  { %v10787_v19 = vadd.f32 %v9621_v0, %v13224_v23  ;;  %v3769_v62 = vpop.f32.mrb[1].mxu1 }
 0x452   :  { %v10788_v53 = vadd.f32 %v13224_v23, %v3769_v62 }
 0x453   :  { %11587 = vtanh.f32 %v10787_v19 }
 0x454   :  { %11589 = vtanh.f32 %v10788_v53  ;;  %v9624_v5 = vpop.f32.mrb[2].mxu1 }
 0x455   :  { %v10789_v9 = vadd.f32 %v9624_v5, %v13224_v23  ;;  %v3781_v41 = vpop.f32.mrb[3].mxu1 }
 0x456   :  { %v10790_v12 = vadd.f32 %v13224_v23, %v3781_v41  ;;  %v13276_v41 = vpack.c.bf16 %v4520_v11, %v4513_v31 }
 0x457   :  { %11591 = vtanh.f32 %v10789_v9 }
 0x458   :  { %11593 = vtanh.f32 %v10790_v12  ;;  %v9627_v8 = vpop.f32.mrb[4].mxu1 }
 0x459   :  { %v10791_v6 = vadd.f32 %v9627_v8, %v13224_v23  ;;  %v3793_v30 = vpop.f32.mrb[5].mxu1 }
 0x45a   :  { %v10792_v4 = vadd.f32 %v13224_v23, %v3793_v30 }
 0x45b   :  { %11595 = vtanh.f32 %v10791_v6 }
 0x45c   :  { %11597 = vtanh.f32 %v10792_v4  ;;  %v9630_v42 = vpop.f32.mrb[6].mxu1 }
 0x45d   :  { %v11588_v61 = vpop.eup %11587  ;;  %v10793_v20 = vadd.f32 %v9630_v42, %v13224_v23  ;;  %v3805_v54 = vpop.f32.mrb[7].mxu1  ;;  %v4527_v42 = vand.u32 4294901760, %v4526_v55 }
 0x45e   :  { %v11590_v22 = vpop.eup %11589  ;;  %v4009_v16 = vsel %vm1992_vm2, %v11588_v61, 0  ;;  %v10794_v37 = vadd.f32 %v13224_v23, %v3805_v54 }
 0x45f   :  { %v13249_v60 = vand.u32 4294901760, %v4009_v16  ;;  %11599 = vtanh.f32 %v10793_v20  ;;  %v4006_v35 = vsel %vm1992_vm2, %v11590_v22, 0 }
 0x460   :  { %11601 = vtanh.f32 %v10794_v37  ;;  %v9633_v32 = vpop.f32.mrb[8].mxu1  ;;  %v13252_v21 = vand.u32 4294901760, %v4006_v35  ;;  %v4534_v37 = vand.u32 4294901760, %v4533_v58 }
 0x461   :  { %v11592_v40 = vpop.eup %11591  ;;  %v13255_v24 = vsub.f32 %v4009_v16, %v13249_v60  ;;  %v10795_v56 = vadd.f32 %v9633_v32, %v13224_v23  ;;  %v3817_v27 = vpop.f32.mrb[9].mxu1 }
 0x462   :  { %v11594_v14 = vpop.eup %11593  ;;  %v10796_v17 = vadd.f32 %v13224_v23, %v3817_v27  ;;  %v13263_v7 = vsub.f32 %v4006_v35, %v13252_v21  ;;  %v4015_v52 = vsel %vm1992_vm2, %v11592_v40, 0 }
 0x463   :  { %11603 = vtanh.f32 %v10795_v56  ;;  %v14972_v0 = vand.u32 4294901760, %v13255_v24  ;;  %v4012_v19 = vsel %vm1992_vm2, %v11594_v14, 0  ;;  %v13271_v62 = vand.u32 4294901760, %v4015_v52 }
 0x464   :  { %11605 = vtanh.f32 %v10796_v17  ;;  %v9636_v53 = vpop.f32.mrb[10].mxu1  ;;  %v14976_v5 = vand.u32 4294901760, %v13263_v7  ;;  %v13274_v9 = vand.u32 4294901760, %v4012_v19 }
 0x465   :  { %v11596_v12 = vpop.eup %11595  ;;  %v10797_v8 = vadd.f32 %v9636_v53, %v13224_v23  ;;  %v3829_v6 = vpop.f32.mrb[11].mxu1  ;;  %v4187_v30 = vsub.f32 %v13255_v24, %v14972_v0  ;;  %v13283_v4 = vsub.f32 %v4015_v52, %v13271_v62 }
 0x466   :  { %v11598_v1 = vpop.eup %11597  ;;  %v10798_v39 = vadd.f32 %v13224_v23, %v3829_v6  ;;  %v4177_v61 = vsub.f32 %v13263_v7, %v14976_v5  ;;  %v13290_v20 = vsub.f32 %v4012_v19, %v13274_v9  ;;  %v4021_v54 = vsel %vm1992_vm2, %v11596_v12, 0 }
 0x467   :  { %11607 = vtanh.f32 %v10797_v8  ;;  %v14965_v22 = vand.u32 4294901760, %v13283_v4  ;;  %v4018_v16 = vsel %vm1992_vm2, %v11598_v1, 0  ;;  %v4188_v55 = vand.u32 4294901760, %v4187_v30 }
 0x468   :  { %11609 = vtanh.f32 %v10798_v39  ;;  %v9639_v35 = vpop.f32.mrb[12].mxu1  ;;  %v4178_v32 = vand.u32 4294901760, %v4177_v61  ;;  %v14970_v31 = vand.u32 4294901760, %v13290_v20  ;;  %v13296_v11 = vand.u32 4294901760, %v4018_v16 }
 0x469   :  { %v11600_v40 = vpop.eup %11599  ;;  %v10799_v56 = vadd.f32 %v9639_v35, %v13224_v23  ;;  %v3841_v27 = vpop.f32.mrb[13].mxu1  ;;  %v4207_v14 = vsub.f32 %v13283_v4, %v14965_v22  ;;  %v13302_v17 = vand.u32 4294901760, %v4021_v54  ;;  %v10579_v30 = vpack.c.bf16 %v4534_v37, %v4527_v42 }
 0x46a   :  { %v11602_v52 = vpop.eup %11601  ;;  %v10800_v58 = vadd.f32 %v13224_v23, %v3841_v27  ;;  %9683 = vmatprep.mubr.f32.mxu0 %v4178_v32  ;;  %v4197_v19 = vsub.f32 %v13290_v20, %v14970_v31  ;;  %v13309_v53 = vsub.f32 %v4018_v16, %v13296_v11  ;;  %v4027_v12 = vsel %vm1992_vm2, %v11600_v40, 0 }
 0x46b   :  { %11611 = vtanh.f32 %v10799_v56  ;;  %9684 = vmatmul.mubr.f32.vlgmr.msra.gmra.mrb[32].mxu0 %v4188_v55  ;;  %v13313_v8 = vsub.f32 %v4021_v54, %v13302_v17  ;;  %v4024_v6 = vsel %vm1992_vm2, %v11602_v52, 0  ;;  %v4208_v56 = vand.u32 4294901760, %v4207_v14 }
 0x46c   :  { %11613 = vtanh.f32 %v10800_v58  ;;  %v9642_v1 = vpop.f32.mrb[14].mxu1  ;;  %10574 = vmatpush3.bf16.msra.mxu0 %v13172_v10  ;;  %v4198_v39 = vand.u32 4294901760, %v4197_v19  ;;  %v14963_v61 = vand.u32 4294901760, %v13309_v53  ;;  %v13318_v35 = vand.u32 4294901760, %v4024_v6 }
 0x46d   :  { %v11604_v16 = vpop.eup %11603  ;;  %v10801_v32 = vadd.f32 %v9642_v1, %v13224_v23  ;;  %v3853_v40 = vpop.f32.mrb[15].mxu1  ;;  %v14961_v54 = vand.u32 4294901760, %v13313_v8  ;;  %v13322_v27 = vand.u32 4294901760, %v4027_v12  ;;  %10576 = vmatprep.subr.bf16.mxu0 %v13276_v41 }
 0x46e   :  { %v11606_v42 = vpop.eup %11605  ;;  %v10802_v37 = vadd.f32 %v13224_v23, %v3853_v40  ;;  %9686 = vmatprep.mubr.f32.mxu0 %v4198_v39  ;;  %v4217_v10 = vsub.f32 %v13309_v53, %v14963_v61  ;;  %v13330_v55 = vsub.f32 %v4024_v6, %v13318_v35  ;;  %v4033_v52 = vsel %vm1992_vm2, %v11604_v16, 0 }
 0x46f   :  { %11615 = vtanh.f32 %v10801_v32  ;;  %9687 = vmatmul.mubr.f32.gmra.mrb[34].mxu0 %v4208_v56  ;;  %v4227_v14 = vsub.f32 %v13313_v8, %v14961_v54  ;;  %v13337_v58 = vsub.f32 %v4027_v12, %v13322_v27  ;;  %v4030_v19 = vsel %vm1992_vm2, %v11606_v42, 0 }
 0x470   :  { %11617 = vtanh.f32 %v10802_v37  ;;  %v9645_v1 = vpop.f32.mrb[16].mxu1  ;;  %v4218_v39 = vand.u32 4294901760, %v4217_v10  ;;  %v14964_v40 = vand.u32 4294901760, %v13330_v55  ;;  %v13341_v6 = vand.u32 4294901760, %v4030_v19  ;;  %10578 = vmatpush3.bf16.msra.mxu0 %v13276_v41 }
 0x471   :  { %15443 = vst [vmem:[#allocation15_spill] sm:$0xff] %v13337_v58  ;;  %v11608_v16 = vpop.eup %11607  ;;  %v10803_v32 = vadd.f32 %v9645_v1, %v13224_v23  ;;  %v3865_v56 = vpop.f32.mrb[17].mxu1  ;;  %v4228_v33 = vand.u32 4294901760, %v4227_v14  ;;  %v14966_v54 = vand.u32 4294901760, %v13337_v58  ;;  %v13346_v12 = vand.u32 4294901760, %v4033_v52  ;;  %10580 = vmatprep.subr.bf16.mxu0 %v10579_v30 }
 0x472   :  { %v11610_v42 = vpop.eup %11609  ;;  %v10804_v37 = vadd.f32 %v13224_v23, %v3865_v56  ;;  %9689 = vmatprep.mubr.f32.mxu0 %v4218_v39  ;;  %v4237_v10 = vsub.f32 %v13330_v55, %v14964_v40  ;;  %v13353_v41 = vsub.f32 %v4030_v19, %v13341_v6  ;;  %v4039_v1 = vsel %vm1992_vm2, %v11608_v16, 0 }
 0x473   :  { %11619 = vtanh.f32 %v10803_v32  ;;  %9690 = vmatmul.mubr.f32.gmra.mrb[36].mxu0 %v4228_v33  ;;  %v4247_v14 = vsub.f32 %v13337_v58, %v14966_v54  ;;  %v13360_v45 = vsub.f32 %v4033_v52, %v13346_v12  ;;  %v4036_v39 = vsel %vm1992_vm2, %v11610_v42, 0 }
 0x474   :  { %15444 = vst [vmem:[#allocation21_spill] sm:$0xff] %v13353_v41  ;;  %11621 = vtanh.f32 %v10804_v37  ;;  %v9648_v56 = vpop.f32.mrb[18].mxu1  ;;  %v4238_v61 = vand.u32 4294901760, %v4237_v10  ;;  %v14969_v40 = vand.u32 4294901760, %v13353_v41  ;;  %v13364_v19 = vand.u32 4294901760, %v4036_v39  ;;  %10582 = vmatpush3.bf16.msra.mxu0 %v10579_v30 }
 0x475   :  { %15445 = vst [vmem:[#allocation24_spill] sm:$0xff] %v13360_v45  ;;  %v11612_v16 = vpop.eup %11611  ;;  %v10805_v33 = vadd.f32 %v9648_v56, %v13224_v23  ;;  %v3877_v32 = vpop.f32.mrb[19].mxu1  ;;  %v4248_v22 = vand.u32 4294901760, %v4247_v14  ;;  %v14971_v54 = vand.u32 4294901760, %v13360_v45  ;;  %v13368_v26 = vand.u32 4294901760, %v4039_v1  ;;  %10584 = vmatprep.subr.bf16.mxu0 %v13187_v48 }
 0x476   :  { %v11614_v52 = vpop.eup %11613  ;;  %v10806_v42 = vadd.f32 %v13224_v23, %v3877_v32  ;;  %9692 = vmatprep.mubr.f32.mxu0 %v4238_v61  ;;  %v4257_v37 = vsub.f32 %v13353_v41, %v14969_v40  ;;  %v13376_v30 = vsub.f32 %v4036_v39, %v13364_v19  ;;  %v4045_v10 = vsel %vm1992_vm2, %v11612_v16, 0 }
 0x477   :  { %11623 = vtanh.f32 %v10805_v33  ;;  %9693 = vmatmul.mubr.f32.gmra.mrb[38].mxu0 %v4248_v22  ;;  %v4267_v14 = vsub.f32 %v13360_v45, %v14971_v54  ;;  %v13383_v56 = vsub.f32 %v4039_v1, %v13368_v26  ;;  %v4042_v61 = vsel %vm1992_vm2, %v11614_v52, 0 }
 0x478   :  { %15446 = vst [vmem:[#allocation20_spill] sm:$0xff] %v13376_v30  ;;  %11625 = vtanh.f32 %v10806_v42  ;;  %v9651_v32 = vpop.f32.mrb[20].mxu1  ;;  %v4258_v25 = vand.u32 4294901760, %v4257_v37  ;;  %v14974_v40 = vand.u32 4294901760, %v13376_v30  ;;  %v13387_v39 = vand.u32 4294901760, %v4042_v61  ;;  %10586 = vmatpush3.bf16.msra.mxu0 %v13187_v48 }
 0x479   :  { %15447 = vst [vmem:[#allocation22_spill] sm:$0xff] %v13383_v56  ;;  %v11616_v16 = vpop.eup %11615  ;;  %v10807_v22 = vadd.f32 %v9651_v32, %v13224_v23  ;;  %v3889_v33 = vpop.f32.mrb[21].mxu1  ;;  %v4268_v31 = vand.u32 4294901760, %v4267_v14  ;;  %v14977_v54 = vand.u32 4294901760, %v13383_v56  ;;  %v13392_v1 = vand.u32 4294901760, %v4045_v10  ;;  %10588 = vmatprep.subr.bf16.mxu0 %v13191_v34 }
 0x47a   :  { %v11618_v52 = vpop.eup %11617  ;;  %v10808_v42 = vadd.f32 %v13224_v23, %v3889_v33  ;;  %9695 = vmatprep.mubr.f32.mxu0 %v4258_v25  ;;  %v4277_v37 = vsub.f32 %v13376_v30, %v14974_v40  ;;  %v13400_v48 = vsub.f32 %v4042_v61, %v13387_v39  ;;  %v4051_v32 = vsel %vm1992_vm2, %v11616_v16, 0 }
 0x47b   :  { %11627 = vtanh.f32 %v10807_v22  ;;  %9696 = vmatmul.mubr.f32.gmra.mrb[40].mxu0 %v4268_v31  ;;  %v4287_v14 = vsub.f32 %v13383_v56, %v14977_v54  ;;  %v13407_v0 = vsub.f32 %v4045_v10, %v13392_v1  ;;  %v4048_v25 = vsel %vm1992_vm2, %v11618_v52, 0 }
 0x47c   :  { %15448 = vst [vmem:[#allocation26_spill] sm:$0xff] %v13400_v48  ;;  %11629 = vtanh.f32 %v10808_v42  ;;  %v9654_v33 = vpop.f32.mrb[22].mxu1  ;;  %v4278_v49 = vand.u32 4294901760, %v4277_v37  ;;  %v14980_v40 = vand.u32 4294901760, %v13400_v48  ;;  %v13411_v61 = vand.u32 4294901760, %v4048_v25 }
 0x47d   :  { %15449 = vst [vmem:[#allocation27_spill] sm:$0xff] %v13407_v0  ;;  %v11620_v46 = vpop.eup %11619  ;;  %v10809_v16 = vadd.f32 %v9654_v33, %v13224_v23  ;;  %v3901_v31 = vpop.f32.mrb[23].mxu1  ;;  %v4288_v22 = vand.u32 4294901760, %v4287_v14  ;;  %v14983_v5 = vand.u32 4294901760, %v13407_v0  ;;  %v13415_v54 = vand.u32 4294901760, %v4051_v32 }
 0x47e   :  { %15450 = vst [vmem:[#allocation30_spill] sm:$0xff] %v13411_v61  ;;  %v11622_v10 = vpop.eup %11621  ;;  %v10810_v36 = vadd.f32 %v13224_v23, %v3901_v31  ;;  %9698 = vmatprep.mubr.f32.mxu0 %v4278_v49  ;;  %v4297_v52 = vsub.f32 %v13400_v48, %v14980_v40  ;;  %v13422_v42 = vsub.f32 %v4048_v25, %v13411_v61  ;;  %v4057_v37 = vsel %vm1992_vm2, %v11620_v46, 0 }
 0x47f   :  { %15451 = vst [vmem:[#allocation31_spill] sm:$0xff] %v13415_v54  ;;  %11631 = vtanh.f32 %v10809_v16  ;;  %9699 = vmatmul.mubr.f32.gmra.mrb[42].mxu0 %v4288_v22  ;;  %v4307_v14 = vsub.f32 %v13407_v0, %v14983_v5  ;;  %v13429_v33 = vsub.f32 %v4051_v32, %v13415_v54  ;;  %v4054_v49 = vsel %vm1992_vm2, %v11622_v10, 0 }
 0x480   :  { %15452 = vst [vmem:[#allocation34_spill] sm:$0xff] %v13422_v42  ;;  %11633 = vtanh.f32 %v10810_v36  ;;  %v9657_v31 = vpop.f32.mrb[24].mxu1  ;;  %v4298_v3 = vand.u32 4294901760, %v4297_v52  ;;  %v14986_v40 = vand.u32 4294901760, %v13422_v42  ;;  %v13433_v25 = vand.u32 4294901760, %v4054_v49 }
 0x481   :  { %15453 = vst [vmem:[#allocation35_spill] sm:$0xff] %v13429_v33  ;;  %v11624_v2 = vpop.eup %11623  ;;  %v10811_v46 = vadd.f32 %v9657_v31, %v13224_v23  ;;  %v3913_v16 = vpop.f32.mrb[25].mxu1  ;;  %v4308_v22 = vand.u32 4294901760, %v4307_v14  ;;  %v14989_v13 = vand.u32 4294901760, %v13429_v33  ;;  %v13437_v5 = vand.u32 4294901760, %v4057_v37 }
 0x482   :  { %15454 = vst [vmem:[#allocation38_spill] sm:$0xff] %v13433_v25  ;;  %v11626_v32 = vpop.eup %11625  ;;  %v10812_v63 = vadd.f32 %v13224_v23, %v3913_v16  ;;  %9701 = vmatprep.mubr.f32.mxu0 %v4298_v3  ;;  %v4317_v36 = vsub.f32 %v13422_v42, %v14986_v40  ;;  %v13444_v10 = vsub.f32 %v4054_v49, %v13433_v25  ;;  %v4063_v52 = vsel %vm1992_vm2, %v11624_v2, 0 }
 0x483   :  { %15455 = vst [vmem:[#allocation39_spill] sm:$0xff] %v13437_v5  ;;  %11635 = vtanh.f32 %v10811_v46  ;;  %9702 = vmatmul.mubr.f32.gmra.mrb[44].mxu0 %v4308_v22  ;;  %v4327_v14 = vsub.f32 %v13429_v33, %v14989_v13  ;;  %v13451_v31 = vsub.f32 %v4057_v37, %v13437_v5  ;;  %v4060_v3 = vsel %vm1992_vm2, %v11626_v32, 0 }
 0x484   :  { %15456 = vst [vmem:[#allocation43_spill] sm:$0xff] %v13444_v10  ;;  %11637 = vtanh.f32 %v10812_v63  ;;  %v9660_v16 = vpop.f32.mrb[26].mxu1  ;;  %v4318_v15 = vand.u32 4294901760, %v4317_v36  ;;  %v14994_v40 = vand.u32 4294901760, %v13444_v10  ;;  %v13455_v49 = vand.u32 4294901760, %v4060_v3 }
 0x485   :  { %15457 = vst [vmem:[#allocation42_spill] sm:$0xff] %v13451_v31  ;;  %v11628_v59 = vpop.eup %11627  ;;  %v10813_v2 = vadd.f32 %v9660_v16, %v13224_v23  ;;  %v3925_v46 = vpop.f32.mrb[27].mxu1  ;;  %v4328_v22 = vand.u32 4294901760, %v4327_v14  ;;  %v14999_v29 = vand.u32 4294901760, %v13451_v31  ;;  %v13459_v13 = vand.u32 4294901760, %v4063_v52 }
 0x486   :  { %15458 = vst [vmem:[#allocation3_spill] sm:$0xff] %v13455_v49  ;;  %v11630_v37 = vpop.eup %11629  ;;  %v10814_v33 = vadd.f32 %v13224_v23, %v3925_v46  ;;  %9704 = vmatprep.mubr.f32.mxu0 %v4318_v15  ;;  %v4337_v63 = vsub.f32 %v13444_v10, %v14994_v40  ;;  %v13466_v32 = vsub.f32 %v4060_v3, %v13455_v49  ;;  %v4069_v36 = vsel %vm1992_vm2, %v11628_v59, 0 }
 0x487   :  { %15459 = vst [vmem:[#allocation4_spill] sm:$0xff] %v13459_v13  ;;  %11639 = vtanh.f32 %v10813_v2  ;;  %9705 = vmatmul.mubr.f32.gmra.mrb[46].mxu0 %v4328_v22  ;;  %v4347_v14 = vsub.f32 %v13451_v31, %v14999_v29  ;;  %v13473_v16 = vsub.f32 %v4063_v52, %v13459_v13  ;;  %v4066_v15 = vsel %vm1992_vm2, %v11630_v37, 0 }
 0x488   :  { %15460 = vst [vmem:[#allocation5_spill] sm:$0xff] %v13466_v32  ;;  %11641 = vtanh.f32 %v10814_v33  ;;  %v9663_v46 = vpop.f32.mrb[28].mxu1  ;;  %v4338_v42 = vand.u32 4294901760, %v4337_v63  ;;  %v15004_v40 = vand.u32 4294901760, %v13466_v32  ;;  %v13477_v3 = vand.u32 4294901760, %v4066_v15 }
 0x489   :  { %15461 = vst [vmem:[#allocation6_spill] sm:$0xff] %v13473_v16  ;;  %v11632_v10 = vpop.eup %11631  ;;  %v10815_v59 = vadd.f32 %v9663_v46, %v13224_v23  ;;  %v3937_v2 = vpop.f32.mrb[29].mxu1  ;;  %v4348_v22 = vand.u32 4294901760, %v4347_v14  ;;  %v15009_v0 = vand.u32 4294901760, %v13473_v16  ;;  %v13481_v29 = vand.u32 4294901760, %v4069_v36 }
 0x48a   :  { %15462 = vst [vmem:[#allocation7_spill] sm:$0xff] %v13477_v3  ;;  %v11634_v52 = vpop.eup %11633  ;;  %v10816_v31 = vadd.f32 %v13224_v23, %v3937_v2  ;;  %9707 = vmatprep.mubr.f32.mxu0 %v4338_v42  ;;  %v4357_v33 = vsub.f32 %v13466_v32, %v15004_v40  ;;  %v13488_v37 = vsub.f32 %v4066_v15, %v13477_v3  ;;  %v4075_v63 = vsel %vm1992_vm2, %v11632_v10, 0 }
 0x48b   :  { %15463 = vst [vmem:[#allocation8_spill] sm:$0xff] %v13481_v29  ;;  %11643 = vtanh.f32 %v10815_v59  ;;  %9708 = vmatmul.mubr.f32.gmra.mrb[48].mxu0 %v4348_v22  ;;  %v4367_v14 = vsub.f32 %v13473_v16, %v15009_v0  ;;  %v13495_v46 = vsub.f32 %v4069_v36, %v13481_v29  ;;  %v4072_v42 = vsel %vm1992_vm2, %v11634_v52, 0 }
 0x48c   :  { %15464 = vst [vmem:[#allocation17_spill] sm:$0xff] %v13488_v37  ;;  %11645 = vtanh.f32 %v10816_v31  ;;  %v9666_v2 = vpop.f32.mrb[30].mxu1  ;;  %v4358_v48 = vand.u32 4294901760, %v4357_v33  ;;  %v15012_v40 = vand.u32 4294901760, %v13488_v37  ;;  %v13499_v15 = vand.u32 4294901760, %v4072_v42 }
 0x48d   :  { %15465 = vst [vmem:[#allocation18_spill] sm:$0xff] %v13495_v46  ;;  %v11636_v32 = vpop.eup %11635  ;;  %v10817_v10 = vadd.f32 %v9666_v2, %v13224_v23  ;;  %v3949_v59 = vpop.f32.mrb[31].mxu1  ;;  %v4368_v22 = vand.u32 4294901760, %v4367_v14  ;;  %v15015_v56 = vand.u32 4294901760, %v13495_v46  ;;  %v13503_v0 = vand.u32 4294901760, %v4075_v63 }
 0x48e   :  { %15466 = vst [vmem:[#allocation16_spill] sm:$0xff] %v13499_v15  ;;  %v11638_v36 = vpop.eup %11637  ;;  %v10818_v16 = vadd.f32 %v13224_v23, %v3949_v59  ;;  %9710 = vmatprep.mubr.f32.mxu0 %v4358_v48  ;;  %v4377_v31 = vsub.f32 %v13488_v37, %v15012_v40  ;;  %v13510_v52 = vsub.f32 %v4072_v42, %v13499_v15  ;;  %v4081_v33 = vsel %vm1992_vm2, %v11636_v32, 0 }
 0x48f   :  { %15467 = vst [vmem:[#allocation19_spill] sm:$0xff] %v13503_v0  ;;  %11647 = vtanh.f32 %v10817_v10  ;;  %9711 = vmatmul.mubr.f32.gmra.mrb[50].mxu0 %v4368_v22  ;;  %v4387_v14 = vsub.f32 %v13495_v46, %v15015_v56  ;;  %v13517_v2 = vsub.f32 %v4075_v63, %v13503_v0  ;;  %v4078_v23 = vsel %vm1992_vm2, %v11638_v36, 0 }
 0x490   :  { %15468 = vst [vmem:[#allocation23_spill] sm:$0xff] %v13510_v52  ;;  %11649 = vtanh.f32 %v10818_v16  ;;  %v4378_v48 = vand.u32 4294901760, %v4377_v31  ;;  %v15018_v59 = vand.u32 4294901760, %v13510_v52  ;;  %v13521_v40 = vand.u32 4294901760, %v4078_v23 }
 0x491   :  { %15469 = vst [vmem:[#allocation25_spill] sm:$0xff] %v13517_v2  ;;  %v11640_v42 = vpop.eup %11639  ;;  %v4388_v37 = vand.u32 4294901760, %v4387_v14  ;;  %v15023_v32 = vand.u32 4294901760, %v13517_v2  ;;  %v13524_v10 = vand.u32 4294901760, %v4081_v33 }
 0x492   :  { %15470 = vst [vmem:[#allocation28_spill] sm:$0xff] %v13521_v40  ;;  %v11642_v22 = vpop.eup %11641  ;;  %9713 = vmatprep.mubr.f32.mxu0 %v4378_v48  ;;  %v4397_v63 = vsub.f32 %v13510_v52, %v15018_v59  ;;  %v13530_v36 = vsub.f32 %v4078_v23, %v13521_v40  ;;  %v4087_v16 = vsel %vm1992_vm2, %v11640_v42, 0 }
 0x493   :  { %15471 = vst [vmem:[#allocation29_spill] sm:$0xff] %v13524_v10  ;;  %9714 = vmatmul.mubr.f32.gmra.mrb[52].mxu0 %v4388_v37  ;;  %v4407_v31 = vsub.f32 %v13517_v2, %v15023_v32  ;;  %v13537_v14 = vsub.f32 %v4081_v33, %v13524_v10  ;;  %v4084_v56 = vsel %vm1992_vm2, %v11642_v22, 0  ;;  %v13540_v48 = vand.u32 4294901760, %v4087_v16 }
 0x494   :  { %15472 = vst [vmem:[#allocation32_spill] sm:$0xff] %v13530_v36  ;;  %v4398_v46 = vand.u32 4294901760, %v4397_v63  ;;  %v15030_v59 = vand.u32 4294901760, %v13530_v36  ;;  %v13543_v52 = vand.u32 4294901760, %v4084_v56 }
 0x495   :  { %15473 = vst [vmem:[#allocation33_spill] sm:$0xff] %v13537_v14  ;;  %15474 = vst [vmem:[#allocation36_spill] sm:$0xff] %v13540_v48  ;;  %v11644_v23 = vpop.eup %11643  ;;  %v4408_v30 = vand.u32 4294901760, %v4407_v31  ;;  %v15033_v37 = vand.u32 4294901760, %v13537_v14  ;;  %v13547_v42 = vsub.f32 %v4087_v16, %v13540_v48 }
 0x496   :  { %15475 = vst [vmem:[#allocation37_spill] sm:$0xff] %v13543_v52  ;;  %v11646_v32 = vpop.eup %11645  ;;  %9716 = vmatprep.mubr.f32.mxu0 %v4398_v46  ;;  %v4417_v33 = vsub.f32 %v13530_v36, %v15030_v59  ;;  %v13553_v22 = vsub.f32 %v4084_v56, %v13543_v52  ;;  %v4093_v63 = vsel %vm1992_vm2, %v11644_v23, 0 }
 0x497   :  { %15476 = vst [vmem:[#allocation41_spill] sm:$0xff] %v13547_v42  ;;  %9717 = vmatmul.mubr.f32.gmra.mrb[54].mxu0 %v4408_v30  ;;  %v4427_v31 = vsub.f32 %v13537_v14, %v15033_v37  ;;  %v15038_v2 = vand.u32 4294901760, %v13547_v42  ;;  %v4090_v16 = vsel %vm1992_vm2, %v11646_v32, 0  ;;  %v13561_v45 = vand.u32 4294901760, %v4093_v63 }
 0x498   :  { %15477 = vst [vmem:[#allocation40_spill] sm:$0xff] %v13553_v22  ;;  %v4418_v46 = vand.u32 4294901760, %v4417_v33  ;;  %v15042_v41 = vand.u32 4294901760, %v13553_v22  ;;  %v13564_v59 = vand.u32 4294901760, %v4090_v16 }
 0x499   :  { %15478 = vst [vmem:[#allocation45_spill] sm:$0xff] %v13561_v45  ;;  %v11648_v56 = vpop.eup %11647  ;;  %v4428_v36 = vand.u32 4294901760, %v4427_v31  ;;  %v4447_v30 = vsub.f32 %v13547_v42, %v15038_v2  ;;  %v13570_v23 = vsub.f32 %v4093_v63, %v13561_v45 }
 0x49a   :  { %15479 = vst [vmem:[#allocation44_spill] sm:$0xff] %v13564_v59  ;;  %v11650_v37 = vpop.eup %11649  ;;  %9719 = vmatprep.mubr.f32.mxu0 %v4418_v46  ;;  %v4437_v32 = vsub.f32 %v13553_v22, %v15042_v41  ;;  %v13576_v33 = vsub.f32 %v4090_v16, %v13564_v59  ;;  %v4099_v14 = vsel %vm1992_vm2, %v11648_v56, 0 }
 0x49b   :  { %9720 = vmatmul.mubr.f32.gmra.mrb[56].mxu0 %v4428_v36  ;;  %v15045_v31 = vand.u32 4294901760, %v13570_v23  ;;  %v4096_v58 = vsel %vm1992_vm2, %v11650_v37, 0  ;;  %v13581_v2 = vand.u32 4294901760, %v4099_v14  ;;  %v4448_v43 = vand.u32 4294901760, %v4447_v30 }
 0x49c   :  { %v4438_v63 = vand.u32 4294901760, %v4437_v32  ;;  %v15048_v42 = vand.u32 4294901760, %v13576_v33  ;;  %v13584_v46 = vand.u32 4294901760, %v4096_v58 }
 0x49d   :  { %15480 = vst [vmem:[#allocation47_spill] sm:$0xff] %v13581_v2  ;;  %v4467_v16 = vsub.f32 %v13570_v23, %v15045_v31  ;;  %v13590_v41 = vsub.f32 %v4099_v14, %v13581_v2 }
 0x49e   :  { %15481 = vst [vmem:[#allocation46_spill] sm:$0xff] %v13584_v46  ;;  %9722 = vmatprep.mubr.f32.mxu0 %v4438_v63  ;;  %v4457_v36 = vsub.f32 %v13576_v33, %v15048_v42  ;;  %v13596_v37 = vsub.f32 %v4096_v58, %v13584_v46  ;;  %v15500_v42 = vld [vmem:[#allocation23_spill] sm:$0xff] }
 0x49f   :  { %9723 = vmatmul.mubr.f32.gmra.mrb[58].mxu0 %v4448_v43  ;;  %v15046_v56 = vand.u32 4294901760, %v13590_v41  ;;  %v4468_v22 = vand.u32 4294901760, %v4467_v16  ;;  %v15482_v43 = vand.u32 4294901760, %v13157_v38  ;;  %v15488_v16 = vld [vmem:[#allocation20_spill] sm:$0xff]  ;;  %v15492_v38 = vld [vmem:[#allocation34_spill] sm:$0xff] }
 0x4a0   :  { %v4458_v32 = vand.u32 4294901760, %v4457_v36  ;;  %v15047_v30 = vand.u32 4294901760, %v13596_v37  ;;  %v15489_v36 = vld [vmem:[#allocation22_spill] sm:$0xff] }
 0x4a1   :  { %v4487_v14 = vsub.f32 %v13590_v41, %v15046_v56  ;;  %v15498_v56 = vld [vmem:[#allocation17_spill] sm:$0xff] }
 0x4a2   :  { %9725 = vmatprep.mubr.f32.mxu0 %v4458_v32  ;;  %v4477_v63 = vsub.f32 %v13596_v37, %v15047_v30  ;;  %v15490_v32 = vld [vmem:[#allocation26_spill] sm:$0xff] }
 0x4a3   :  { %9726 = vmatmul.mubr.f32.gmra.mrb[60].mxu0 %v4468_v22  ;;  %v4488_v58 = vand.u32 4294901760, %v4487_v14  ;;  %v15486_v22 = vld [vmem:[#allocation21_spill] sm:$0xff]  ;;  %v15491_v14 = vld [vmem:[#allocation27_spill] sm:$0xff]  ;;  %v15499_v30 = vld [vmem:[#allocation18_spill] sm:$0xff] }
 0x4a4   :  { %v4478_v31 = vand.u32 4294901760, %v4477_v63  ;;  %v15493_v63 = vld [vmem:[#allocation35_spill] sm:$0xff] }
 0x4a6   :  { %9728 = vmatprep.mubr.f32.mxu0 %v4478_v31  ;;  %v15487_v31 = vld [vmem:[#allocation24_spill] sm:$0xff] }
 0x4a7   :  { %9729 = vmatmul.mubr.f32.gmra.mrb[62].mxu0 %v4488_v58  ;;  %v15494_v58 = vld [vmem:[#allocation43_spill] sm:$0xff] }
 0x4a8   :  { %9747 = vmatprep.mubr.f32.mxu0 %v13252_v21 }
 0x4ab   :  { %9748 = vmatmul.mubr.f32.vlgmr.msra.gmra.mrb[32].mxu0 %v13249_v60 }
 0x4ac   :  { %9750 = vmatprep.mubr.f32.mxu0 %v13274_v9  ;;  %10590 = vmatpush3.bf16.msra.mxu0 %v13191_v34  ;;  %v15483_v34 = vld [vmem:[#allocation2_spill] sm:$0xff] }
 0x4ad   :  { %10592 = vmatprep.subr.bf16.mxu0 %v13205_v44 }
 0x4af   :  { %9751 = vmatmul.mubr.f32.gmra.mrb[34].mxu0 %v13271_v62 }
 0x4b0   :  { %9753 = vmatprep.mubr.f32.mxu0 %v13296_v11  ;;  %10594 = vmatpush3.bf16.msra.mxu0 %v13205_v44  ;;  %v15484_v44 = vand.u32 4294901760, %v15483_v34  ;;  %v15496_v34 = vld [vmem:[#allocation5_spill] sm:$0xff] }
 0x4b1   :  { %10596 = vmatprep.subr.bf16.mxu0 %v13219_v50 }
 0x4b3   :  { %9754 = vmatmul.mubr.f32.gmra.mrb[36].mxu0 %v13302_v17 }
 0x4b4   :  { %9756 = vmatprep.mubr.f32.mxu0 %v13318_v35  ;;  %10598 = vmatpush3.bf16.msra.mxu0 %v13219_v50  ;;  %v10619_v50 = vpack.c.bf16 %v15484_v44, %v15482_v43  ;;  %v15495_v43 = vld [vmem:[#allocation42_spill] sm:$0xff] }
 0x4b5   :  { %10600 = vmatprep.subr.bf16.mxu0 %v13242_v51  ;;  %v15497_v44 = vld [vmem:[#allocation6_spill] sm:$0xff] }
 0x4b7   :  { %9757 = vmatmul.mubr.f32.gmra.mrb[38].mxu0 %v13322_v27 }
 0x4b8   :  { %9759 = vmatprep.mubr.f32.mxu0 %v13341_v6  ;;  %10602 = vmatpush3.bf16.msra.mxu0 %v13242_v51  ;;  %v15485_v51 = vld [vmem:[#allocation15_spill] sm:$0xff] }
 0x4b9   :  { %10604 = vmatprep.subr.bf16.mxu0 %v13052_v18 }
 0x4bb   :  { %9760 = vmatmul.mubr.f32.gmra.mrb[40].mxu0 %v13346_v12 }
 0x4bc   :  { %9762 = vmatprep.mubr.f32.mxu0 %v13364_v19 }
 0x4bf   :  { %9763 = vmatmul.mubr.f32.gmra.mrb[42].mxu0 %v13368_v26 }
 0x4c0   :  { %9765 = vmatprep.mubr.f32.mxu0 %v13387_v39 }
 0x4c3   :  { %9766 = vmatmul.mubr.f32.gmra.mrb[44].mxu0 %v13392_v1 }
 0x4c4   :  { %9768 = vmatprep.mubr.f32.mxu0 %v13411_v61 }
 0x4c7   :  { %9769 = vmatmul.mubr.f32.gmra.mrb[46].mxu0 %v13415_v54 }
 0x4c8   :  { %9771 = vmatprep.mubr.f32.mxu0 %v13433_v25  ;;  %v15515_v25 = vld [vmem:[#allocation14_spill] sm:$0xff] }
 0x4c9   :  { %v15516_v54 = vand.u32 4294901760, %v15515_v25  ;;  %v15533_v25 = vand.u32 4294901760, %v15493_v63 }
 0x4cb   :  { %9772 = vmatmul.mubr.f32.gmra.mrb[48].mxu0 %v13437_v5 }
 0x4cc   :  { %9774 = vmatprep.mubr.f32.mxu0 %v13455_v49  ;;  %v15513_v49 = vld [vmem:[#allocation13_spill] sm:$0xff] }
 0x4cd   :  { %v15514_v5 = vand.u32 4294901760, %v15513_v49  ;;  %v15524_v49 = vand.u32 4294901760, %v13330_v55 }
 0x4cf   :  { %9775 = vmatmul.mubr.f32.gmra.mrb[50].mxu0 %v13459_v13  ;;  %v15512_v13 = vand.u32 4294901760, %v13290_v20  ;;  %v10627_v61 = vpack.c.bf16 %v15516_v54, %v15514_v5  ;;  %v15525_v5 = vand.u32 4294901760, %v15485_v51  ;;  %v15530_v54 = vand.u32 4294901760, %v15490_v32 }
 0x4d0   :  { %9777 = vmatprep.mubr.f32.mxu0 %v13477_v3  ;;  %v15511_v3 = vand.u32 4294901760, %v13255_v24 }
 0x4d3   :  { %9778 = vmatmul.mubr.f32.gmra.mrb[52].mxu0 %v13481_v29 }
 0x4d4   :  { %9780 = vmatprep.mubr.f32.mxu0 %v13499_v15 }
 0x4d7   :  { %9781 = vmatmul.mubr.f32.gmra.mrb[54].mxu0 %v13503_v0  ;;  %v15509_v0 = vld [vmem:[#allocation12_spill] sm:$0xff] }
 0x4d8   :  { %9783 = vmatprep.mubr.f32.mxu0 %v13521_v40  ;;  %v15510_v15 = vand.u32 4294901760, %v15509_v0 }
 0x4db   :  { %9784 = vmatmul.mubr.f32.gmra.mrb[56].mxu0 %v13524_v10  ;;  %v15507_v10 = vld [vmem:[#allocation11_spill] sm:$0xff] }
 0x4dc   :  { %9786 = vmatprep.mubr.f32.mxu0 %v13543_v52  ;;  %v15506_v52 = vand.u32 4294901760, %v13263_v7  ;;  %v15508_v40 = vand.u32 4294901760, %v15507_v10  ;;  %v15535_v10 = vand.u32 4294901760, %v15495_v43 }
 0x4de   :  { %v10623_v29 = vpack.c.bf16 %v15510_v15, %v15508_v40  ;;  %v15521_v40 = vld [vmem:[#allocation10_spill] sm:$0xff]  ;;  %v15534_v15 = vand.u32 4294901760, %v15494_v58 }
 0x4df   :  { %9787 = vmatmul.mubr.f32.gmra.mrb[58].mxu0 %v13540_v48  ;;  %v15505_v48 = vld [vmem:[#allocation41_spill] sm:$0xff] }
 0x4e0   :  { %9789 = vmatprep.mubr.f32.mxu0 %v13564_v59  ;;  %v15504_v59 = vld [vmem:[#allocation40_spill] sm:$0xff] }
 0x4e3   :  { %9790 = vmatmul.mubr.f32.gmra.mrb[60].mxu0 %v13561_v45  ;;  %v15503_v45 = vld [vmem:[#allocation33_spill] sm:$0xff] }
 0x4e4   :  { %9792 = vmatprep.mubr.f32.mxu0 %v13584_v46  ;;  %v15502_v46 = vld [vmem:[#allocation32_spill] sm:$0xff] }
 0x4e7   :  { %9793 = vmatmul.mubr.f32.gmra.mrb[62].mxu0 %v13581_v2  ;;  %v15501_v2 = vld [vmem:[#allocation25_spill] sm:$0xff] }
 0x4e8   :  { %9811 = vmatprep.mubr.f32.mxu0 %v13263_v7  ;;  %v15517_v7 = vand.u32 4294901760, %v13283_v4 }
 0x4eb   :  { %9812 = vmatmul.mubr.f32.vlgmr.msra.gmra.mrb[32].mxu0 %v13255_v24  ;;  %v15519_v24 = vld [vmem:[#allocation9_spill] sm:$0xff] }
 0x4ec   :  { %9814 = vmatprep.mubr.f32.mxu0 %v13290_v20  ;;  %10606 = vmatpush3.bf16.msra.mxu0 %v13052_v18  ;;  %v15520_v0 = vand.u32 4294901760, %v15519_v24  ;;  %v15522_v20 = vand.u32 4294901760, %v15521_v40  ;;  %v15558_v24 = vld [vmem:[#allocation16_spill] sm:$0xff] }
 0x4ed   :  { %10608 = vmatprep.subr.bf16.mxu0 %v13059_v28  ;;  %v15560_v40 = vld [vmem:[#allocation28_spill] sm:$0xff] }
 0x4ef   :  { %9815 = vmatmul.mubr.f32.gmra.mrb[34].mxu0 %v13283_v4  ;;  %v15526_v4 = vand.u32 4294901760, %v15486_v22 }
 0x4f0   :  { %9817 = vmatprep.mubr.f32.mxu0 %v13309_v53  ;;  %10610 = vmatpush3.bf16.msra.mxu0 %v13059_v28 }
 0x4f1   :  { %10612 = vmatprep.subr.bf16.mxu0 %v13074_v47 }
 0x4f3   :  { %9818 = vmatmul.mubr.f32.gmra.mrb[36].mxu0 %v13313_v8 }
 0x4f4   :  { %9820 = vmatprep.mubr.f32.mxu0 %v13330_v55  ;;  %10614 = vmatpush3.bf16.msra.mxu0 %v13074_v47  ;;  %v15531_v55 = vand.u32 4294901760, %v15491_v14 }
 0x4f5   :  { %10616 = vmatprep.subr.bf16.mxu0 %v13150_v57 }
 0x4f7   :  { %9821 = vmatmul.mubr.f32.gmra.mrb[38].mxu0 %v15485_v51  ;;  %v15537_v51 = vand.u32 4294901760, %v15497_v44 }
 0x4f8   :  { %9823 = vmatprep.mubr.f32.mxu0 %v15486_v22  ;;  %10618 = vmatpush3.bf16.msra.mxu0 %v13150_v57  ;;  %v15538_v22 = vand.u32 4294901760, %v15498_v56 }
 0x4f9   :  { %10620 = vmatprep.subr.bf16.mxu0 %v10619_v50 }
 0x4fb   :  { %9824 = vmatmul.mubr.f32.gmra.mrb[40].mxu0 %v15487_v31 }
 0x4fc   :  { %9826 = vmatprep.mubr.f32.mxu0 %v15488_v16 }
 0x4ff   :  { %9827 = vmatmul.mubr.f32.gmra.mrb[42].mxu0 %v15489_v36 }
 0x500   :  { %9829 = vmatprep.mubr.f32.mxu0 %v15490_v32  ;;  %v15542_v32 = vand.u32 4294901760, %v15502_v46 }
 0x503   :  { %9830 = vmatmul.mubr.f32.gmra.mrb[44].mxu0 %v15491_v14  ;;  %v15543_v14 = vand.u32 4294901760, %v15503_v45 }
 0x504   :  { %9832 = vmatprep.mubr.f32.mxu0 %v15492_v38 }
 0x507   :  { %9833 = vmatmul.mubr.f32.gmra.mrb[46].mxu0 %v15493_v63 }
 0x508   :  { %9835 = vmatprep.mubr.f32.mxu0 %v15494_v58 }
 0x50b   :  { %9836 = vmatmul.mubr.f32.gmra.mrb[48].mxu0 %v15495_v43 }
 0x50c   :  { %9838 = vmatprep.mubr.f32.mxu0 %v15496_v34 }
 0x50f   :  { %9839 = vmatmul.mubr.f32.gmra.mrb[50].mxu0 %v15497_v44  ;;  %v15555_v44 = vld [vmem:[#allocation4_spill] sm:$0xff] }
 0x510   :  { %9841 = vmatprep.mubr.f32.mxu0 %v15498_v56  ;;  %v15545_v56 = vand.u32 4294901760, %v15505_v48 }
 0x513   :  { %9842 = vmatmul.mubr.f32.gmra.mrb[52].mxu0 %v15499_v30 }
 0x514   :  { %9844 = vmatprep.mubr.f32.mxu0 %v15500_v42 }
 0x517   :  { %9845 = vmatmul.mubr.f32.gmra.mrb[54].mxu0 %v15501_v2 }
 0x518   :  { %9847 = vmatprep.mubr.f32.mxu0 %v15502_v46  ;;  %v15549_v46 = vand.u32 4294901760, %v13590_v41 }
 0x51b   :  { %9848 = vmatmul.mubr.f32.gmra.mrb[56].mxu0 %v15503_v45  ;;  %v13769_v45 = vld [vmem:[%s14753_s1 + $0xc0] sm:$0xff] }
 0x51c   :  { %9850 = vmatprep.mubr.f32.mxu0 %v15504_v59 }
 0x51f   :  { %9851 = vmatmul.mubr.f32.gmra.mrb[58].mxu0 %v15505_v48  ;;  %v13779_v48 = vld [vmem:[%s14753_s1 + $0xd0] sm:$0xff] }
 0x520   :  { %9853 = vmatprep.mubr.f32.mxu0 %v13576_v33 }
 0x523   :  { %9854 = vmatmul.mubr.f32.gmra.mrb[60].mxu0 %v13570_v23 }
 0x524   :  { %9856 = vmatprep.mubr.f32.mxu0 %v13596_v37 }
 0x527   :  { %9857 = vmatmul.mubr.f32.gmra.mrb[62].mxu0 %v13590_v41  ;;  %v6114_v41 = vand.u32 4294901760, %v13769_v45 }
 0x528   :  { %9875 = vmatprep.mubr.f32.mxu0 %v15506_v52  ;;  %v15518_v52 = vand.u32 4294901760, %v13309_v53  ;;  %v15528_v53 = vand.u32 4294901760, %v15488_v16  ;;  %v15540_v16 = vand.u32 4294901760, %v15500_v42  ;;  %v15547_v42 = vand.u32 4294901760, %v13570_v23 }
 0x52b   :  { %9876 = vmatmul.mubr.f32.vlgmr.msra.gmra.mrb[32].mxu0 %v15511_v3  ;;  %v15523_v3 = vand.u32 4294901760, %v13313_v8  ;;  %v15529_v8 = vand.u32 4294901760, %v15489_v36  ;;  %v15541_v36 = vand.u32 4294901760, %v15501_v2  ;;  %v15548_v2 = vand.u32 4294901760, %v13596_v37 }
 0x52c   :  { %9878 = vmatprep.mubr.f32.mxu0 %v15512_v13  ;;  %10622 = vmatpush3.bf16.msra.mxu0 %v10619_v50  ;;  %v10631_v13 = vpack.c.bf16 %v15522_v20, %v15520_v0  ;;  %v15536_v50 = vand.u32 4294901760, %v15496_v34  ;;  %v6120_v37 = vand.u32 4294901760, %v13779_v48  ;;  %v15553_v34 = vld [vmem:[#allocation39_spill] sm:$0xff]  ;;  %v15561_v20 = vld [vmem:[#allocation29_spill] sm:$0xff] }
 0x52d   :  { %10624 = vmatprep.subr.bf16.mxu0 %v10623_v29  ;;  %v15559_v0 = vld [vmem:[#allocation19_spill] sm:$0xff] }
 0x52f   :  { %9879 = vmatmul.mubr.f32.gmra.mrb[34].mxu0 %v15517_v7  ;;  %v15556_v7 = vld [vmem:[#allocation7_spill] sm:$0xff] }
 0x530   :  { %9881 = vmatprep.mubr.f32.mxu0 %v15518_v52  ;;  %10626 = vmatpush3.bf16.msra.mxu0 %v10623_v29  ;;  %v15527_v29 = vand.u32 4294901760, %v15487_v31  ;;  %v15539_v31 = vand.u32 4294901760, %v15499_v30  ;;  %v15546_v30 = vand.u32 4294901760, %v13576_v33  ;;  %v13787_v33 = vld [vmem:[%s14753_s1 + $0xd8] sm:$0xff]  ;;  %v15557_v52 = vld [vmem:[#allocation8_spill] sm:$0xff] }
 0x531   :  { %10628 = vmatprep.subr.bf16.mxu0 %v10627_v61  ;;  %v6123_v63 = vand.u32 4294901760, %v13787_v33 }
 0x533   :  { %9882 = vmatmul.mubr.f32.gmra.mrb[36].mxu0 %v15523_v3  ;;  %v13806_v43 = vpack.c.bf16 %v6123_v63, %v6120_v37  ;;  %v15563_v3 = vld [vmem:[#allocation36_spill] sm:$0xff] }
 0x534   :  { %9884 = vmatprep.mubr.f32.mxu0 %v15524_v49  ;;  %10630 = vmatpush3.bf16.msra.mxu0 %v10627_v61  ;;  %v15532_v61 = vand.u32 4294901760, %v15492_v38  ;;  %v15544_v38 = vand.u32 4294901760, %v15504_v59  ;;  %v13774_v59 = vld [vmem:[%s14753_s1 + $0xc8] sm:$0xff]  ;;  %v15564_v49 = vld [vmem:[#allocation44_spill] sm:$0xff] }
 0x535   :  { %10632 = vmatprep.subr.bf16.mxu0 %v10631_v13  ;;  %v6117_v23 = vand.u32 4294901760, %v13774_v59 }
 0x537   :  { %9885 = vmatmul.mubr.f32.gmra.mrb[38].mxu0 %v15525_v5  ;;  %v13796_v58 = vpack.c.bf16 %v6117_v23, %v6114_v41  ;;  %v15565_v5 = vld [vmem:[#allocation45_spill] sm:$0xff] }
 0x538   :  { %9887 = vmatprep.mubr.f32.mxu0 %v15526_v4  ;;  %10634 = vmatpush3.bf16.msra.mxu0 %v10631_v13  ;;  %v15562_v13 = vld [vmem:[#allocation37_spill] sm:$0xff]  ;;  %v15566_v4 = vld [vmem:[#allocation46_spill] sm:$0xff] }
 0x539   :  { %10636 = vmatprep.subr.bf16.mxu0 %v13052_v18  ;;  %10747 = vmatprep.subr.bf16.mxu1 %v13796_v58 }
 0x53a   :  { %10751 = vmatpush3.bf16.msra.mxu1 %v13796_v58 }
 0x53b   :  { %9888 = vmatmul.mubr.f32.gmra.mrb[40].mxu0 %v15527_v29  ;;  %10748 = vmatprep.subr.bf16.mxu1 %v13806_v43  ;;  %v15567_v29 = vld [vmem:[#allocation47_spill] sm:$0xff] }
 0x53c   :  { %9890 = vmatprep.mubr.f32.mxu0 %v15528_v53 }
 0x53e   :  { %10752 = vmatpush3.bf16.msra.mxu1 %v13806_v43 }
 0x53f   :  { %9891 = vmatmul.mubr.f32.gmra.mrb[42].mxu0 %v15529_v8 }
 0x540   :  { %9893 = vmatprep.mubr.f32.mxu0 %v15530_v54 }
 0x543   :  { %9894 = vmatmul.mubr.f32.gmra.mrb[44].mxu0 %v15531_v55 }
 0x544   :  { %9896 = vmatprep.mubr.f32.mxu0 %v15532_v61 }
 0x547   :  { %9897 = vmatmul.mubr.f32.gmra.mrb[46].mxu0 %v15533_v25 }
 0x548   :  { %9899 = vmatprep.mubr.f32.mxu0 %v15534_v15 }
 0x54b   :  { %9900 = vmatmul.mubr.f32.gmra.mrb[48].mxu0 %v15535_v10 }
 0x54c   :  { %9902 = vmatprep.mubr.f32.mxu0 %v15536_v50 }
 0x54f   :  { %9903 = vmatmul.mubr.f32.gmra.mrb[50].mxu0 %v15537_v51 }
 0x550   :  { %9905 = vmatprep.mubr.f32.mxu0 %v15538_v22 }
 0x553   :  { %9906 = vmatmul.mubr.f32.gmra.mrb[52].mxu0 %v15539_v31 }
 0x554   :  { %9908 = vmatprep.mubr.f32.mxu0 %v15540_v16 }
 0x557   :  { %9909 = vmatmul.mubr.f32.gmra.mrb[54].mxu0 %v15541_v36 }
 0x558   :  { %9911 = vmatprep.mubr.f32.mxu0 %v15542_v32 }
 0x55b   :  { %9912 = vmatmul.mubr.f32.gmra.mrb[56].mxu0 %v15543_v14 }
 0x55c   :  { %9914 = vmatprep.mubr.f32.mxu0 %v15544_v38 }
 0x55f   :  { %9915 = vmatmul.mubr.f32.gmra.mrb[58].mxu0 %v15545_v56 }
 0x560   :  { %9917 = vmatprep.mubr.f32.mxu0 %v15546_v30 }
 0x563   :  { %9918 = vmatmul.mubr.f32.gmra.mrb[60].mxu0 %v15547_v42 }
 0x564   :  { %9920 = vmatprep.mubr.f32.mxu0 %v15548_v2 }
 0x567   :  { %9921 = vmatmul.mubr.f32.gmra.mrb[62].mxu0 %v15549_v46 }
 0x568   :  { %9939 = vmatprep.mubr.f32.mxu0 %v13252_v21 }
 0x56b   :  { %9940 = vmatmul.mubr.f32.vlgmr.msra.gmra.mrb[32].mxu0 %v13249_v60 }
 0x56c   :  { %9942 = vmatprep.mubr.f32.mxu0 %v13274_v9  ;;  %10638 = vmatpush3.bf16.msra.mxu0 %v13052_v18  ;;  %v15550_v18 = vld [vmem:[#allocation30_spill] sm:$0xff] }
 0x56d   :  { %10640 = vmatprep.subr.bf16.mxu0 %v13059_v28 }
 0x56f   :  { %9943 = vmatmul.mubr.f32.gmra.mrb[34].mxu0 %v13271_v62 }
 0x570   :  { %9945 = vmatprep.mubr.f32.mxu0 %v13296_v11  ;;  %10642 = vmatpush3.bf16.msra.mxu0 %v13059_v28  ;;  %v15551_v28 = vld [vmem:[#allocation31_spill] sm:$0xff] }
 0x571   :  { %10644 = vmatprep.subr.bf16.mxu0 %v13074_v47 }
 0x573   :  { %9946 = vmatmul.mubr.f32.gmra.mrb[36].mxu0 %v13302_v17 }
 0x574   :  { %9948 = vmatprep.mubr.f32.mxu0 %v13318_v35  ;;  %10646 = vmatpush3.bf16.msra.mxu0 %v13074_v47  ;;  %v15552_v47 = vld [vmem:[#allocation38_spill] sm:$0xff] }
 0x575   :  { %10648 = vmatprep.subr.bf16.mxu0 %v13150_v57 }
 0x577   :  { %9949 = vmatmul.mubr.f32.gmra.mrb[38].mxu0 %v13322_v27 }
 0x578   :  { %9951 = vmatprep.mubr.f32.mxu0 %v13341_v6  ;;  %10650 = vmatpush3.bf16.msra.mxu0 %v13150_v57  ;;  %v15554_v57 = vld [vmem:[#allocation3_spill] sm:$0xff] }
 0x579   :  { %10652 = vmatprep.subr.bf16.mxu0 %v13796_v58 }
 0x57b   :  { %9952 = vmatmul.mubr.f32.gmra.mrb[40].mxu0 %v13346_v12 }
 0x57c   :  { %9954 = vmatprep.mubr.f32.mxu0 %v13364_v19 }
 0x57f   :  { %9955 = vmatmul.mubr.f32.gmra.mrb[42].mxu0 %v13368_v26 }
 0x580   :  { %9957 = vmatprep.mubr.f32.mxu0 %v13387_v39 }
 0x583   :  { %9958 = vmatmul.mubr.f32.gmra.mrb[44].mxu0 %v13392_v1 }
 0x584   :  { %9960 = vmatprep.mubr.f32.mxu0 %v15550_v18 }
 0x587   :  { %9961 = vmatmul.mubr.f32.gmra.mrb[46].mxu0 %v15551_v28 }
 0x588   :  { %9963 = vmatprep.mubr.f32.mxu0 %v15552_v47 }
 0x58b   :  { %9964 = vmatmul.mubr.f32.gmra.mrb[48].mxu0 %v15553_v34 }
 0x58c   :  { %9966 = vmatprep.mubr.f32.mxu0 %v15554_v57 }
 0x58f   :  { %9967 = vmatmul.mubr.f32.gmra.mrb[50].mxu0 %v15555_v44 }
 0x590   :  { %9969 = vmatprep.mubr.f32.mxu0 %v15556_v7 }
 0x593   :  { %9970 = vmatmul.mubr.f32.gmra.mrb[52].mxu0 %v15557_v52 }
 0x594   :  { %9972 = vmatprep.mubr.f32.mxu0 %v15558_v24 }
 0x597   :  { %9973 = vmatmul.mubr.f32.gmra.mrb[54].mxu0 %v15559_v0 }
 0x598   :  { %9975 = vmatprep.mubr.f32.mxu0 %v15560_v40 }
 0x59b   :  { %9976 = vmatmul.mubr.f32.gmra.mrb[56].mxu0 %v15561_v20 }
 0x59c   :  { %9978 = vmatprep.mubr.f32.mxu0 %v15562_v13 }
 0x59f   :  { %9979 = vmatmul.mubr.f32.gmra.mrb[58].mxu0 %v15563_v3 }
 0x5a0   :  { %9981 = vmatprep.mubr.f32.mxu0 %v15564_v49 }
 0x5a3   :  { %9982 = vmatmul.mubr.f32.gmra.mrb[60].mxu0 %v15565_v5 }
 0x5a4   :  { %9984 = vmatprep.mubr.f32.mxu0 %v15566_v4 }
 0x5a7   :  { %9985 = vmatmul.mubr.f32.gmra.mrb[62].mxu0 %v15567_v29 }
 0x5a8   :  { %10003 = vmatprep.mubr.f32.mxu0 %v13252_v21 }
 0x5ab   :  { %10004 = vmatmul.mubr.f32.vlgmr.msra.gmra.mrb[32].mxu0 %v13249_v60  ;;  %v8043_v60 = vld [vmem:[%s14753_s1 + $0xe8] sm:$0xff] }
 0x5ac   :  { %10006 = vmatprep.mubr.f32.mxu0 %v13274_v9  ;;  %10654 = vmatpush3.bf16.msra.mxu0 %v13796_v58 }
 0x5ad   :  { %10656 = vmatprep.subr.bf16.mxu0 %v13806_v43 }
 0x5af   :  { %10007 = vmatmul.mubr.f32.gmra.mrb[34].mxu0 %v13271_v62  ;;  %v6129_v62 = vand.u32 4294901760, %v8043_v60 }
 0x5b0   :  { %10009 = vmatprep.mubr.f32.mxu0 %v13296_v11  ;;  %10658 = vmatpush3.bf16.msra.mxu0 %v13806_v43  ;;  %v8044_v11 = vld [vmem:[%s14753_s1 + $0xf0] sm:$0xff] }
 0x5b1   :  { %v13928_v15 = vsub.f32 %v8043_v60, %v6129_v62 }
 0x5b3   :  { %10010 = vmatmul.mubr.f32.gmra.mrb[36].mxu0 %v13302_v17  ;;  %v8045_v17 = vld [vmem:[%s14753_s1 + $0xf8] sm:$0xff]  ;;  %15570 = vst [vmem:[#allocation21_spill] sm:$0xff] %v13928_v15  ;;  %v15091_v50 = vand.u32 4294901760, %v13928_v15 }
 0x5b4   :  { %10012 = vmatprep.mubr.f32.mxu0 %v13318_v35  ;;  %v6132_v35 = vand.u32 4294901760, %v8044_v11 }
 0x5b5   :  { %v6545_v22 = vsub.f32 %v13928_v15, %v15091_v50 }
 0x5b6   :  { %v13940_v32 = vsub.f32 %v8044_v11, %v6132_v35 }
 0x5b7   :  { %10013 = vmatmul.mubr.f32.gmra.mrb[38].mxu0 %v13322_v27  ;;  %v6135_v27 = vand.u32 4294901760, %v8045_v17  ;;  %v6546_v16 = vand.u32 4294901760, %v6545_v22 }
 0x5b8   :  { %10015 = vmatprep.mubr.f32.mxu0 %v13341_v6  ;;  %15571 = vst [vmem:[#allocation24_spill] sm:$0xff] %v13940_v32  ;;  %v15086_v38 = vand.u32 4294901760, %v13940_v32 }
 0x5b9   :  { %v13899_v6 = vpack.c.bf16 %v6135_v27, %v6132_v35  ;;  %v13942_v14 = vsub.f32 %v8045_v17, %v6135_v27 }
 0x5ba   :  { %v6552_v30 = vsub.f32 %v13940_v32, %v15086_v38 }
 0x5bb   :  { %10016 = vmatmul.mubr.f32.gmra.mrb[40].mxu0 %v13346_v12  ;;  %v13908_v12 = vsub.f32 %v13769_v45, %v6114_v41  ;;  %15572 = vst [vmem:[#allocation20_spill] sm:$0xff] %v13942_v14  ;;  %v15085_v56 = vand.u32 4294901760, %v13942_v14  ;;  %v13961_v41 = vsub.f32 %v13779_v48, %v6120_v37 }
 0x5bc   :  { %10018 = vmatprep.mubr.f32.mxu0 %v13364_v19  ;;  %v13913_v19 = vsub.f32 %v13774_v59, %v6117_v23  ;;  %v6553_v2 = vand.u32 4294901760, %v6552_v30  ;;  %v13966_v23 = vsub.f32 %v13787_v33, %v6123_v63 }
 0x5bd   :  { %v6559_v42 = vsub.f32 %v13942_v14, %v15085_v56  ;;  %15573 = vst [vmem:[#allocation22_spill] sm:$0xff] %v13961_v41 }
 0x5be   :  { %15568 = vst [vmem:[#allocation2_spill] sm:$0xff] %v13913_v19  ;;  %v13956_v59 = vpack.c.bf16 %v13913_v19, %v13908_v12  ;;  %15574 = vst [vmem:[#allocation26_spill] sm:$0xff] %v13966_v23 }
 0x5bf   :  { %10019 = vmatmul.mubr.f32.gmra.mrb[42].mxu0 %v13368_v26  ;;  %v8042_v26 = vld [vmem:[%s14753_s1 + $0xe0] sm:$0xff]  ;;  %v6560_v46 = vand.u32 4294901760, %v6559_v42 }
 0x5c0   :  { %10021 = vmatprep.mubr.f32.mxu0 %v13387_v39  ;;  %v6126_v21 = vand.u32 4294901760, %v8042_v26  ;;  %v15104_v39 = vand.u32 4294901760, %v13908_v12 }
 0x5c1   :  { %v13952_v45 = vpack.c.bf16 %v6560_v46, %v6553_v2 }
 0x5c2   :  { %v13887_v9 = vpack.c.bf16 %v6129_v62, %v6126_v21  ;;  %v6510_v53 = vsub.f32 %v13908_v12, %v15104_v39  ;;  %v13926_v25 = vsub.f32 %v8042_v26, %v6126_v21  ;;  %v15098_v21 = vand.u32 4294901760, %v13966_v23 }
 0x5c3   :  { %10022 = vmatmul.mubr.f32.gmra.mrb[44].mxu0 %v13392_v1  ;;  %v15103_v1 = vand.u32 4294901760, %v13913_v19 }
 0x5c4   :  { %10024 = vmatprep.mubr.f32.mxu0 %v15550_v18  ;;  %10749 = vmatprep.subr.bf16.mxu1 %v13887_v9  ;;  %v6511_v54 = vand.u32 4294901760, %v6510_v53  ;;  %15569 = vst [vmem:[#allocation15_spill] sm:$0xff] %v13926_v25  ;;  %v15093_v10 = vand.u32 4294901760, %v13926_v25  ;;  %v13970_v18 = vpack.c.bf16 %v13966_v23, %v13961_v41  ;;  %v6531_v30 = vsub.f32 %v13966_v23, %v15098_v21 }
 0x5c5   :  { %10660 = vmatprep.subr.bf16.mxu0 %v13887_v9  ;;  %10753 = vmatpush3.bf16.msra.mxu1 %v13887_v9  ;;  %v6517_v8 = vsub.f32 %v13913_v19, %v15103_v1 }
 0x5c6   :  { %10662 = vmatpush3.bf16.msra.mxu0 %v13887_v9  ;;  %10750 = vmatprep.subr.bf16.mxu1 %v13899_v6  ;;  %v6538_v51 = vsub.f32 %v13926_v25, %v15093_v10 }
 0x5c7   :  { %10025 = vmatmul.mubr.f32.gmra.mrb[46].mxu0 %v15551_v28  ;;  %10664 = vmatprep.subr.bf16.mxu0 %v13899_v6  ;;  %v6518_v55 = vand.u32 4294901760, %v6517_v8  ;;  %v13974_v28 = vpack.c.bf16 %v13928_v15, %v13926_v25 }
 0x5c8   :  { %10027 = vmatprep.mubr.f32.mxu0 %v15552_v47  ;;  %v6539_v31 = vand.u32 4294901760, %v6538_v51  ;;  %v13979_v47 = vld [vmem:[%s14755_s2 + $0x2] ss:$0 sm:$0xff] }
 0x5c9   :  { %10754 = vmatpush3.bf16.msra.mxu1 %v13899_v6  ;;  %v13923_v61 = vpack.c.bf16 %v6518_v55, %v6511_v54 }
 0x5ca   :  { %10666 = vmatpush3.bf16.msra.mxu0 %v13899_v6  ;;  %v13938_v36 = vpack.c.bf16 %v6546_v16, %v6539_v31 }
 0x5cb   :  { %10028 = vmatmul.mubr.f32.gmra.mrb[48].mxu0 %v15553_v34  ;;  %10668 = vmatprep.subr.bf16.mxu1 %v13923_v61 }
 0x5cc   :  { %10030 = vmatprep.mubr.f32.mxu0 %v15554_v57 }
 0x5cf   :  { %10031 = vmatmul.mubr.f32.gmra.mrb[50].mxu0 %v15555_v44 }
 0x5d0   :  { %10033 = vmatprep.mubr.f32.mxu0 %v15556_v7 }
 0x5d3   :  { %10034 = vmatmul.mubr.f32.gmra.mrb[52].mxu0 %v15557_v52 }
 0x5d4   :  { %10036 = vmatprep.mubr.f32.mxu0 %v15558_v24 }
 0x5d7   :  { %10037 = vmatmul.mubr.f32.gmra.mrb[54].mxu0 %v15559_v0 }
 0x5d8   :  { %10039 = vmatprep.mubr.f32.mxu0 %v15560_v40 }
 0x5db   :  { %10040 = vmatmul.mubr.f32.gmra.mrb[56].mxu0 %v15561_v20 }
 0x5dc   :  { %10042 = vmatprep.mubr.f32.mxu0 %v15562_v13  ;;  %v13989_v13 = vpack.c.bf16 %v13942_v14, %v13940_v32 }
 0x5df   :  { %10043 = vmatmul.mubr.f32.gmra.mrb[58].mxu0 %v15563_v3 }
 0x5e0   :  { %10045 = vmatprep.mubr.f32.mxu0 %v15564_v49 }
 0x5e3   :  { %10046 = vmatmul.mubr.f32.gmra.mrb[60].mxu0 %v15565_v5 }
 0x5e4   :  { %10048 = vmatprep.mubr.f32.mxu0 %v15566_v4  ;;  %v15099_v4 = vand.u32 4294901760, %v13961_v41 }
 0x5e6   :  { %v6524_v55 = vsub.f32 %v13961_v41, %v15099_v4 }
 0x5e7   :  { %10049 = vmatmul.mubr.f32.gmra.mrb[62].mxu0 %v15567_v29 }
 0x67e   :  { %v10005_v48 = vpop.f32.mrb[32].mxu0 }
 0x67f   :  { %v10819_v37 = vadd.f32 %v10005_v48, %v13979_v47  ;;  %v5781_v34 = vpop.f32.mrb[33].mxu0 }
 0x680   :  { %v10820_v33 = vadd.f32 %v13979_v47, %v5781_v34 }
 0x681   :  { %11651 = vtanh.f32 %v10819_v37 }
 0x682   :  { %11653 = vtanh.f32 %v10820_v33  ;;  %v10008_v63 = vpop.f32.mrb[34].mxu0 }
 0x683   :  { %v10821_v57 = vadd.f32 %v10008_v63, %v13979_v47  ;;  %v5793_v44 = vpop.f32.mrb[35].mxu0 }
 0x684   :  { %v10822_v7 = vadd.f32 %v13979_v47, %v5793_v44 }
 0x685   :  { %11655 = vtanh.f32 %v10821_v57 }
 0x686   :  { %11657 = vtanh.f32 %v10822_v7  ;;  %v10011_v52 = vpop.f32.mrb[36].mxu0 }
 0x687   :  { %v10823_v24 = vadd.f32 %v10011_v52, %v13979_v47  ;;  %v5805_v0 = vpop.f32.mrb[37].mxu0  ;;  %v6525_v52 = vand.u32 4294901760, %v6524_v55 }
 0x688   :  { %v10824_v40 = vadd.f32 %v13979_v47, %v5805_v0 }
 0x689   :  { %11659 = vtanh.f32 %v10823_v24 }
 0x68a   :  { %11661 = vtanh.f32 %v10824_v40  ;;  %v10014_v20 = vpop.f32.mrb[38].mxu0 }
 0x68b   :  { %v11652_v3 = vpop.eup %11651  ;;  %v10825_v49 = vadd.f32 %v10014_v20, %v13979_v47  ;;  %v5817_v5 = vpop.f32.mrb[39].mxu0 }
 0x68c   :  { %v11654_v29 = vpop.eup %11653  ;;  %v6021_v26 = vsel %vm1992_vm2, %v11652_v3, 0  ;;  %v10826_v60 = vadd.f32 %v13979_v47, %v5817_v5 }
 0x68d   :  { %v13996_v62 = vand.u32 4294901760, %v6021_v26  ;;  %11663 = vtanh.f32 %v10825_v49  ;;  %v6018_v11 = vsel %vm1992_vm2, %v11654_v29, 0  ;;  %v6532_v29 = vand.u32 4294901760, %v6531_v30 }
 0x68e   :  { %11665 = vtanh.f32 %v10826_v60  ;;  %v10017_v17 = vpop.f32.mrb[40].mxu0  ;;  %v13999_v35 = vand.u32 4294901760, %v6018_v11 }
 0x68f   :  { %v11656_v27 = vpop.eup %11655  ;;  %v14002_v53 = vsub.f32 %v6021_v26, %v13996_v62  ;;  %v10827_v8 = vadd.f32 %v10017_v17, %v13979_v47  ;;  %v5829_v54 = vpop.f32.mrb[41].mxu0 }
 0x690   :  { %v11658_v51 = vpop.eup %11657  ;;  %v6027_v22 = vsel %vm1992_vm2, %v11656_v27, 0  ;;  %v10828_v31 = vadd.f32 %v13979_v47, %v5829_v54  ;;  %v14011_v16 = vsub.f32 %v6018_v11, %v13999_v35 }
 0x691   :  { %v14016_v42 = vand.u32 4294901760, %v6027_v22  ;;  %11667 = vtanh.f32 %v10827_v8  ;;  %v15096_v2 = vand.u32 4294901760, %v14002_v53  ;;  %v6024_v46 = vsel %vm1992_vm2, %v11658_v51, 0 }
 0x692   :  { %11669 = vtanh.f32 %v10828_v31  ;;  %v10020_v48 = vpop.f32.mrb[42].mxu0  ;;  %v15101_v37 = vand.u32 4294901760, %v14011_v16  ;;  %v14021_v34 = vand.u32 4294901760, %v6024_v46 }
 0x693   :  { %v11660_v33 = vpop.eup %11659  ;;  %v14024_v63 = vsub.f32 %v6027_v22, %v14016_v42  ;;  %v10829_v57 = vadd.f32 %v10020_v48, %v13979_v47  ;;  %v5841_v44 = vpop.f32.mrb[43].mxu0  ;;  %v6199_v7 = vsub.f32 %v14002_v53, %v15096_v2 }
 0x694   :  { %v11662_v24 = vpop.eup %11661  ;;  %v10830_v0 = vadd.f32 %v13979_v47, %v5841_v44  ;;  %v6189_v40 = vsub.f32 %v14011_v16, %v15101_v37  ;;  %v14035_v20 = vsub.f32 %v6024_v46, %v14021_v34  ;;  %v6033_v3 = vsel %vm1992_vm2, %v11660_v33, 0 }
 0x695   :  { %11671 = vtanh.f32 %v10829_v57  ;;  %v15089_v49 = vand.u32 4294901760, %v14024_v63  ;;  %v6030_v5 = vsel %vm1992_vm2, %v11662_v24, 0  ;;  %v6200_v55 = vand.u32 4294901760, %v6199_v7 }
 0x696   :  { %11673 = vtanh.f32 %v10830_v0  ;;  %v10023_v26 = vpop.f32.mrb[44].mxu0  ;;  %v6190_v60 = vand.u32 4294901760, %v6189_v40  ;;  %v15094_v11 = vand.u32 4294901760, %v14035_v20  ;;  %v14041_v17 = vand.u32 4294901760, %v6030_v5 }
 0x697   :  { %v11664_v27 = vpop.eup %11663  ;;  %v10831_v8 = vadd.f32 %v10023_v26, %v13979_v47  ;;  %v5853_v54 = vpop.f32.mrb[45].mxu0  ;;  %v6219_v51 = vsub.f32 %v14024_v63, %v15089_v49  ;;  %v14047_v22 = vand.u32 4294901760, %v6033_v3  ;;  %v10671_v7 = vpack.c.bf16 %v6532_v29, %v6525_v52 }
 0x698   :  { %v11666_v31 = vpop.eup %11665  ;;  %v10832_v30 = vadd.f32 %v13979_v47, %v5853_v54  ;;  %10067 = vmatprep.mubr.f32.mxu0 %v6190_v60  ;;  %v6209_v46 = vsub.f32 %v14035_v20, %v15094_v11  ;;  %v14054_v48 = vsub.f32 %v6030_v5, %v14041_v17  ;;  %v6039_v33 = vsel %vm1992_vm2, %v11664_v27, 0 }
 0x699   :  { %11675 = vtanh.f32 %v10831_v8  ;;  %10068 = vmatmul.mubr.f32.vlgmr.msra.gmra.mrb[64].mxu0 %v6200_v55  ;;  %v14058_v57 = vsub.f32 %v6033_v3, %v14047_v22  ;;  %v6036_v44 = vsel %vm1992_vm2, %v11666_v31, 0  ;;  %v6220_v27 = vand.u32 4294901760, %v6219_v51 }
 0x69a   :  { %11677 = vtanh.f32 %v10832_v30  ;;  %v10026_v24 = vpop.f32.mrb[46].mxu0  ;;  %v6210_v0 = vand.u32 4294901760, %v6209_v46  ;;  %v15088_v40 = vand.u32 4294901760, %v14054_v48  ;;  %v14062_v26 = vand.u32 4294901760, %v6036_v44 }
 0x69b   :  { %v11668_v60 = vpop.eup %11667  ;;  %v10833_v5 = vadd.f32 %v10026_v24, %v13979_v47  ;;  %v5865_v54 = vpop.f32.mrb[47].mxu0  ;;  %v15087_v8 = vand.u32 4294901760, %v14058_v57  ;;  %v14066_v55 = vand.u32 4294901760, %v6039_v33 }
 0x69c   :  { %v11670_v3 = vpop.eup %11669  ;;  %v10834_v31 = vadd.f32 %v13979_v47, %v5865_v54  ;;  %10070 = vmatprep.mubr.f32.mxu1 %v6210_v0  ;;  %v6229_v52 = vsub.f32 %v14054_v48, %v15088_v40  ;;  %v14073_v29 = vsub.f32 %v6036_v44, %v14062_v26  ;;  %v6045_v30 = vsel %vm1992_vm2, %v11668_v60, 0 }
 0x69d   :  { %11679 = vtanh.f32 %v10833_v5  ;;  %10071 = vmatmul.mubr.f32.vlgmr.msra.gmra.mrb[32].mxu1 %v6220_v27  ;;  %v6239_v51 = vsub.f32 %v14058_v57, %v15087_v8  ;;  %v14080_v46 = vsub.f32 %v6039_v33, %v14066_v55  ;;  %v6042_v24 = vsel %vm1992_vm2, %v11670_v3, 0 }
 0x69e   :  { %11681 = vtanh.f32 %v10834_v31  ;;  %v10029_v0 = vpop.f32.mrb[48].mxu0  ;;  %10670 = vmatpush3.bf16.msra.mxu1 %v13923_v61  ;;  %v6230_v54 = vand.u32 4294901760, %v6229_v52  ;;  %v15090_v44 = vand.u32 4294901760, %v14073_v29  ;;  %v14085_v56 = vand.u32 4294901760, %v6042_v24 }
 0x69f   :  { %15575 = vst [vmem:[#allocation27_spill] sm:$0xff] %v14080_v46  ;;  %v11672_v60 = vpop.eup %11671  ;;  %v10835_v5 = vadd.f32 %v10029_v0, %v13979_v47  ;;  %v5877_v27 = vpop.f32.mrb[49].mxu0  ;;  %v6240_v38 = vand.u32 4294901760, %v6239_v51  ;;  %v15092_v8 = vand.u32 4294901760, %v14080_v46  ;;  %v14089_v33 = vand.u32 4294901760, %v6045_v30  ;;  %10672 = vmatprep.subr.bf16.mxu1 %v10671_v7 }
 0x6a0   :  { %v11674_v3 = vpop.eup %11673  ;;  %v10836_v31 = vadd.f32 %v13979_v47, %v5877_v27  ;;  %10073 = vmatprep.mubr.f32.mxu1 %v6230_v54  ;;  %v6249_v61 = vsub.f32 %v14073_v29, %v15090_v44  ;;  %v14096_v52 = vsub.f32 %v6042_v24, %v14085_v56  ;;  %v6051_v0 = vsel %vm1992_vm2, %v11672_v60, 0 }
 0x6a1   :  { %11683 = vtanh.f32 %v10835_v5  ;;  %10074 = vmatmul.mubr.f32.gmra.mrb[34].mxu1 %v6240_v38  ;;  %v6259_v51 = vsub.f32 %v14080_v46, %v15092_v8  ;;  %v14103_v40 = vsub.f32 %v6045_v30, %v14089_v33  ;;  %v6048_v54 = vsel %vm1992_vm2, %v11674_v3, 0 }
 0x6a2   :  { %15576 = vst [vmem:[#allocation34_spill] sm:$0xff] %v14096_v52  ;;  %11685 = vtanh.f32 %v10836_v31  ;;  %v10032_v27 = vpop.f32.mrb[50].mxu0  ;;  %v6250_v49 = vand.u32 4294901760, %v6249_v61  ;;  %v15095_v44 = vand.u32 4294901760, %v14096_v52  ;;  %v14107_v24 = vand.u32 4294901760, %v6048_v54  ;;  %10674 = vmatpush3.bf16.msra.mxu1 %v10671_v7 }
 0x6a3   :  { %15577 = vst [vmem:[#allocation35_spill] sm:$0xff] %v14103_v40  ;;  %v11676_v60 = vpop.eup %11675  ;;  %v10837_v38 = vadd.f32 %v10032_v27, %v13979_v47  ;;  %v5889_v5 = vpop.f32.mrb[51].mxu0  ;;  %v6260_v50 = vand.u32 4294901760, %v6259_v51  ;;  %v15097_v8 = vand.u32 4294901760, %v14103_v40  ;;  %v14111_v10 = vand.u32 4294901760, %v6051_v0  ;;  %10676 = vmatprep.subr.bf16.mxu1 %v13938_v36 }
 0x6a4   :  { %v11678_v30 = vpop.eup %11677  ;;  %v10838_v3 = vadd.f32 %v13979_v47, %v5889_v5  ;;  %10076 = vmatprep.mubr.f32.mxu1 %v6250_v49  ;;  %v6269_v31 = vsub.f32 %v14096_v52, %v15095_v44  ;;  %v14119_v7 = vsub.f32 %v6048_v54, %v14107_v24  ;;  %v6057_v61 = vsel %vm1992_vm2, %v11676_v60, 0 }
 0x6a5   :  { %11687 = vtanh.f32 %v10837_v38  ;;  %10077 = vmatmul.mubr.f32.gmra.mrb[36].mxu1 %v6260_v50  ;;  %v6279_v51 = vsub.f32 %v14103_v40, %v15097_v8  ;;  %v14126_v27 = vsub.f32 %v6051_v0, %v14111_v10  ;;  %v6054_v49 = vsel %vm1992_vm2, %v11678_v30, 0 }
 0x6a6   :  { %15578 = vst [vmem:[#allocation43_spill] sm:$0xff] %v14119_v7  ;;  %11689 = vtanh.f32 %v10838_v3  ;;  %v10035_v5 = vpop.f32.mrb[52].mxu0  ;;  %v6270_v11 = vand.u32 4294901760, %v6269_v31  ;;  %v15100_v44 = vand.u32 4294901760, %v14119_v7  ;;  %v14130_v54 = vand.u32 4294901760, %v6054_v49  ;;  %10678 = vmatpush3.bf16.msra.mxu1 %v13938_v36 }
 0x6a7   :  { %15579 = vst [vmem:[#allocation42_spill] sm:$0xff] %v14126_v27  ;;  %v11680_v60 = vpop.eup %11679  ;;  %v10839_v50 = vadd.f32 %v10035_v5, %v13979_v47  ;;  %v5901_v38 = vpop.f32.mrb[53].mxu0  ;;  %v6280_v2 = vand.u32 4294901760, %v6279_v51  ;;  %v15102_v8 = vand.u32 4294901760, %v14126_v27  ;;  %v14135_v0 = vand.u32 4294901760, %v6057_v61  ;;  %10680 = vmatprep.subr.bf16.mxu1 %v13952_v45 }
 0x6a8   :  { %v11682_v30 = vpop.eup %11681  ;;  %v10840_v3 = vadd.f32 %v13979_v47, %v5901_v38  ;;  %10079 = vmatprep.mubr.f32.mxu1 %v6270_v11  ;;  %v6289_v31 = vsub.f32 %v14119_v7, %v15100_v44  ;;  %v14143_v36 = vsub.f32 %v6054_v49, %v14130_v54  ;;  %v6063_v5 = vsel %vm1992_vm2, %v11680_v60, 0 }
 0x6a9   :  { %11691 = vtanh.f32 %v10839_v50  ;;  %10080 = vmatmul.mubr.f32.gmra.mrb[38].mxu1 %v6280_v2  ;;  %v6299_v51 = vsub.f32 %v14126_v27, %v15102_v8  ;;  %v14150_v21 = vsub.f32 %v6057_v61, %v14135_v0  ;;  %v6060_v11 = vsel %vm1992_vm2, %v11682_v30, 0 }
 0x6aa   :  { %15580 = vst [vmem:[#allocation5_spill] sm:$0xff] %v14143_v36  ;;  %11693 = vtanh.f32 %v10840_v3  ;;  %v10038_v38 = vpop.f32.mrb[54].mxu0  ;;  %v6290_v4 = vand.u32 4294901760, %v6289_v31  ;;  %v15105_v44 = vand.u32 4294901760, %v14143_v36  ;;  %v14154_v49 = vand.u32 4294901760, %v6060_v11  ;;  %10682 = vmatpush3.bf16.msra.mxu1 %v13952_v45 }
 0x6ab   :  { %15581 = vst [vmem:[#allocation6_spill] sm:$0xff] %v14150_v21  ;;  %v11684_v60 = vpop.eup %11683  ;;  %v10841_v2 = vadd.f32 %v10038_v38, %v13979_v47  ;;  %v5913_v50 = vpop.f32.mrb[55].mxu0  ;;  %v6300_v37 = vand.u32 4294901760, %v6299_v51  ;;  %v15108_v8 = vand.u32 4294901760, %v14150_v21  ;;  %v14159_v61 = vand.u32 4294901760, %v6063_v5  ;;  %10684 = vmatprep.subr.bf16.mxu1 %v13956_v59 }
 0x6ac   :  { %15582 = vst [vmem:[#allocation17_spill] sm:$0xff] %v14154_v49  ;;  %v11686_v30 = vpop.eup %11685  ;;  %v10842_v3 = vadd.f32 %v13979_v47, %v5913_v50  ;;  %10082 = vmatprep.mubr.f32.mxu1 %v6290_v4  ;;  %v6309_v31 = vsub.f32 %v14143_v36, %v15105_v44  ;;  %v14167_v45 = vsub.f32 %v6060_v11, %v14154_v49  ;;  %v6069_v38 = vsel %vm1992_vm2, %v11684_v60, 0 }
 0x6ad   :  { %15583 = vst [vmem:[#allocation18_spill] sm:$0xff] %v14159_v61  ;;  %11695 = vtanh.f32 %v10841_v2  ;;  %10083 = vmatmul.mubr.f32.gmra.mrb[40].mxu1 %v6300_v37  ;;  %v6319_v51 = vsub.f32 %v14150_v21, %v15108_v8  ;;  %v14174_v1 = vsub.f32 %v6063_v5, %v14159_v61  ;;  %v6066_v4 = vsel %vm1992_vm2, %v11686_v30, 0 }
 0x6ae   :  { %15584 = vst [vmem:[#allocation23_spill] sm:$0xff] %v14167_v45  ;;  %11697 = vtanh.f32 %v10842_v3  ;;  %v10041_v50 = vpop.f32.mrb[56].mxu0  ;;  %v6310_v39 = vand.u32 4294901760, %v6309_v31  ;;  %v15111_v44 = vand.u32 4294901760, %v14167_v45  ;;  %v14178_v11 = vand.u32 4294901760, %v6066_v4 }
 0x6af   :  { %15585 = vst [vmem:[#allocation25_spill] sm:$0xff] %v14174_v1  ;;  %v11688_v14 = vpop.eup %11687  ;;  %v10843_v60 = vadd.f32 %v10041_v50, %v13979_v47  ;;  %v5925_v37 = vpop.f32.mrb[57].mxu0  ;;  %v6320_v2 = vand.u32 4294901760, %v6319_v51  ;;  %v15114_v32 = vand.u32 4294901760, %v14174_v1  ;;  %v14182_v8 = vand.u32 4294901760, %v6069_v38 }
 0x6b0   :  { %15586 = vst [vmem:[#allocation32_spill] sm:$0xff] %v14178_v11  ;;  %v11690_v5 = vpop.eup %11689  ;;  %v10844_v15 = vadd.f32 %v13979_v47, %v5925_v37  ;;  %10085 = vmatprep.mubr.f32.mxu1 %v6310_v39  ;;  %v6329_v30 = vsub.f32 %v14167_v45, %v15111_v44  ;;  %v14189_v3 = vsub.f32 %v6066_v4, %v14178_v11  ;;  %v6075_v31 = vsel %vm1992_vm2, %v11688_v14, 0 }
 0x6b1   :  { %15587 = vst [vmem:[#allocation33_spill] sm:$0xff] %v14182_v8  ;;  %11699 = vtanh.f32 %v10843_v60  ;;  %10086 = vmatmul.mubr.f32.gmra.mrb[42].mxu1 %v6320_v2  ;;  %v6339_v51 = vsub.f32 %v14174_v1, %v15114_v32  ;;  %v14196_v50 = vsub.f32 %v6069_v38, %v14182_v8  ;;  %v6072_v39 = vsel %vm1992_vm2, %v11690_v5, 0 }
 0x6b2   :  { %15588 = vst [vmem:[#allocation40_spill] sm:$0xff] %v14189_v3  ;;  %11701 = vtanh.f32 %v10844_v15  ;;  %v10044_v37 = vpop.f32.mrb[58].mxu0  ;;  %v6330_v25 = vand.u32 4294901760, %v6329_v30  ;;  %v15119_v44 = vand.u32 4294901760, %v14189_v3  ;;  %v14200_v4 = vand.u32 4294901760, %v6072_v39 }
 0x6b3   :  { %15589 = vst [vmem:[#allocation41_spill] sm:$0xff] %v14196_v50  ;;  %v11692_v23 = vpop.eup %11691  ;;  %v10845_v14 = vadd.f32 %v10044_v37, %v13979_v47  ;;  %v5937_v60 = vpop.f32.mrb[59].mxu0  ;;  %v6340_v2 = vand.u32 4294901760, %v6339_v51  ;;  %v15124_v41 = vand.u32 4294901760, %v14196_v50  ;;  %v14204_v32 = vand.u32 4294901760, %v6075_v31 }
 0x6b4   :  { %15590 = vst [vmem:[#allocation11_spill] sm:$0xff] %v14200_v4  ;;  %v11694_v38 = vpop.eup %11693  ;;  %v10846_v1 = vadd.f32 %v13979_v47, %v5937_v60  ;;  %10088 = vmatprep.mubr.f32.mxu1 %v6330_v25  ;;  %v6349_v15 = vsub.f32 %v14189_v3, %v15119_v44  ;;  %v14211_v5 = vsub.f32 %v6072_v39, %v14200_v4  ;;  %v6081_v30 = vsel %vm1992_vm2, %v11692_v23, 0 }
 0x6b5   :  { %15591 = vst [vmem:[#allocation12_spill] sm:$0xff] %v14204_v32  ;;  %11703 = vtanh.f32 %v10845_v14  ;;  %10089 = vmatmul.mubr.f32.gmra.mrb[44].mxu1 %v6340_v2  ;;  %v6359_v51 = vsub.f32 %v14196_v50, %v15124_v41  ;;  %v14218_v37 = vsub.f32 %v6075_v31, %v14204_v32  ;;  %v6078_v25 = vsel %vm1992_vm2, %v11694_v38, 0 }
 0x6b6   :  { %15592 = vst [vmem:[#allocation13_spill] sm:$0xff] %v14211_v5  ;;  %11705 = vtanh.f32 %v10846_v1  ;;  %v10047_v60 = vpop.f32.mrb[60].mxu0  ;;  %v6350_v45 = vand.u32 4294901760, %v6349_v15  ;;  %v15129_v44 = vand.u32 4294901760, %v14211_v5  ;;  %v14222_v39 = vand.u32 4294901760, %v6078_v25 }
 0x6b7   :  { %15593 = vst [vmem:[#allocation14_spill] sm:$0xff] %v14218_v37  ;;  %v11696_v3 = vpop.eup %11695  ;;  %v10847_v23 = vadd.f32 %v10047_v60, %v13979_v47  ;;  %v5949_v14 = vpop.f32.mrb[61].mxu0  ;;  %v6360_v2 = vand.u32 4294901760, %v6359_v51  ;;  %v15134_v21 = vand.u32 4294901760, %v14218_v37  ;;  %v14226_v41 = vand.u32 4294901760, %v6081_v30 }
 0x6b8   :  { %15594 = vst [vmem:[#allocation9_spill] sm:$0xff] %v14222_v39  ;;  %v11698_v31 = vpop.eup %11697  ;;  %v10848_v50 = vadd.f32 %v13979_v47, %v5949_v14  ;;  %10091 = vmatprep.mubr.f32.mxu1 %v6350_v45  ;;  %v6369_v1 = vsub.f32 %v14211_v5, %v15129_v44  ;;  %v14233_v38 = vsub.f32 %v6078_v25, %v14222_v39  ;;  %v6087_v15 = vsel %vm1992_vm2, %v11696_v3, 0 }
 0x6b9   :  { %15595 = vst [vmem:[#allocation10_spill] sm:$0xff] %v14226_v41  ;;  %11707 = vtanh.f32 %v10847_v23  ;;  %10092 = vmatmul.mubr.f32.gmra.mrb[46].mxu1 %v6360_v2  ;;  %v6379_v51 = vsub.f32 %v14218_v37, %v15134_v21  ;;  %v14240_v60 = vsub.f32 %v6081_v30, %v14226_v41  ;;  %v6084_v45 = vsel %vm1992_vm2, %v11698_v31, 0 }
 0x6ba   :  { %15596 = vst [vmem:[#allocation30_spill] sm:$0xff] %v14233_v38  ;;  %11709 = vtanh.f32 %v10848_v50  ;;  %v10050_v14 = vpop.f32.mrb[62].mxu0  ;;  %v6370_v36 = vand.u32 4294901760, %v6369_v1  ;;  %v15137_v44 = vand.u32 4294901760, %v14233_v38  ;;  %v14244_v25 = vand.u32 4294901760, %v6084_v45 }
 0x6bb   :  { %15597 = vst [vmem:[#allocation31_spill] sm:$0xff] %v14240_v60  ;;  %v11700_v5 = vpop.eup %11699  ;;  %v10849_v3 = vadd.f32 %v10050_v14, %v13979_v47  ;;  %v5961_v23 = vpop.f32.mrb[63].mxu0  ;;  %v6380_v2 = vand.u32 4294901760, %v6379_v51  ;;  %v15140_v27 = vand.u32 4294901760, %v14240_v60  ;;  %v14248_v21 = vand.u32 4294901760, %v6087_v15 }
 0x6bc   :  { %15598 = vst [vmem:[#allocation38_spill] sm:$0xff] %v14244_v25  ;;  %v11702_v30 = vpop.eup %11701  ;;  %v10850_v37 = vadd.f32 %v13979_v47, %v5961_v23  ;;  %10094 = vmatprep.mubr.f32.mxu1 %v6370_v36  ;;  %v6389_v50 = vsub.f32 %v14233_v38, %v15137_v44  ;;  %v14255_v31 = vsub.f32 %v6084_v45, %v14244_v25  ;;  %v6093_v1 = vsel %vm1992_vm2, %v11700_v5, 0 }
 0x6bd   :  { %15599 = vst [vmem:[#allocation39_spill] sm:$0xff] %v14248_v21  ;;  %11711 = vtanh.f32 %v10849_v3  ;;  %10095 = vmatmul.mubr.f32.gmra.mrb[48].mxu1 %v6380_v2  ;;  %v6399_v51 = vsub.f32 %v14240_v60, %v15140_v27  ;;  %v14262_v14 = vsub.f32 %v6087_v15, %v14248_v21  ;;  %v6090_v47 = vsel %vm1992_vm2, %v11702_v30, 0 }
 0x6be   :  { %15600 = vst [vmem:[#allocation3_spill] sm:$0xff] %v14255_v31  ;;  %11713 = vtanh.f32 %v10850_v37  ;;  %v6390_v36 = vand.u32 4294901760, %v6389_v50  ;;  %v15143_v23 = vand.u32 4294901760, %v14255_v31  ;;  %v14266_v44 = vand.u32 4294901760, %v6090_v47 }
 0x6bf   :  { %15601 = vst [vmem:[#allocation4_spill] sm:$0xff] %v14262_v14  ;;  %v11704_v45 = vpop.eup %11703  ;;  %v6400_v38 = vand.u32 4294901760, %v6399_v51  ;;  %v15148_v5 = vand.u32 4294901760, %v14262_v14  ;;  %v14269_v3 = vand.u32 4294901760, %v6093_v1 }
 0x6c0   :  { %15602 = vst [vmem:[#allocation7_spill] sm:$0xff] %v14266_v44  ;;  %v11706_v2 = vpop.eup %11705  ;;  %10097 = vmatprep.mubr.f32.mxu1 %v6390_v36  ;;  %v6409_v15 = vsub.f32 %v14255_v31, %v15143_v23  ;;  %v14275_v30 = vsub.f32 %v6090_v47, %v14266_v44  ;;  %v6099_v37 = vsel %vm1992_vm2, %v11704_v45, 0 }
 0x6c1   :  { %15603 = vst [vmem:[#allocation8_spill] sm:$0xff] %v14269_v3  ;;  %10098 = vmatmul.mubr.f32.gmra.mrb[50].mxu1 %v6400_v38  ;;  %v6419_v50 = vsub.f32 %v14262_v14, %v15148_v5  ;;  %v14282_v51 = vsub.f32 %v6093_v1, %v14269_v3  ;;  %v6096_v27 = vsel %vm1992_vm2, %v11706_v2, 0  ;;  %v14285_v36 = vand.u32 4294901760, %v6099_v37 }
 0x6c2   :  { %15604 = vst [vmem:[#allocation16_spill] sm:$0xff] %v14275_v30  ;;  %v6410_v60 = vand.u32 4294901760, %v6409_v15  ;;  %v15155_v23 = vand.u32 4294901760, %v14275_v30  ;;  %v14288_v31 = vand.u32 4294901760, %v6096_v27 }
 0x6c3   :  { %15605 = vst [vmem:[#allocation19_spill] sm:$0xff] %v14282_v51  ;;  %15606 = vst [vmem:[#allocation28_spill] sm:$0xff] %v14285_v36  ;;  %v11708_v47 = vpop.eup %11707  ;;  %v6420_v7 = vand.u32 4294901760, %v6419_v50  ;;  %v15158_v38 = vand.u32 4294901760, %v14282_v51  ;;  %v14292_v45 = vsub.f32 %v6099_v37, %v14285_v36 }
 0x6c4   :  { %15607 = vst [vmem:[#allocation29_spill] sm:$0xff] %v14288_v31  ;;  %v11710_v5 = vpop.eup %11709  ;;  %10100 = vmatprep.mubr.f32.mxu1 %v6410_v60  ;;  %v6429_v1 = vsub.f32 %v14275_v30, %v15155_v23  ;;  %v14298_v2 = vsub.f32 %v6096_v27, %v14288_v31  ;;  %v6105_v15 = vsel %vm1992_vm2, %v11708_v47, 0 }
 0x6c5   :  { %15608 = vst [vmem:[#allocation37_spill] sm:$0xff] %v14292_v45  ;;  %10101 = vmatmul.mubr.f32.gmra.mrb[52].mxu1 %v6420_v7  ;;  %v6439_v50 = vsub.f32 %v14282_v51, %v15158_v38  ;;  %v15163_v14 = vand.u32 4294901760, %v14292_v45  ;;  %v6102_v37 = vsel %vm1992_vm2, %v11710_v5, 0  ;;  %v14306_v40 = vand.u32 4294901760, %v6105_v15 }
 0x6c6   :  { %15609 = vst [vmem:[#allocation36_spill] sm:$0xff] %v14298_v2  ;;  %v6430_v60 = vand.u32 4294901760, %v6429_v1  ;;  %v15167_v52 = vand.u32 4294901760, %v14298_v2  ;;  %v14309_v23 = vand.u32 4294901760, %v6102_v37 }
 0x6c7   :  { %15610 = vst [vmem:[#allocation44_spill] sm:$0xff] %v14306_v40  ;;  %v11712_v27 = vpop.eup %11711  ;;  %v6440_v30 = vand.u32 4294901760, %v6439_v50  ;;  %v6459_v7 = vsub.f32 %v14292_v45, %v15163_v14  ;;  %v14315_v47 = vsub.f32 %v6105_v15, %v14306_v40 }
 0x6c8   :  { %15611 = vst [vmem:[#allocation45_spill] sm:$0xff] %v14309_v23  ;;  %v11714_v38 = vpop.eup %11713  ;;  %10103 = vmatprep.mubr.f32.mxu1 %v6430_v60  ;;  %v6449_v5 = vsub.f32 %v14298_v2, %v15167_v52  ;;  %v14321_v1 = vsub.f32 %v6102_v37, %v14309_v23  ;;  %v6111_v51 = vsel %vm1992_vm2, %v11712_v27, 0 }
 0x6c9   :  { %10104 = vmatmul.mubr.f32.gmra.mrb[54].mxu1 %v6440_v30  ;;  %v15170_v50 = vand.u32 4294901760, %v14315_v47  ;;  %v6108_v46 = vsel %vm1992_vm2, %v11714_v38, 0  ;;  %v14326_v14 = vand.u32 4294901760, %v6111_v51  ;;  %v6460_v19 = vand.u32 4294901760, %v6459_v7 }
 0x6ca   :  { %v6450_v15 = vand.u32 4294901760, %v6449_v5  ;;  %v15173_v45 = vand.u32 4294901760, %v14321_v1  ;;  %v14329_v60 = vand.u32 4294901760, %v6108_v46 }
 0x6cb   :  { %15612 = vst [vmem:[#allocation46_spill] sm:$0xff] %v14326_v14  ;;  %v6479_v37 = vsub.f32 %v14315_v47, %v15170_v50  ;;  %v14335_v52 = vsub.f32 %v6111_v51, %v14326_v14 }
 0x6cc   :  { %15613 = vst [vmem:[#allocation47_spill] sm:$0xff] %v14329_v60  ;;  %10106 = vmatprep.mubr.f32.mxu1 %v6450_v15  ;;  %v6469_v30 = vsub.f32 %v14321_v1, %v15173_v45  ;;  %v14341_v38 = vsub.f32 %v6108_v46, %v14329_v60  ;;  %v15632_v45 = vld [vmem:[#allocation3_spill] sm:$0xff] }
 0x6cd   :  { %10107 = vmatmul.mubr.f32.gmra.mrb[56].mxu1 %v6460_v19  ;;  %v15171_v27 = vand.u32 4294901760, %v14335_v52  ;;  %v6480_v2 = vand.u32 4294901760, %v6479_v37  ;;  %v15614_v19 = vand.u32 4294901760, %v13908_v12  ;;  %v15620_v37 = vld [vmem:[#allocation43_spill] sm:$0xff] }
 0x6ce   :  { %v6470_v5 = vand.u32 4294901760, %v6469_v30  ;;  %v15172_v7 = vand.u32 4294901760, %v14341_v38  ;;  %v15621_v30 = vld [vmem:[#allocation42_spill] sm:$0xff]  ;;  %v15624_v12 = vld [vmem:[#allocation23_spill] sm:$0xff] }
 0x6cf   :  { %v6499_v51 = vsub.f32 %v14335_v52, %v15171_v27  ;;  %v15630_v27 = vld [vmem:[#allocation30_spill] sm:$0xff] }
 0x6d0   :  { %10109 = vmatprep.mubr.f32.mxu1 %v6470_v5  ;;  %v6489_v15 = vsub.f32 %v14341_v38, %v15172_v7  ;;  %v15622_v5 = vld [vmem:[#allocation5_spill] sm:$0xff]  ;;  %v15631_v7 = vld [vmem:[#allocation31_spill] sm:$0xff] }
 0x6d1   :  { %10110 = vmatmul.mubr.f32.gmra.mrb[58].mxu1 %v6480_v2  ;;  %v6500_v46 = vand.u32 4294901760, %v6499_v51  ;;  %v15618_v2 = vld [vmem:[#allocation34_spill] sm:$0xff] }
 0x6d2   :  { %v6490_v50 = vand.u32 4294901760, %v6489_v15  ;;  %v15623_v51 = vld [vmem:[#allocation6_spill] sm:$0xff]  ;;  %v15625_v15 = vld [vmem:[#allocation25_spill] sm:$0xff] }
 0x6d4   :  { %10112 = vmatprep.mubr.f32.mxu1 %v6490_v50  ;;  %v15619_v50 = vld [vmem:[#allocation35_spill] sm:$0xff] }
 0x6d5   :  { %10113 = vmatmul.mubr.f32.gmra.mrb[60].mxu1 %v6500_v46  ;;  %v15626_v46 = vld [vmem:[#allocation40_spill] sm:$0xff] }
 0x6d6   :  { %10131 = vmatprep.mubr.f32.mxu1 %v13999_v35 }
 0x6d9   :  { %10132 = vmatmul.mubr.f32.vlgmr.msra.gmra.mrb[62].mxu1 %v13996_v62 }
 0x6da   :  { %10134 = vmatprep.mubr.f32.mxu1 %v14021_v34  ;;  %10686 = vmatpush3.bf16.msra.mxu1 %v13956_v59  ;;  %v15615_v59 = vld [vmem:[#allocation2_spill] sm:$0xff] }
 0x6db   :  { %10688 = vmatprep.subr.bf16.mxu1 %v13970_v18 }
 0x6dd   :  { %10135 = vmatmul.mubr.f32.gmra.mrb[32].mxu1 %v14016_v42 }
 0x6de   :  { %10137 = vmatprep.mubr.f32.mxu1 %v14041_v17  ;;  %10690 = vmatpush3.bf16.msra.mxu1 %v13970_v18  ;;  %v15616_v18 = vand.u32 4294901760, %v15615_v59  ;;  %v15628_v59 = vld [vmem:[#allocation13_spill] sm:$0xff] }
 0x6df   :  { %10692 = vmatprep.subr.bf16.mxu1 %v13974_v28 }
 0x6e1   :  { %10138 = vmatmul.mubr.f32.gmra.mrb[34].mxu1 %v14047_v22 }
 0x6e2   :  { %10140 = vmatprep.mubr.f32.mxu1 %v14062_v26  ;;  %10694 = vmatpush3.bf16.msra.mxu1 %v13974_v28  ;;  %v10715_v28 = vpack.c.bf16 %v15616_v18, %v15614_v19  ;;  %v15627_v19 = vld [vmem:[#allocation41_spill] sm:$0xff]  ;;  %v15629_v18 = vld [vmem:[#allocation14_spill] sm:$0xff] }
 0x6e3   :  { %10696 = vmatprep.subr.bf16.mxu1 %v13989_v13 }
 0x6e5   :  { %10141 = vmatmul.mubr.f32.gmra.mrb[36].mxu1 %v14066_v55 }
 0x6e6   :  { %10143 = vmatprep.mubr.f32.mxu1 %v14085_v56  ;;  %10698 = vmatpush3.bf16.msra.mxu1 %v13989_v13  ;;  %v15617_v13 = vld [vmem:[#allocation27_spill] sm:$0xff] }
 0x6e7   :  { %10700 = vmatprep.subr.bf16.mxu1 %v13796_v58 }
 0x6e9   :  { %10144 = vmatmul.mubr.f32.gmra.mrb[38].mxu1 %v14089_v33 }
 0x6ea   :  { %10146 = vmatprep.mubr.f32.mxu1 %v14107_v24 }
 0x6ed   :  { %10147 = vmatmul.mubr.f32.gmra.mrb[40].mxu1 %v14111_v10 }
 0x6ee   :  { %10149 = vmatprep.mubr.f32.mxu1 %v14130_v54 }
 0x6f1   :  { %10150 = vmatmul.mubr.f32.gmra.mrb[42].mxu1 %v14135_v0 }
 0x6f2   :  { %10152 = vmatprep.mubr.f32.mxu1 %v14154_v49 }
 0x6f5   :  { %10153 = vmatmul.mubr.f32.gmra.mrb[44].mxu1 %v14159_v61 }
 0x6f6   :  { %10155 = vmatprep.mubr.f32.mxu1 %v14178_v11  ;;  %v15647_v11 = vld [vmem:[#allocation21_spill] sm:$0xff] }
 0x6f7   :  { %v15648_v61 = vand.u32 4294901760, %v15647_v11  ;;  %v15663_v11 = vand.u32 4294901760, %v15623_v51 }
 0x6f9   :  { %10156 = vmatmul.mubr.f32.gmra.mrb[46].mxu1 %v14182_v8 }
 0x6fa   :  { %10158 = vmatprep.mubr.f32.mxu1 %v14200_v4  ;;  %v15645_v4 = vld [vmem:[#allocation15_spill] sm:$0xff] }
 0x6fb   :  { %v15646_v8 = vand.u32 4294901760, %v15645_v4  ;;  %v15656_v4 = vand.u32 4294901760, %v14073_v29 }
 0x6fd   :  { %10159 = vmatmul.mubr.f32.gmra.mrb[48].mxu1 %v14204_v32  ;;  %v15644_v32 = vand.u32 4294901760, %v14035_v20  ;;  %v10723_v49 = vpack.c.bf16 %v15648_v61, %v15646_v8  ;;  %v15662_v61 = vand.u32 4294901760, %v15622_v5 }
 0x6fe   :  { %10161 = vmatprep.mubr.f32.mxu1 %v14222_v39  ;;  %v15643_v39 = vand.u32 4294901760, %v14002_v53 }
 0x701   :  { %10162 = vmatmul.mubr.f32.gmra.mrb[50].mxu1 %v14226_v41 }
 0x702   :  { %10164 = vmatprep.mubr.f32.mxu1 %v14244_v25 }
 0x705   :  { %10165 = vmatmul.mubr.f32.gmra.mrb[52].mxu1 %v14248_v21  ;;  %v15641_v21 = vld [vmem:[#allocation26_spill] sm:$0xff] }
 0x706   :  { %10167 = vmatprep.mubr.f32.mxu1 %v14266_v44  ;;  %v15642_v25 = vand.u32 4294901760, %v15641_v21  ;;  %v15651_v21 = vld [vmem:[#allocation24_spill] sm:$0xff] }
 0x709   :  { %10168 = vmatmul.mubr.f32.gmra.mrb[54].mxu1 %v14269_v3  ;;  %v15639_v3 = vld [vmem:[#allocation22_spill] sm:$0xff] }
 0x70a   :  { %10170 = vmatprep.mubr.f32.mxu1 %v14288_v31  ;;  %v15638_v31 = vand.u32 4294901760, %v14011_v16  ;;  %v15640_v44 = vand.u32 4294901760, %v15639_v3  ;;  %v15665_v3 = vand.u32 4294901760, %v15625_v15 }
 0x70c   :  { %v10719_v41 = vpack.c.bf16 %v15642_v25, %v15640_v44  ;;  %v15653_v44 = vld [vmem:[#allocation20_spill] sm:$0xff]  ;;  %v15664_v25 = vand.u32 4294901760, %v15624_v12 }
 0x70d   :  { %10171 = vmatmul.mubr.f32.gmra.mrb[56].mxu1 %v14285_v36  ;;  %v15637_v36 = vld [vmem:[#allocation37_spill] sm:$0xff] }
 0x70e   :  { %10173 = vmatprep.mubr.f32.mxu1 %v14309_v23  ;;  %v15636_v23 = vld [vmem:[#allocation36_spill] sm:$0xff] }
 0x711   :  { %10174 = vmatmul.mubr.f32.gmra.mrb[58].mxu1 %v14306_v40  ;;  %v15635_v40 = vld [vmem:[#allocation19_spill] sm:$0xff] }
 0x712   :  { %10176 = vmatprep.mubr.f32.mxu1 %v14329_v60  ;;  %v15634_v60 = vld [vmem:[#allocation16_spill] sm:$0xff] }
 0x715   :  { %10177 = vmatmul.mubr.f32.gmra.mrb[60].mxu1 %v14326_v14  ;;  %v15633_v14 = vld [vmem:[#allocation4_spill] sm:$0xff] }
 0x716   :  { %10195 = vmatprep.mubr.f32.mxu1 %v14011_v16  ;;  %v15649_v16 = vand.u32 4294901760, %v14024_v63 }
 0x719   :  { %10196 = vmatmul.mubr.f32.vlgmr.msra.gmra.mrb[62].mxu1 %v14002_v53  ;;  %v15652_v53 = vand.u32 4294901760, %v15651_v21  ;;  %v15698_v21 = vld [vmem:[#allocation47_spill] sm:$0xff] }
 0x71a   :  { %10198 = vmatprep.mubr.f32.mxu1 %v14035_v20  ;;  %10702 = vmatpush3.bf16.msra.mxu1 %v13796_v58  ;;  %v15654_v20 = vand.u32 4294901760, %v15653_v44 }
 0x71b   :  { %10704 = vmatprep.subr.bf16.mxu1 %v13806_v43 }
 0x71d   :  { %10199 = vmatmul.mubr.f32.gmra.mrb[32].mxu1 %v14024_v63  ;;  %v15657_v63 = vand.u32 4294901760, %v15617_v13 }
 0x71e   :  { %10201 = vmatprep.mubr.f32.mxu1 %v14054_v48  ;;  %10706 = vmatpush3.bf16.msra.mxu1 %v13806_v43 }
 0x71f   :  { %10708 = vmatprep.subr.bf16.mxu1 %v13887_v9 }
 0x721   :  { %10202 = vmatmul.mubr.f32.gmra.mrb[34].mxu1 %v14058_v57 }
 0x722   :  { %10204 = vmatprep.mubr.f32.mxu1 %v14073_v29  ;;  %10710 = vmatpush3.bf16.msra.mxu1 %v13887_v9 }
 0x723   :  { %10712 = vmatprep.subr.bf16.mxu1 %v13899_v6 }
 0x725   :  { %10205 = vmatmul.mubr.f32.gmra.mrb[36].mxu1 %v15617_v13  ;;  %v15667_v13 = vand.u32 4294901760, %v15627_v19 }
 0x726   :  { %10207 = vmatprep.mubr.f32.mxu1 %v15618_v2  ;;  %10714 = vmatpush3.bf16.msra.mxu1 %v13899_v6 }
 0x727   :  { %10716 = vmatprep.subr.bf16.mxu1 %v10715_v28 }
 0x729   :  { %10208 = vmatmul.mubr.f32.gmra.mrb[38].mxu1 %v15619_v50 }
 0x72a   :  { %10210 = vmatprep.mubr.f32.mxu1 %v15620_v37 }
 0x72d   :  { %10211 = vmatmul.mubr.f32.gmra.mrb[40].mxu1 %v15621_v30 }
 0x72e   :  { %10213 = vmatprep.mubr.f32.mxu1 %v15622_v5  ;;  %v15672_v5 = vand.u32 4294901760, %v15632_v45 }
 0x731   :  { %10214 = vmatmul.mubr.f32.gmra.mrb[42].mxu1 %v15623_v51  ;;  %v15673_v51 = vand.u32 4294901760, %v15633_v14 }
 0x732   :  { %10216 = vmatprep.mubr.f32.mxu1 %v15624_v12  ;;  %v15674_v12 = vand.u32 4294901760, %v15634_v60 }
 0x735   :  { %10217 = vmatmul.mubr.f32.gmra.mrb[44].mxu1 %v15625_v15  ;;  %v15675_v15 = vand.u32 4294901760, %v15635_v40 }
 0x736   :  { %10219 = vmatprep.mubr.f32.mxu1 %v15626_v46 }
 0x739   :  { %10220 = vmatmul.mubr.f32.gmra.mrb[46].mxu1 %v15627_v19  ;;  %v15693_v19 = vld [vmem:[#allocation8_spill] sm:$0xff] }
 0x73a   :  { %10222 = vmatprep.mubr.f32.mxu1 %v15628_v59 }
 0x73d   :  { %10223 = vmatmul.mubr.f32.gmra.mrb[48].mxu1 %v15629_v18 }
 0x73e   :  { %10225 = vmatprep.mubr.f32.mxu1 %v15630_v27 }
 0x741   :  { %10226 = vmatmul.mubr.f32.gmra.mrb[50].mxu1 %v15631_v7 }
 0x742   :  { %10228 = vmatprep.mubr.f32.mxu1 %v15632_v45  ;;  %v15679_v45 = vand.u32 4294901760, %v14315_v47 }
 0x745   :  { %10229 = vmatmul.mubr.f32.gmra.mrb[52].mxu1 %v15633_v14  ;;  %v15680_v14 = vand.u32 4294901760, %v14341_v38 }
 0x746   :  { %10231 = vmatprep.mubr.f32.mxu1 %v15634_v60  ;;  %v15681_v60 = vand.u32 4294901760, %v14335_v52 }
 0x749   :  { %10232 = vmatmul.mubr.f32.gmra.mrb[54].mxu1 %v15635_v40  ;;  %v15685_v40 = vld [vmem:[#allocation33_spill] sm:$0xff] }
 0x74a   :  { %10234 = vmatprep.mubr.f32.mxu1 %v15636_v23 }
 0x74d   :  { %10235 = vmatmul.mubr.f32.gmra.mrb[56].mxu1 %v15637_v36 }
 0x74e   :  { %10237 = vmatprep.mubr.f32.mxu1 %v14321_v1 }
 0x751   :  { %10238 = vmatmul.mubr.f32.gmra.mrb[58].mxu1 %v14315_v47  ;;  %v15690_v47 = vld [vmem:[#allocation38_spill] sm:$0xff] }
 0x752   :  { %10240 = vmatprep.mubr.f32.mxu1 %v14341_v38  ;;  %v15692_v38 = vld [vmem:[#allocation7_spill] sm:$0xff] }
 0x755   :  { %10241 = vmatmul.mubr.f32.gmra.mrb[60].mxu1 %v14335_v52  ;;  %v15686_v52 = vld [vmem:[#allocation11_spill] sm:$0xff] }
 0x756   :  { %10259 = vmatprep.mubr.f32.mxu1 %v15638_v31  ;;  %v15650_v31 = vand.u32 4294901760, %v14054_v48  ;;  %v15658_v48 = vand.u32 4294901760, %v15618_v2  ;;  %v15668_v2 = vand.u32 4294901760, %v15628_v59  ;;  %v15694_v59 = vld [vmem:[#allocation29_spill] sm:$0xff] }
 0x759   :  { %10260 = vmatmul.mubr.f32.vlgmr.msra.gmra.mrb[62].mxu1 %v15643_v39  ;;  %v15655_v39 = vand.u32 4294901760, %v14058_v57  ;;  %v15660_v57 = vand.u32 4294901760, %v15620_v37  ;;  %v15670_v37 = vand.u32 4294901760, %v15630_v27  ;;  %v15677_v27 = vand.u32 4294901760, %v15637_v36  ;;  %v15689_v36 = vld [vmem:[#allocation10_spill] sm:$0xff] }
 0x75a   :  { %10262 = vmatprep.mubr.f32.mxu1 %v15644_v32  ;;  %10718 = vmatpush3.bf16.msra.mxu1 %v10715_v28  ;;  %v10727_v32 = vpack.c.bf16 %v15654_v20, %v15652_v53  ;;  %v15666_v28 = vand.u32 4294901760, %v15626_v46  ;;  %v15676_v46 = vand.u32 4294901760, %v15636_v23  ;;  %v15688_v23 = vld [vmem:[#allocation9_spill] sm:$0xff]  ;;  %v15699_v53 = vld [vmem:[#allocation46_spill] sm:$0xff] }
 0x75b   :  { %10720 = vmatprep.subr.bf16.mxu1 %v10719_v41 }
 0x75d   :  { %10263 = vmatmul.mubr.f32.gmra.mrb[32].mxu1 %v15649_v16  ;;  %v15696_v16 = vld [vmem:[#allocation45_spill] sm:$0xff] }
 0x75e   :  { %10265 = vmatprep.mubr.f32.mxu1 %v15650_v31  ;;  %10722 = vmatpush3.bf16.msra.mxu1 %v10719_v41  ;;  %v15659_v41 = vand.u32 4294901760, %v15619_v50  ;;  %v15669_v50 = vand.u32 4294901760, %v15629_v18  ;;  %v15695_v18 = vld [vmem:[#allocation28_spill] sm:$0xff] }
 0x75f   :  { %10724 = vmatprep.subr.bf16.mxu1 %v10723_v49  ;;  %v15697_v31 = vld [vmem:[#allocation44_spill] sm:$0xff] }
 0x761   :  { %10266 = vmatmul.mubr.f32.gmra.mrb[34].mxu1 %v15655_v39 }
 0x762   :  { %10268 = vmatprep.mubr.f32.mxu1 %v15656_v4  ;;  %10726 = vmatpush3.bf16.msra.mxu1 %v10723_v49  ;;  %v15661_v49 = vand.u32 4294901760, %v15621_v30  ;;  %v15671_v30 = vand.u32 4294901760, %v15631_v7  ;;  %v15678_v7 = vand.u32 4294901760, %v14321_v1  ;;  %v15691_v1 = vld [vmem:[#allocation39_spill] sm:$0xff] }
 0x763   :  { %10728 = vmatprep.subr.bf16.mxu1 %v10727_v32 }
 0x765   :  { %10269 = vmatmul.mubr.f32.gmra.mrb[36].mxu1 %v15657_v63 }
 0x766   :  { %10271 = vmatprep.mubr.f32.mxu1 %v15658_v48  ;;  %10730 = vmatpush3.bf16.msra.mxu1 %v10727_v32 }
 0x767   :  { %10732 = vmatprep.subr.bf16.mxu1 %v13796_v58 }
 0x769   :  { %10272 = vmatmul.mubr.f32.gmra.mrb[38].mxu1 %v15659_v41 }
 0x76a   :  { %10274 = vmatprep.mubr.f32.mxu1 %v15660_v57 }
 0x76c   :  { %v14469_v8 = vpop.f32.mrb[64].mxu0 }
 0x76d   :  { %v14471_v29 = vpop.f32.mrb[65].mxu0  ;;  %10275 = vmatmul.mubr.f32.gmra.mrb[40].mxu1 %v15661_v49 }
 0x76e   :  { %10277 = vmatprep.mubr.f32.mxu1 %v15662_v61 }
 0x771   :  { %10278 = vmatmul.mubr.f32.gmra.mrb[42].mxu1 %v15663_v11 }
 0x772   :  { %10280 = vmatprep.mubr.f32.mxu1 %v15664_v25 }
 0x775   :  { %10281 = vmatmul.mubr.f32.gmra.mrb[44].mxu1 %v15665_v3 }
 0x776   :  { %10283 = vmatprep.mubr.f32.mxu1 %v15666_v28 }
 0x779   :  { %10284 = vmatmul.mubr.f32.gmra.mrb[46].mxu1 %v15667_v13 }
 0x77a   :  { %10286 = vmatprep.mubr.f32.mxu1 %v15668_v2 }
 0x77d   :  { %10287 = vmatmul.mubr.f32.gmra.mrb[48].mxu1 %v15669_v50 }
 0x77e   :  { %10289 = vmatprep.mubr.f32.mxu1 %v15670_v37 }
 0x781   :  { %10290 = vmatmul.mubr.f32.gmra.mrb[50].mxu1 %v15671_v30 }
 0x782   :  { %10292 = vmatprep.mubr.f32.mxu1 %v15672_v5 }
 0x785   :  { %10293 = vmatmul.mubr.f32.gmra.mrb[52].mxu1 %v15673_v51 }
 0x786   :  { %10295 = vmatprep.mubr.f32.mxu1 %v15674_v12 }
 0x789   :  { %10296 = vmatmul.mubr.f32.gmra.mrb[54].mxu1 %v15675_v15 }
 0x78a   :  { %10298 = vmatprep.mubr.f32.mxu1 %v15676_v46 }
 0x78d   :  { %10299 = vmatmul.mubr.f32.gmra.mrb[56].mxu1 %v15677_v27 }
 0x78e   :  { %10301 = vmatprep.mubr.f32.mxu1 %v15678_v7 }
 0x791   :  { %10302 = vmatmul.mubr.f32.gmra.mrb[58].mxu1 %v15679_v45 }
 0x792   :  { %10304 = vmatprep.mubr.f32.mxu1 %v15680_v14 }
 0x795   :  { %10305 = vmatmul.mubr.f32.gmra.mrb[60].mxu1 %v15681_v60 }
 0x796   :  { %10323 = vmatprep.mubr.f32.mxu1 %v13999_v35 }
 0x799   :  { %10324 = vmatmul.mubr.f32.vlgmr.msra.gmra.mrb[62].mxu1 %v13996_v62 }
 0x79a   :  { %10326 = vmatprep.mubr.f32.mxu1 %v14021_v34  ;;  %10734 = vmatpush3.bf16.msra.mxu1 %v13796_v58  ;;  %v15682_v58 = vld [vmem:[#allocation17_spill] sm:$0xff] }
 0x79b   :  { %10736 = vmatprep.subr.bf16.mxu1 %v13806_v43 }
 0x79d   :  { %10327 = vmatmul.mubr.f32.gmra.mrb[32].mxu1 %v14016_v42 }
 0x79e   :  { %10329 = vmatprep.mubr.f32.mxu1 %v14041_v17  ;;  %10738 = vmatpush3.bf16.msra.mxu1 %v13806_v43  ;;  %v15683_v43 = vld [vmem:[#allocation18_spill] sm:$0xff] }
 0x79f   :  { %10740 = vmatprep.subr.bf16.mxu1 %v13887_v9 }
 0x7a1   :  { %10330 = vmatmul.mubr.f32.gmra.mrb[34].mxu1 %v14047_v22 }
 0x7a2   :  { %10332 = vmatprep.mubr.f32.mxu1 %v14062_v26  ;;  %10742 = vmatpush3.bf16.msra.mxu1 %v13887_v9  ;;  %v15684_v9 = vld [vmem:[#allocation32_spill] sm:$0xff] }
 0x7a3   :  { %10744 = vmatprep.subr.bf16.mxu1 %v13899_v6 }
 0x7a5   :  { %10333 = vmatmul.mubr.f32.gmra.mrb[36].mxu1 %v14066_v55 }
 0x7a6   :  { %10335 = vmatprep.mubr.f32.mxu1 %v14085_v56  ;;  %10746 = vmatpush3.bf16.msra.mxu1 %v13899_v6  ;;  %v15687_v6 = vld [vmem:[#allocation12_spill] sm:$0xff] }
 0x7a9   :  { %10336 = vmatmul.mubr.f32.gmra.mrb[38].mxu1 %v14089_v33 }
 0x7aa   :  { %10338 = vmatprep.mubr.f32.mxu1 %v14107_v24 }
 0x7ad   :  { %10339 = vmatmul.mubr.f32.gmra.mrb[40].mxu1 %v14111_v10 }
 0x7ae   :  { %10341 = vmatprep.mubr.f32.mxu1 %v14130_v54 }
 0x7b1   :  { %10342 = vmatmul.mubr.f32.gmra.mrb[42].mxu1 %v14135_v0 }
 0x7b2   :  { %10344 = vmatprep.mubr.f32.mxu1 %v15682_v58 }
 0x7b5   :  { %10345 = vmatmul.mubr.f32.gmra.mrb[44].mxu1 %v15683_v43 }
 0x7b6   :  { %10347 = vmatprep.mubr.f32.mxu1 %v15684_v9 }
 0x7b9   :  { %10348 = vmatmul.mubr.f32.gmra.mrb[46].mxu1 %v15685_v40 }
 0x7ba   :  { %10350 = vmatprep.mubr.f32.mxu1 %v15686_v52 }
 0x7bd   :  { %10351 = vmatmul.mubr.f32.gmra.mrb[48].mxu1 %v15687_v6 }
 0x7be   :  { %10353 = vmatprep.mubr.f32.mxu1 %v15688_v23 }
 0x7c1   :  { %10354 = vmatmul.mubr.f32.gmra.mrb[50].mxu1 %v15689_v36 }
 0x7c2   :  { %10356 = vmatprep.mubr.f32.mxu1 %v15690_v47 }
 0x7c5   :  { %10357 = vmatmul.mubr.f32.gmra.mrb[52].mxu1 %v15691_v1 }
 0x7c6   :  { %10359 = vmatprep.mubr.f32.mxu1 %v15692_v38 }
 0x7c9   :  { %10360 = vmatmul.mubr.f32.gmra.mrb[54].mxu1 %v15693_v19 }
 0x7ca   :  { %10362 = vmatprep.mubr.f32.mxu1 %v15694_v59 }
 0x7cd   :  { %10363 = vmatmul.mubr.f32.gmra.mrb[56].mxu1 %v15695_v18 }
 0x7ce   :  { %10365 = vmatprep.mubr.f32.mxu1 %v15696_v16 }
 0x7d1   :  { %10366 = vmatmul.mubr.f32.gmra.mrb[58].mxu1 %v15697_v31 }
 0x7d2   :  { %10368 = vmatprep.mubr.f32.mxu1 %v15698_v21 }
 0x7d5   :  { %10369 = vmatmul.mubr.f32.gmra.mrb[60].mxu1 %v15699_v53 }
 0x7d6   :  { %10387 = vmatprep.mubr.f32.mxu1 %v13999_v35 }
 0x7d9   :  { %10388 = vmatmul.mubr.f32.vlgmr.msra.gmra.mrb[62].mxu1 %v13996_v62 }
 0x7da   :  { %10390 = vmatprep.mubr.f32.mxu1 %v14021_v34 }
 0x7dd   :  { %10391 = vmatmul.mubr.f32.gmra.mrb[32].mxu1 %v14016_v42 }
 0x7de   :  { %10393 = vmatprep.mubr.f32.mxu1 %v14041_v17 }
 0x7e1   :  { %10394 = vmatmul.mubr.f32.gmra.mrb[34].mxu1 %v14047_v22 }
 0x7e2   :  { %10396 = vmatprep.mubr.f32.mxu1 %v14062_v26 }
 0x7e5   :  { %10397 = vmatmul.mubr.f32.gmra.mrb[36].mxu1 %v14066_v55 }
 0x7e6   :  { %10399 = vmatprep.mubr.f32.mxu1 %v14085_v56 }
 0x7e9   :  { %10400 = vmatmul.mubr.f32.gmra.mrb[38].mxu1 %v14089_v33 }
 0x7ea   :  { %10402 = vmatprep.mubr.f32.mxu1 %v14107_v24 }
 0x7ed   :  { %10403 = vmatmul.mubr.f32.gmra.mrb[40].mxu1 %v14111_v10  ;;  %v14589_v10 = vld [vmem:[%s14755_s2 + $0x3] ss:$0 sm:$0xff] }
 0x7ee   :  { %10405 = vmatprep.mubr.f32.mxu1 %v14130_v54  ;;  %v6203_v56 = vadd.f32 %v14469_v8, %v14589_v10  ;;  %v6193_v62 = vadd.f32 %v14589_v10, %v14471_v29 }
 0x7f1   :  { %10406 = vmatmul.mubr.f32.gmra.mrb[42].mxu1 %v14135_v0 }
 0x7f2   :  { %10408 = vmatprep.mubr.f32.mxu1 %v15682_v58 }
 0x7f5   :  { %10409 = vmatmul.mubr.f32.gmra.mrb[44].mxu1 %v15683_v43 }
 0x7f6   :  { %10411 = vmatprep.mubr.f32.mxu1 %v15684_v9 }
 0x7f9   :  { %10412 = vmatmul.mubr.f32.gmra.mrb[46].mxu1 %v15685_v40 }
 0x7fa   :  { %10414 = vmatprep.mubr.f32.mxu1 %v15686_v52 }
 0x7fd   :  { %10415 = vmatmul.mubr.f32.gmra.mrb[48].mxu1 %v15687_v6 }
 0x7fe   :  { %10417 = vmatprep.mubr.f32.mxu1 %v15688_v23 }
 0x801   :  { %10418 = vmatmul.mubr.f32.gmra.mrb[50].mxu1 %v15689_v36 }
 0x802   :  { %10420 = vmatprep.mubr.f32.mxu1 %v15690_v47 }
 0x805   :  { %10421 = vmatmul.mubr.f32.gmra.mrb[52].mxu1 %v15691_v1 }
 0x806   :  { %10423 = vmatprep.mubr.f32.mxu1 %v15692_v38 }
 0x809   :  { %10424 = vmatmul.mubr.f32.gmra.mrb[54].mxu1 %v15693_v19 }
 0x80a   :  { %10426 = vmatprep.mubr.f32.mxu1 %v15694_v59 }
 0x80d   :  { %10427 = vmatmul.mubr.f32.gmra.mrb[56].mxu1 %v15695_v18 }
 0x80e   :  { %10429 = vmatprep.mubr.f32.mxu1 %v15696_v16 }
 0x811   :  { %10430 = vmatmul.mubr.f32.gmra.mrb[58].mxu1 %v15697_v31 }
 0x812   :  { %10432 = vmatprep.mubr.f32.mxu1 %v15698_v21 }
 0x815   :  { %10433 = vmatmul.mubr.f32.gmra.mrb[60].mxu1 %v15699_v53 }
 0x8ac   :  { %v10389_v35 = vpop.f32.mrb[62].mxu1 }
 0x8ad   :  { %v10852_v42 = vadd.f32 %v10389_v35, %v6203_v56  ;;  %v7793_v34 = vpop.f32.mrb[63].mxu1 }
 0x8ae   :  { %v10854_v17 = vadd.f32 %v7793_v34, %v6193_v62 }
 0x8af   :  { %7984 = vst.msk [vmem:[%s14756_s3 + $0x8] sm:$0xff] %vm53_vm1, %v10852_v42 }
 0x8b0   :  { %7983 = vst.msk [vmem:[%s14756_s3] sm:$0xff] %vm53_vm1, %v10854_v17  ;;  %v10392_v22 = vpop.f32.mrb[32].mxu1 }
 0x8b1   :  { %v10855_v26 = vadd.f32 %v10392_v22, %v14589_v10  ;;  %v7805_v55 = vpop.f32.mrb[33].mxu1 }
 0x8b2   :  { %v10856_v33 = vadd.f32 %v14589_v10, %v7805_v55 }
 0x8b3   :  { %7986 = vst.msk [vmem:[%s14756_s3 + $0x18] sm:$0xff] %vm53_vm1, %v10855_v26 }
 0x8b4   :  { %7985 = vst.msk [vmem:[%s14756_s3 + $0x10] sm:$0xff] %vm53_vm1, %v10856_v33  ;;  %v10395_v24 = vpop.f32.mrb[34].mxu1 }
 0x8b5   :  { %v10857_v54 = vadd.f32 %v10395_v24, %v14589_v10  ;;  %v7817_v0 = vpop.f32.mrb[35].mxu1 }
 0x8b6   :  { %v10858_v44 = vadd.f32 %v14589_v10, %v7817_v0 }
 0x8b7   :  { %7988 = vst.msk [vmem:[%s14756_s3 + $0x28] sm:$0xff] %vm53_vm1, %v10857_v54 }
 0x8b8   :  { %7987 = vst.msk [vmem:[%s14756_s3 + $0x20] sm:$0xff] %vm53_vm1, %v10858_v44  ;;  %v10398_v20 = vpop.f32.mrb[36].mxu1 }
 0x8b9   :  { %v10859_v32 = vadd.f32 %v10398_v20, %v14589_v10  ;;  %v7829_v39 = vpop.f32.mrb[37].mxu1 }
 0x8ba   :  { %v10860_v4 = vadd.f32 %v14589_v10, %v7829_v39 }
 0x8bb   :  { %7990 = vst.msk [vmem:[%s14756_s3 + $0x38] sm:$0xff] %vm53_vm1, %v10859_v32 }
 0x8bc   :  { %7989 = vst.msk [vmem:[%s14756_s3 + $0x30] sm:$0xff] %vm53_vm1, %v10860_v4  ;;  %v10401_v63 = vpop.f32.mrb[38].mxu1 }
 0x8bd   :  { %v10861_v48 = vadd.f32 %v10401_v63, %v14589_v10  ;;  %v7841_v41 = vpop.f32.mrb[39].mxu1 }
 0x8be   :  { %v10862_v57 = vadd.f32 %v14589_v10, %v7841_v41 }
 0x8bf   :  { %7992 = vst.msk [vmem:[%s14756_s3 + $0x48] sm:$0xff] %vm53_vm1, %v10861_v48 }
 0x8c0   :  { %7991 = vst.msk [vmem:[%s14756_s3 + $0x40] sm:$0xff] %vm53_vm1, %v10862_v57  ;;  %v10404_v8 = vpop.f32.mrb[40].mxu1 }
 0x8c1   :  { %v10863_v29 = vadd.f32 %v10404_v8, %v14589_v10  ;;  %v7853_v49 = vpop.f32.mrb[41].mxu1 }
 0x8c2   :  { %v10864_v61 = vadd.f32 %v14589_v10, %v7853_v49 }
 0x8c3   :  { %7994 = vst.msk [vmem:[%s14756_s3 + $0x58] sm:$0xff] %vm53_vm1, %v10863_v29 }
 0x8c4   :  { %7993 = vst.msk [vmem:[%s14756_s3 + $0x50] sm:$0xff] %vm53_vm1, %v10864_v61  ;;  %v10407_v11 = vpop.f32.mrb[42].mxu1 }
 0x8c5   :  { %v10865_v25 = vadd.f32 %v10407_v11, %v14589_v10  ;;  %v7865_v3 = vpop.f32.mrb[43].mxu1 }
 0x8c6   :  { %v10866_v28 = vadd.f32 %v14589_v10, %v7865_v3 }
 0x8c7   :  { %7996 = vst.msk [vmem:[%s14756_s3 + $0x68] sm:$0xff] %vm53_vm1, %v10865_v25 }
 0x8c8   :  { %7995 = vst.msk [vmem:[%s14756_s3 + $0x60] sm:$0xff] %vm53_vm1, %v10866_v28  ;;  %v10410_v13 = vpop.f32.mrb[44].mxu1 }
 0x8c9   :  { %v10867_v2 = vadd.f32 %v10410_v13, %v14589_v10  ;;  %v7877_v50 = vpop.f32.mrb[45].mxu1 }
 0x8ca   :  { %v10868_v37 = vadd.f32 %v14589_v10, %v7877_v50 }
 0x8cb   :  { %7998 = vst.msk [vmem:[%s14756_s3 + $0x78] sm:$0xff] %vm53_vm1, %v10867_v2 }
 0x8cc   :  { %7997 = vst.msk [vmem:[%s14756_s3 + $0x70] sm:$0xff] %vm53_vm1, %v10868_v37  ;;  %v10413_v30 = vpop.f32.mrb[46].mxu1 }
 0x8cd   :  { %v10869_v5 = vadd.f32 %v10413_v30, %v14589_v10  ;;  %v7889_v51 = vpop.f32.mrb[47].mxu1 }
 0x8ce   :  { %v10870_v12 = vadd.f32 %v14589_v10, %v7889_v51 }
 0x8cf   :  { %8000 = vst.msk [vmem:[%s14756_s3 + $0x88] sm:$0xff] %vm53_vm1, %v10869_v5 }
 0x8d0   :  { %7999 = vst.msk [vmem:[%s14756_s3 + $0x80] sm:$0xff] %vm53_vm1, %v10870_v12  ;;  %v10416_v15 = vpop.f32.mrb[48].mxu1 }
 0x8d1   :  { %v10871_v46 = vadd.f32 %v10416_v15, %v14589_v10  ;;  %v7901_v27 = vpop.f32.mrb[49].mxu1 }
 0x8d2   :  { %v10872_v7 = vadd.f32 %v14589_v10, %v7901_v27 }
 0x8d3   :  { %8002 = vst.msk [vmem:[%s14756_s3 + $0x98] sm:$0xff] %vm53_vm1, %v10871_v46 }
 0x8d4   :  { %8001 = vst.msk [vmem:[%s14756_s3 + $0x90] sm:$0xff] %vm53_vm1, %v10872_v7  ;;  %v10419_v45 = vpop.f32.mrb[50].mxu1 }
 0x8d5   :  { %v10873_v14 = vadd.f32 %v10419_v45, %v14589_v10  ;;  %v7913_v60 = vpop.f32.mrb[51].mxu1 }
 0x8d6   :  { %v10874_v58 = vadd.f32 %v14589_v10, %v7913_v60 }
 0x8d7   :  { %8004 = vst.msk [vmem:[%s14756_s3 + $0xa8] sm:$0xff] %vm53_vm1, %v10873_v14 }
 0x8d8   :  { %8003 = vst.msk [vmem:[%s14756_s3 + $0xa0] sm:$0xff] %vm53_vm1, %v10874_v58  ;;  %v10422_v43 = vpop.f32.mrb[52].mxu1 }
 0x8d9   :  { %v10875_v9 = vadd.f32 %v10422_v43, %v14589_v10  ;;  %v7925_v40 = vpop.f32.mrb[53].mxu1 }
 0x8da   :  { %v10876_v52 = vadd.f32 %v14589_v10, %v7925_v40 }
 0x8db   :  { %8006 = vst.msk [vmem:[%s14756_s3 + $0xb8] sm:$0xff] %vm53_vm1, %v10875_v9 }
 0x8dc   :  { %8005 = vst.msk [vmem:[%s14756_s3 + $0xb0] sm:$0xff] %vm53_vm1, %v10876_v52  ;;  %v10425_v6 = vpop.f32.mrb[54].mxu1 }
 0x8dd   :  { %v10877_v23 = vadd.f32 %v10425_v6, %v14589_v10  ;;  %v7937_v36 = vpop.f32.mrb[55].mxu1 }
 0x8de   :  { %v10878_v47 = vadd.f32 %v14589_v10, %v7937_v36 }
 0x8df   :  { %8008 = vst.msk [vmem:[%s14756_s3 + $0xc8] sm:$0xff] %vm53_vm1, %v10877_v23 }
 0x8e0   :  { %8007 = vst.msk [vmem:[%s14756_s3 + $0xc0] sm:$0xff] %vm53_vm1, %v10878_v47  ;;  %v10428_v1 = vpop.f32.mrb[56].mxu1 }
 0x8e1   :  { %v10879_v38 = vadd.f32 %v10428_v1, %v14589_v10  ;;  %v7949_v19 = vpop.f32.mrb[57].mxu1 }
 0x8e2   :  { %v10880_v59 = vadd.f32 %v14589_v10, %v7949_v19 }
 0x8e3   :  { %8010 = vst.msk [vmem:[%s14756_s3 + $0xd8] sm:$0xff] %vm53_vm1, %v10879_v38 }
 0x8e4   :  { %8009 = vst.msk [vmem:[%s14756_s3 + $0xd0] sm:$0xff] %vm53_vm1, %v10880_v59  ;;  %v10431_v18 = vpop.f32.mrb[58].mxu1 }
 0x8e5   :  { %v10881_v16 = vadd.f32 %v10431_v18, %v14589_v10  ;;  %v7961_v31 = vpop.f32.mrb[59].mxu1 }
 0x8e6   :  { %v10882_v21 = vadd.f32 %v14589_v10, %v7961_v31 }
 0x8e7   :  { %8012 = vst.msk [vmem:[%s14756_s3 + $0xe8] sm:$0xff] %vm53_vm1, %v10881_v16 }
 0x8e8   :  { %8011 = vst.msk [vmem:[%s14756_s3 + $0xe0] sm:$0xff] %vm53_vm1, %v10882_v21  ;;  %v10434_v53 = vpop.f32.mrb[60].mxu1 }
 0x8e9   :  { %v10883_v56 = vadd.f32 %v10434_v53, %v14589_v10  ;;  %v7973_v62 = vpop.f32.mrb[61].mxu1 }
 0x8ea   :  { %v10884_v35 = vadd.f32 %v14589_v10, %v7973_v62 }
 0x8eb   :  { %8014 = vst.msk [vmem:[%s14756_s3 + $0xf8] sm:$0xff] %vm53_vm1, %v10883_v56 }
 0x8ec   :  { %8013 = vst.msk [vmem:[%s14756_s3 + $0xf0] sm:$0xff] %vm53_vm1, %v10884_v35 }

</bundles_post_ra>
